<compile_context>
chip_gen: v7x
topology: tpu7x:2x2x1
jax: 0.10.0
libtpu: 0.0.40
codegen_flags: <defaults>
</compile_context>

<pallas_src>
import numpy as np
import jax
import jax.numpy as jnp
from jax import lax
from jax.experimental import pallas as pl
from jax.experimental.pallas import tpu as pltpu

# ----------------------------- configuration --------------------------------
NPNA = 2            # npnalayers
GRAPH_IN = 20       # graphin / pnain   (divisible by TOWERS)
EDGE_DIM = 6        # edgedim
TOWERS = 5
F_IN = GRAPH_IN     # divide_input=False -> full width per tower
F_OUT = GRAPH_IN // TOWERS
N_AGG = 4           # mean, min, max, std
N_SCALE = 3         # identity, amplification, attenuation
N_SA = N_AGG * N_SCALE
PREDICT_NODE = 16
N_FING_LAYERS = 2   # nfinglayers
FING_DIM = 24       # fingdim
FINGER_NODE = 32
FINGER_OUT = 16
MLP_OUT = 16
MLP_NODE = 32
DROPOUT = 0.2       # eval mode -> identity
N_HEADS = 7

NUM_GRAPHS = 2
NODES_PER_GRAPH = 6
BN_EPS = 1e-5

W = TOWERS * F_IN           # 100 = tower-concatenated pre-NN width
W_PAD = 128                 # lane-aligned padded width of the pre-NN slab
assert W <= W_PAD
_BIG = 1e30


def _dot(a, b):
    return jnp.dot(a, b, preferred_element_type=jnp.float32)


# ------------------------- static parameter-slab layout ----------------------
def _build_layout():
    entries = []
    for l in range(NPNA):
        entries += [
            (f"p{l}_wpre_i", F_IN, W_PAD),      # acts on x_i (dst gather)
            (f"p{l}_wpre_j", F_IN, W_PAD),      # acts on x_j (src gather)
            (f"p{l}_wpre_e", EDGE_DIM, W_PAD),  # edge-encoder folded in
            (f"p{l}_bpre", 1, W_PAD),
            (f"p{l}_wx", GRAPH_IN, GRAPH_IN),   # post-NN x-block @ lin @ BN
            (f"p{l}_bout", 1, GRAPH_IN),
        ]
    entries += [
        ("mlp_w0", GRAPH_IN, MLP_NODE), ("mlp_b0", 1, MLP_NODE),
        ("mlp_w1", MLP_NODE, MLP_NODE), ("mlp_b1", 1, MLP_NODE),
        ("mlp_w2c", MLP_NODE, PREDICT_NODE),    # mlp.w2 @ conn_w[:MLP_OUT]
    ]
    in_dim = FING_DIM
    for i in range(N_FING_LAYERS):
        entries += [(f"fing{i}_w", in_dim, FINGER_NODE),
                    (f"fing{i}_b", 1, FINGER_NODE)]
        in_dim = FINGER_NODE
    entries += [
        ("fing_oc", FINGER_NODE, PREDICT_NODE),  # finger-out @ conn_w[MLP_OUT:]
        ("conn_b", 1, PREDICT_NODE),
        ("heads_w", PREDICT_NODE, N_HEADS),
        ("heads_b", 1, N_HEADS),
    ]
    layout, off = {}, 0
    for name, r, c in entries:
        layout[name] = (off, r, c)
        off += (r + 7) & ~7       # 8-row (sublane) aligned blocks
    return layout, off


LAYOUT, SLAB_ROWS = _build_layout()


# ------------------------------ fused kernel --------------------------------
def _net_kernel(x_ref, ea_ref, gsrc_ref, mask_ref, pool_ref, fing_ref,
                avg_ref, par_ref, wagg_ref, out_ref):
    """Whole Net forward (eval mode), everything VMEM-resident.

    par_ref  : (SLAB_ROWS, 128) f32 slab of all small weights/biases
    wagg_ref : (NPNA, 12*128, 20) f32 stacked post-aggregation weights
               (post-NN block-diag @ PNAConv.lin @ folded BatchNorm)
    avg_ref  : (1, 1) f32 in SMEM = avg_deg['log']
    """
    f32 = jnp.float32

    def P(name):                         # static carve from the parameter slab
        off, r, c = LAYOUT[name]
        return par_ref[off:off + r, :c]

    x = x_ref[...]                       # (N, GRAPH_IN) f32
    ea = ea_ref[...]                     # (E, EDGE_DIM) f32
    gsrc = gsrc_ref[...].astype(f32)     # (E, N) one-hot: gathers x[src]
    mask = mask_ref[...].astype(f32)     # (N, E) one-hot: scatter to dst nodes
    pool = pool_ref[...].astype(f32)     # (B, N) one-hot: global_add_pool
    avg_log = avg_ref[0, 0]

    # ---- degree statistics & scalers (shared by every PNA layer) ----
    deg_raw = jnp.sum(mask, axis=1, keepdims=True)   # (N, 1) in-degree
    has_nb = deg_raw > 0.0
    deg = jnp.maximum(deg_raw, 1.0)                  # PyG clamps deg >= 1
    inv_deg = 1.0 / deg                              # exact division
    logd = jnp.log(deg + 1.0)
    amp = logd / avg_log                             # amplification scaler
    att = avg_log / logd                             # attenuation scaler
    pen = (1.0 - mask)[:, :, None] * _BIG            # (N, E, 1), built once

    # ---------------------------- PNA stack ----------------------------
    for l in range(NPNA):
        # gathers as one-hot matmuls on the MXU; x_i uses mask^T (== gdst)
        x_i = lax.dot_general(mask, x, (((0,), (0,)), ((), ())),
                              preferred_element_type=f32)          # (E, 20)
        x_j = _dot(gsrc, x)                                         # (E, 20)
        # fused tower pre-NNs, edge encoder folded in; concat folded into the
        # row-split weights; width padded to 128 lanes (tail columns are 0).
        h = (_dot(x_i, P(f"p{l}_wpre_i")) + _dot(x_j, P(f"p{l}_wpre_j"))
             + _dot(ea, P(f"p{l}_wpre_e")) + P(f"p{l}_bpre"))       # (E, 128)

        # segment mean/std via one-hot matmuls (MXU)
        ssum = _dot(mask, h)                                        # (N, 128)
        ssq = _dot(mask, h * h)
        mean = ssum * inv_deg
        var = ssq * inv_deg - mean * mean
        std = jnp.sqrt(jnp.maximum(var, 0.0) + 1e-5)

        # segment min/max via additive penalty (hoisted) + cross-sublane reduce
        hb = h[None, :, :]
        mn = jnp.where(has_nb, jnp.min(hb + pen, axis=1), 0.0)      # (N, 128)
        mx = jnp.where(has_nb, jnp.max(hb - pen, axis=1), 0.0)

        # one big (N, 12*128) @ (12*128, 20) contraction replaces the 12
        # per-(scaler, aggregator) matmuls; PNAConv.lin + BN folded in.
        aggcat = jnp.concatenate([mean, mn, mx, std], axis=-1)      # (N, 512)
        slab = jnp.concatenate([aggcat, aggcat * amp, aggcat * att],
                               axis=-1)                             # (N, 1536)
        y = _dot(x, P(f"p{l}_wx")) + _dot(slab, wagg_ref[l]) + P(f"p{l}_bout")
        x = jnp.maximum(y, 0.0)                                     # BN+ReLU

    # ---------------------- global_add_pool + graph MLP ----------------------
    pooled = _dot(pool, x)                                          # (B, 20)
    hm = jnp.maximum(_dot(pooled, P("mlp_w0")) + P("mlp_b0"), 0.0)
    hm = jnp.maximum(_dot(hm, P("mlp_w1")) + P("mlp_b1"), 0.0)
    # mlp.w2 is folded into mlp_w2c (no nonlinearity in between)

    # ------------------------- fingerprint branch ---------------------------
    f = fing_ref[...]
    for i in range(N_FING_LAYERS):
        # TODO(synk): Dropout is identity (eval mode); train-mode RNG dropout not implemented.
        f = jnp.maximum(_dot(f, P(f"fing{i}_w")) + P(f"fing{i}_b"), 0.0)
    # finger output linear is folded into fing_oc

    # fully connected ([mlp | finger] concat folded into two matmuls) + heads
    pre = _dot(hm, P("mlp_w2c")) + _dot(f, P("fing_oc")) + P("conn_b")
    dmr2 = jnp.maximum(pre, 0.0)
    out_ref[...] = _dot(dmr2, P("heads_w")) + P("heads_b")          # (B, 7)


# ----------------------------- wrapper / glue --------------------------------
@jax.jit
def net_forward(param_slab, w_agg_stack, x, edge_index, edge_attr, batch,
                fingerprint, avg_deg_log):
    """Full Net forward as a single fused Pallas kernel."""
    f32 = jnp.float32
    x = x.astype(f32)
    edge_attr = edge_attr.astype(f32)
    fingerprint = fingerprint.astype(f32)
    src, dst = edge_index[0], edge_index[1]
    n_nodes = x.shape[0]
    n_graphs = fingerprint.shape[0]

    # one-hot gather/scatter/pool matrices in bf16 (exact 0/1, half the bytes);
    # gdst is NOT shipped: x_i is recovered from mask with a transposed dot.
    node_ids = jnp.arange(n_nodes, dtype=jnp.int32)
    gsrc = (src[:, None] == node_ids[None, :]).astype(jnp.bfloat16)   # (E, N)
    mask = (node_ids[:, None] == dst[None, :]).astype(jnp.bfloat16)   # (N, E)
    pool = (jnp.arange(n_graphs, dtype=jnp.int32)[:, None] ==
            batch[None, :]).astype(jnp.bfloat16)                      # (B, N)
    avg = jnp.reshape(jnp.asarray(avg_deg_log, f32), (1, 1))

    vm = pl.BlockSpec(memory_space=pltpu.MemorySpace.VMEM)
    sm = pl.BlockSpec(memory_space=pltpu.MemorySpace.SMEM)
    # TODO(synk): for large graphs on v7x, add a "parallel" node-block grid
    # axis (and block the min/max over edges) so the second TensorCore is used.
    return pl.pallas_call(
        _net_kernel,
        out_shape=jax.ShapeDtypeStruct((n_graphs, N_HEADS), f32),
        in_specs=[vm, vm, vm, vm, vm, vm, sm, vm, vm],
        out_specs=vm,
        compiler_params=pltpu.CompilerParams(vmem_limit_bytes=32 * 1024 * 1024),
    )(x, edge_attr, gsrc, mask, pool, fingerprint, avg, param_slab, w_agg_stack)


# ----------------------------- parameter packing -----------------------------
def _fold_bn(gamma, beta, mean, var, eps=BN_EPS):
    gamma, beta = np.asarray(gamma, np.float32), np.asarray(beta, np.float32)
    mean, var = np.asarray(mean, np.float32), np.asarray(var, np.float32)
    scale = gamma / np.sqrt(var + eps)
    shift = beta - mean * scale
    return scale, shift


def _pack_post_weights(w_post_list, b_post_list):
    """Pack per-tower post-NN Linear((1+12)*F_IN, F_OUT) weights into:
       w_x (F_IN, GRAPH_IN), w_agg (12, TOWERS*F_IN, GRAPH_IN), b (GRAPH_IN,)"""
    w_x = np.zeros((F_IN, GRAPH_IN), np.float32)
    w_agg = np.zeros((N_SA, TOWERS * F_IN, GRAPH_IN), np.float32)
    b = np.zeros((GRAPH_IN,), np.float32)
    for t in range(TOWERS):
        wt = np.asarray(w_post_list[t], np.float32)
        cols = slice(t * F_OUT, (t + 1) * F_OUT)
        w_x[:, cols] = wt[:F_IN]
        for sa in range(N_SA):
            w_agg[sa, t * F_IN:(t + 1) * F_IN, cols] = \
                wt[F_IN + sa * F_IN:F_IN + (sa + 1) * F_IN]
        b[cols] = np.asarray(b_post_list[t], np.float32)
    return jnp.asarray(w_x), jnp.asarray(w_agg), jnp.asarray(b)


def pack_params(params):
    """Fold adjacent linears / eval BatchNorm and pack everything into
    (a) one (SLAB_ROWS, 128) slab and (b) one (NPNA, 12*128, 20) stack."""
    slab = np.zeros((SLAB_ROWS, W_PAD), np.float32)

    def put(name, arr):
        off, r, c = LAYOUT[name]
        a = np.asarray(arr, np.float32)
        if a.ndim == 1:
            a = a.reshape(1, -1)
        assert a.shape[0] == r and a.shape[1] <= c, (name, a.shape, (r, c))
        slab[off:off + r, :a.shape[1]] = a

    w_agg_stack = np.zeros((NPNA, N_SA * W_PAD, GRAPH_IN), np.float32)
    for l, p in enumerate(params["pna"]):
        s, t = _fold_bn(p["bn_g"], p["bn_b"], p["bn_m"], p["bn_v"])
        wlin_s = np.asarray(p["w_lin"], np.float32) * s[None, :]   # lin*BN
        wpre = np.asarray(p["w_pre3"], np.float32)                 # (3, 20, 100)
        put(f"p{l}_wpre_i", wpre[0])
        put(f"p{l}_wpre_j", wpre[1])
        put(f"p{l}_wpre_e", np.asarray(p["w_edge"], np.float32) @ wpre[2])
        put(f"p{l}_bpre", np.asarray(p["b_pre"], np.float32)
            + np.asarray(p["b_edge"], np.float32) @ wpre[2])
        put(f"p{l}_wx", np.asarray(p["w_post_x"], np.float32) @ wlin_s)
        put(f"p{l}_bout", np.asarray(p["b_post"], np.float32) @ wlin_s
            + np.asarray(p["b_lin"], np.float32) * s + t)
        wagg = np.asarray(p["w_post_agg"], np.float32)             # (12, 100, 20)
        for sa in range(N_SA):
            w_agg_stack[l, sa * W_PAD: sa * W_PAD + W, :] = wagg[sa] @ wlin_s

    (w0, b0), (w1, b1), (w2, b2) = params["mlp"]
    wc = np.asarray(params["conn_w"], np.float32)
    wc_m, wc_f = wc[:MLP_OUT], wc[MLP_OUT:]
    put("mlp_w0", w0); put("mlp_b0", b0)
    put("mlp_w1", w1); put("mlp_b1", b1)
    put("mlp_w2c", np.asarray(w2, np.float32) @ wc_m)

    for i, lp in enumerate(params["fing"]):
        s, t = _fold_bn(lp["bn_g"], lp["bn_b"], lp["bn_m"], lp["bn_v"])
        put(f"fing{i}_w", np.asarray(lp["w"], np.float32) * s[None, :])
        put(f"fing{i}_b", np.asarray(lp["b"], np.float32) * s + t)
    wfo, bfo = params["fing_out"]
    put("fing_oc", np.asarray(wfo, np.float32) @ wc_f)

    put("conn_b", np.asarray(params["conn_b"], np.float32)
        + np.asarray(b2, np.float32) @ wc_m + np.asarray(bfo, np.float32) @ wc_f)
    put("heads_w", params["heads_w"])
    put("heads_b", params["heads_b"])
    return jnp.asarray(slab), jnp.asarray(w_agg_stack)


# ----------------------------- parameter init -------------------------------
def init_params(key):
    keys = iter(jax.random.split(key, 256))

    def nrm(shape, scale=0.1):
        return scale * jax.random.normal(next(keys), shape, dtype=jnp.float32)

    params = {"pna": []}
    for _ in range(NPNA):
        w_post = [nrm(((N_SA + 1) * F_IN, F_OUT)) for _ in range(TOWERS)]
        b_post = [nrm((F_OUT,)) for _ in range(TOWERS)]
        w_px, w_pagg, b_post_packed = _pack_post_weights(w_post, b_post)
        params["pna"].append({
            "w_edge": nrm((EDGE_DIM, F_IN)), "b_edge": nrm((F_IN,)),
            "w_pre3": nrm((3, F_IN, TOWERS * F_IN)), "b_pre": nrm((TOWERS * F_IN,)),
            "w_post_x": w_px, "w_post_agg": w_pagg, "b_post": b_post_packed,
            "w_lin": nrm((GRAPH_IN, GRAPH_IN)), "b_lin": nrm((GRAPH_IN,)),
            "bn_g": 1.0 + nrm((GRAPH_IN,)), "bn_b": nrm((GRAPH_IN,)),
            "bn_m": nrm((GRAPH_IN,)), "bn_v": 1.0 + jnp.abs(nrm((GRAPH_IN,))),
        })

    params["mlp"] = [
        (nrm((GRAPH_IN, MLP_NODE)), nrm((MLP_NODE,))),
        (nrm((MLP_NODE, MLP_NODE)), nrm((MLP_NODE,))),
        (nrm((MLP_NODE, MLP_OUT)), nrm((MLP_OUT,))),
    ]

    fing, in_dim = [], FING_DIM
    for _ in range(N_FING_LAYERS):
        fing.append({
            "w": nrm((in_dim, FINGER_NODE)), "b": nrm((FINGER_NODE,)),
            "bn_g": 1.0 + nrm((FINGER_NODE,)), "bn_b": nrm((FINGER_NODE,)),
            "bn_m": nrm((FINGER_NODE,)), "bn_v": 1.0 + jnp.abs(nrm((FINGER_NODE,))),
        })
        in_dim = FINGER_NODE
    params["fing"] = fing
    params["fing_out"] = (nrm((FINGER_NODE, FINGER_OUT)), nrm((FINGER_OUT,)))

    params["conn_w"] = nrm((MLP_OUT + FINGER_OUT, PREDICT_NODE))
    params["conn_b"] = nrm((PREDICT_NODE,))
    # 7 prediction heads fused into one (PREDICT_NODE, 7) weight
    params["heads_w"] = nrm((PREDICT_NODE, N_HEADS))
    params["heads_b"] = nrm((N_HEADS,))
    return params


# --------------------------------- main --------------------------------------
if __name__ == "__main__":
    key = jax.random.PRNGKey(0)
    kp, kx, ke, kf = jax.random.split(key, 4)
    params = init_params(kp)
    param_slab, w_agg_stack = pack_params(params)   # host-side folding/packing

    # small synthetic batch of 2 graphs: bidirectional ring per graph
    src, dst = [], []
    for g in range(NUM_GRAPHS):
        off = g * NODES_PER_GRAPH
        for i in range(NODES_PER_GRAPH):
            j = (i + 1) % NODES_PER_GRAPH
            src += [off + i, off + j]
            dst += [off + j, off + i]
    edge_index = jnp.array([src, dst], dtype=jnp.int32)          # (2, E)
    n_nodes = NUM_GRAPHS * NODES_PER_GRAPH
    n_edges = edge_index.shape[1]

    x = jax.random.normal(kx, (n_nodes, GRAPH_IN), dtype=jnp.float32)
    edge_attr = jax.random.normal(ke, (n_edges, EDGE_DIM), dtype=jnp.float32)
    batch = jnp.repeat(jnp.arange(NUM_GRAPHS, dtype=jnp.int32), NODES_PER_GRAPH)
    fingerprint = jax.random.normal(kf, (NUM_GRAPHS, FING_DIM), dtype=jnp.float32)

    # PNAConv `deg` histogram -> avg_deg['log'] (same formula as torch_geometric)
    in_deg = np.bincount(np.asarray(dst), minlength=n_nodes)
    hist = np.bincount(in_deg).astype(np.float64)
    avg_deg_log = float((np.log(np.arange(len(hist)) + 1.0) * hist).sum() / hist.sum())

    props = net_forward(param_slab, w_agg_stack, x, edge_index, edge_attr,
                        batch, fingerprint, jnp.float32(avg_deg_log))
    jax.block_until_ready(props)
    # (B, 7): one column per prediction head (property1..property7)
    assert props.shape == (NUM_GRAPHS, N_HEADS)
    print("KERNEL_OK")
</pallas_src>

<mosaic_0001>
module attributes {stable_mosaic.version = 11 : i64} {
  func.func @_net_kernel(%arg0: memref<12x20xf32, #tpu.memory_space<vmem>>, %arg1: memref<24x6xf32, #tpu.memory_space<vmem>>, %arg2: memref<24x12xbf16, #tpu.memory_space<vmem>>, %arg3: memref<12x24xbf16, #tpu.memory_space<vmem>>, %arg4: memref<2x12xbf16, #tpu.memory_space<vmem>>, %arg5: memref<2x24xf32, #tpu.memory_space<vmem>>, %arg6: memref<1x1xf32, #tpu.memory_space<smem>>, %arg7: memref<432x128xf32, #tpu.memory_space<vmem>>, %arg8: memref<2x1536x20xf32, #tpu.memory_space<vmem>>, %arg9: memref<2x7xf32, #tpu.memory_space<vmem>>) attributes {dimension_semantics = [], scalar_prefetch = 0 : i64, scratch_operands = 0 : i64, tpu.core_type = #tpu.core_type<tc>} {
    %c0 = arith.constant 0 : index
    %c0_0 = arith.constant 0 : index
    %0 = vector.load %arg0[%c0, %c0_0] : memref<12x20xf32, #tpu.memory_space<vmem>>, vector<12x20xf32>
    %c0_1 = arith.constant 0 : index
    %c0_2 = arith.constant 0 : index
    %1 = vector.load %arg1[%c0_1, %c0_2] : memref<24x6xf32, #tpu.memory_space<vmem>>, vector<24x6xf32>
    %c0_3 = arith.constant 0 : index
    %c0_4 = arith.constant 0 : index
    %2 = vector.load %arg2[%c0_3, %c0_4] : memref<24x12xbf16, #tpu.memory_space<vmem>>, vector<24x12xbf16>
    %3 = arith.extf %2 : vector<24x12xbf16> to vector<24x12xf32>
    %c0_5 = arith.constant 0 : index
    %c0_6 = arith.constant 0 : index
    %4 = vector.load %arg3[%c0_5, %c0_6] : memref<12x24xbf16, #tpu.memory_space<vmem>>, vector<12x24xbf16>
    %5 = arith.extf %4 : vector<12x24xbf16> to vector<12x24xf32>
    %c0_7 = arith.constant 0 : index
    %c0_8 = arith.constant 0 : index
    %6 = vector.load %arg4[%c0_7, %c0_8] : memref<2x12xbf16, #tpu.memory_space<vmem>>, vector<2x12xbf16>
    %7 = arith.extf %6 : vector<2x12xbf16> to vector<2x12xf32>
    %c0_9 = arith.constant 0 : index
    %c0_10 = arith.constant 0 : index
    %8 = memref.load %arg6[%c0_9, %c0_10] : memref<1x1xf32, #tpu.memory_space<smem>>
    %cst = arith.constant dense<0.000000e+00> : vector<12xf32>
    %9 = vector.multi_reduction <add>, %5, %cst [1] : vector<12x24xf32> to vector<12xf32>
    %10 = vector.shape_cast %9 : vector<12xf32> to vector<12x1xf32>
    %cst_11 = arith.constant 0.000000e+00 : f32
    %11 = vector.broadcast %cst_11 : f32 to vector<12x1xf32>
    %12 = arith.cmpf ogt, %10, %11 : vector<12x1xf32>
    %cst_12 = arith.constant 1.000000e+00 : f32
    %13 = vector.broadcast %cst_12 : f32 to vector<12x1xf32>
    %14 = arith.maximumf %10, %13 : vector<12x1xf32>
    %cst_13 = arith.constant 1.000000e+00 : f32
    %15 = vector.broadcast %cst_13 : f32 to vector<12x1xf32>
    %16 = arith.divf %15, %14 : vector<12x1xf32>
    %cst_14 = arith.constant 1.000000e+00 : f32
    %17 = vector.broadcast %cst_14 : f32 to vector<12x1xf32>
    %18 = arith.addf %14, %17 : vector<12x1xf32>
    %19 = math.log %18 : vector<12x1xf32>
    %20 = vector.broadcast %8 : f32 to vector<12x1xf32>
    %21 = arith.divf %19, %20 : vector<12x1xf32>
    %22 = vector.broadcast %8 : f32 to vector<12x1xf32>
    %23 = arith.divf %22, %19 : vector<12x1xf32>
    %cst_15 = arith.constant 1.000000e+00 : f32
    %24 = vector.broadcast %cst_15 : f32 to vector<12x24xf32>
    %25 = arith.subf %24, %5 : vector<12x24xf32>
    %26 = vector.shape_cast %25 : vector<12x24xf32> to vector<12x24x1xf32>
    %cst_16 = arith.constant 1.000000e+30 : f32
    %27 = vector.broadcast %cst_16 : f32 to vector<12x24x1xf32>
    %28 = arith.mulf %26, %27 : vector<12x24x1xf32>
    %cst_17 = arith.constant dense<0.000000e+00> : vector<24x20xf32>
    %29 = tpu.matmul %5, %0, %cst_17 {dimension_numbers = #tpu.dot_dimension_numbers<[0], [0], [1], [1], [0, 1, 1, 1], [], []>} : vector<12x24xf32>, vector<12x20xf32>, vector<24x20xf32> -> vector<24x20xf32>
    %cst_18 = arith.constant dense<0.000000e+00> : vector<24x20xf32>
    %30 = tpu.matmul %3, %0, %cst_18 {dimension_numbers = #tpu.dot_dimension_numbers<[1], [0], [0], [1], [0, 0, 1, 1], [], []>} : vector<24x12xf32>, vector<12x20xf32>, vector<24x20xf32> -> vector<24x20xf32>
    %c0_19 = arith.constant 0 : index
    %c0_20 = arith.constant 0 : index
    %31 = vector.load %arg7[%c0_19, %c0_20] : memref<432x128xf32, #tpu.memory_space<vmem>>, vector<20x128xf32>
    %cst_21 = arith.constant dense<0.000000e+00> : vector<24x128xf32>
    %32 = tpu.matmul %29, %31, %cst_21 {dimension_numbers = #tpu.dot_dimension_numbers<[1], [0], [0], [1], [0, 0, 1, 1], [], []>} : vector<24x20xf32>, vector<20x128xf32>, vector<24x128xf32> -> vector<24x128xf32>
    %c24 = arith.constant 24 : index
    %c0_22 = arith.constant 0 : index
    %33 = vector.load %arg7[%c24, %c0_22] : memref<432x128xf32, #tpu.memory_space<vmem>>, vector<20x128xf32>
    %cst_23 = arith.constant dense<0.000000e+00> : vector<24x128xf32>
    %34 = tpu.matmul %30, %33, %cst_23 {dimension_numbers = #tpu.dot_dimension_numbers<[1], [0], [0], [1], [0, 0, 1, 1], [], []>} : vector<24x20xf32>, vector<20x128xf32>, vector<24x128xf32> -> vector<24x128xf32>
    %35 = arith.addf %32, %34 : vector<24x128xf32>
    %c48 = arith.constant 48 : index
    %c0_24 = arith.constant 0 : index
    %36 = vector.load %arg7[%c48, %c0_24] : memref<432x128xf32, #tpu.memory_space<vmem>>, vector<6x128xf32>
    %cst_25 = arith.constant dense<0.000000e+00> : vector<24x128xf32>
    %37 = tpu.matmul %1, %36, %cst_25 {dimension_numbers = #tpu.dot_dimension_numbers<[1], [0], [0], [1], [0, 0, 1, 1], [], []>} : vector<24x6xf32>, vector<6x128xf32>, vector<24x128xf32> -> vector<24x128xf32>
    %38 = arith.addf %35, %37 : vector<24x128xf32>
    %c56 = arith.constant 56 : index
    %c0_26 = arith.constant 0 : index
    %39 = vector.load %arg7[%c56, %c0_26] : memref<432x128xf32, #tpu.memory_space<vmem>>, vector<1x128xf32>
    %40 = vector.broadcast %39 : vector<1x128xf32> to vector<24x128xf32>
    %41 = arith.addf %38, %40 : vector<24x128xf32>
    %cst_27 = arith.constant dense<0.000000e+00> : vector<12x128xf32>
    %42 = tpu.matmul %5, %41, %cst_27 {dimension_numbers = #tpu.dot_dimension_numbers<[1], [0], [0], [1], [0, 0, 1, 1], [], []>} : vector<12x24xf32>, vector<24x128xf32>, vector<12x128xf32> -> vector<12x128xf32>
    %43 = arith.mulf %41, %41 : vector<24x128xf32>
    %cst_28 = arith.constant dense<0.000000e+00> : vector<12x128xf32>
    %44 = tpu.matmul %5, %43, %cst_28 {dimension_numbers = #tpu.dot_dimension_numbers<[1], [0], [0], [1], [0, 0, 1, 1], [], []>} : vector<12x24xf32>, vector<24x128xf32>, vector<12x128xf32> -> vector<12x128xf32>
    %45 = vector.broadcast %16 : vector<12x1xf32> to vector<12x128xf32>
    %46 = arith.mulf %42, %45 : vector<12x128xf32>
    %47 = vector.broadcast %16 : vector<12x1xf32> to vector<12x128xf32>
    %48 = arith.mulf %44, %47 : vector<12x128xf32>
    %49 = arith.mulf %46, %46 : vector<12x128xf32>
    %50 = arith.subf %48, %49 : vector<12x128xf32>
    %cst_29 = arith.constant 0.000000e+00 : f32
    %51 = vector.broadcast %cst_29 : f32 to vector<12x128xf32>
    %52 = arith.maximumf %50, %51 : vector<12x128xf32>
    %cst_30 = arith.constant 9.99999974E-6 : f32
    %53 = vector.broadcast %cst_30 : f32 to vector<12x128xf32>
    %54 = arith.addf %52, %53 : vector<12x128xf32>
    %55 = math.sqrt %54 : vector<12x128xf32>
    %56 = vector.shape_cast %41 : vector<24x128xf32> to vector<1x24x128xf32>
    %57 = vector.broadcast %56 : vector<1x24x128xf32> to vector<12x24x128xf32>
    %58 = vector.broadcast %28 : vector<12x24x1xf32> to vector<12x24x128xf32>
    %59 = arith.addf %57, %58 : vector<12x24x128xf32>
    %cst_31 = arith.constant dense<0x7F800000> : vector<12x128xf32>
    %60 = vector.multi_reduction <minimumf>, %59, %cst_31 [1] : vector<12x24x128xf32> to vector<12x128xf32>
    %cst_32 = arith.constant 0.000000e+00 : f32
    %61 = vector.shape_cast %12 : vector<12x1xi1> to vector<12x1xi1>
    %62 = vector.broadcast %61 : vector<12x1xi1> to vector<12x128xi1>
    %63 = vector.broadcast %cst_32 : f32 to vector<12x128xf32>
    %64 = arith.select %62, %60, %63 : vector<12x128xi1>, vector<12x128xf32>
    %65 = vector.broadcast %56 : vector<1x24x128xf32> to vector<12x24x128xf32>
    %66 = vector.broadcast %28 : vector<12x24x1xf32> to vector<12x24x128xf32>
    %67 = arith.subf %65, %66 : vector<12x24x128xf32>
    %cst_33 = arith.constant dense<0xFF800000> : vector<12x128xf32>
    %68 = vector.multi_reduction <maximumf>, %67, %cst_33 [1] : vector<12x24x128xf32> to vector<12x128xf32>
    %cst_34 = arith.constant 0.000000e+00 : f32
    %69 = vector.shape_cast %12 : vector<12x1xi1> to vector<12x1xi1>
    %70 = vector.broadcast %69 : vector<12x1xi1> to vector<12x128xi1>
    %71 = vector.broadcast %cst_34 : f32 to vector<12x128xf32>
    %72 = arith.select %70, %68, %71 : vector<12x128xi1>, vector<12x128xf32>
    %73 = tpu.concatenate %46, %64, %72, %55 in 1 : vector<12x128xf32>, vector<12x128xf32>, vector<12x128xf32>, vector<12x128xf32> -> vector<12x512xf32>
    %74 = vector.broadcast %21 : vector<12x1xf32> to vector<12x512xf32>
    %75 = arith.mulf %73, %74 : vector<12x512xf32>
    %76 = vector.broadcast %23 : vector<12x1xf32> to vector<12x512xf32>
    %77 = arith.mulf %73, %76 : vector<12x512xf32>
    %78 = tpu.concatenate %73, %75, %77 in 1 : vector<12x512xf32>, vector<12x512xf32>, vector<12x512xf32> -> vector<12x1536xf32>
    %c64 = arith.constant 64 : index
    %c0_35 = arith.constant 0 : index
    %79 = vector.load %arg7[%c64, %c0_35] : memref<432x128xf32, #tpu.memory_space<vmem>>, vector<20x20xf32>
    %cst_36 = arith.constant dense<0.000000e+00> : vector<12x20xf32>
    %80 = tpu.matmul %0, %79, %cst_36 {dimension_numbers = #tpu.dot_dimension_numbers<[1], [0], [0], [1], [0, 0, 1, 1], [], []>} : vector<12x20xf32>, vector<20x20xf32>, vector<12x20xf32> -> vector<12x20xf32>
    %c0_37 = arith.constant 0 : index
    %c0_38 = arith.constant 0 : index
    %c0_39 = arith.constant 0 : index
    %81 = vector.load %arg8[%c0_37, %c0_38, %c0_39] : memref<2x1536x20xf32, #tpu.memory_space<vmem>>, vector<1x1536x20xf32>
    %82 = vector.shape_cast %81 : vector<1x1536x20xf32> to vector<1536x20xf32>
    %cst_40 = arith.constant dense<0.000000e+00> : vector<12x20xf32>
    %83 = tpu.matmul %78, %82, %cst_40 {dimension_numbers = #tpu.dot_dimension_numbers<[1], [0], [0], [1], [0, 0, 1, 1], [], []>} : vector<12x1536xf32>, vector<1536x20xf32>, vector<12x20xf32> -> vector<12x20xf32>
    %84 = arith.addf %80, %83 : vector<12x20xf32>
    %c88 = arith.constant 88 : index
    %c0_41 = arith.constant 0 : index
    %85 = vector.load %arg7[%c88, %c0_41] : memref<432x128xf32, #tpu.memory_space<vmem>>, vector<1x20xf32>
    %86 = vector.broadcast %85 : vector<1x20xf32> to vector<12x20xf32>
    %87 = arith.addf %84, %86 : vector<12x20xf32>
    %cst_42 = arith.constant 0.000000e+00 : f32
    %88 = vector.broadcast %cst_42 : f32 to vector<12x20xf32>
    %89 = arith.maximumf %87, %88 : vector<12x20xf32>
    %cst_43 = arith.constant dense<0.000000e+00> : vector<24x20xf32>
    %90 = tpu.matmul %5, %89, %cst_43 {dimension_numbers = #tpu.dot_dimension_numbers<[0], [0], [1], [1], [0, 1, 1, 1], [], []>} : vector<12x24xf32>, vector<12x20xf32>, vector<24x20xf32> -> vector<24x20xf32>
    %cst_44 = arith.constant dense<0.000000e+00> : vector<24x20xf32>
    %91 = tpu.matmul %3, %89, %cst_44 {dimension_numbers = #tpu.dot_dimension_numbers<[1], [0], [0], [1], [0, 0, 1, 1], [], []>} : vector<24x12xf32>, vector<12x20xf32>, vector<24x20xf32> -> vector<24x20xf32>
    %c96 = arith.constant 96 : index
    %c0_45 = arith.constant 0 : index
    %92 = vector.load %arg7[%c96, %c0_45] : memref<432x128xf32, #tpu.memory_space<vmem>>, vector<20x128xf32>
    %cst_46 = arith.constant dense<0.000000e+00> : vector<24x128xf32>
    %93 = tpu.matmul %90, %92, %cst_46 {dimension_numbers = #tpu.dot_dimension_numbers<[1], [0], [0], [1], [0, 0, 1, 1], [], []>} : vector<24x20xf32>, vector<20x128xf32>, vector<24x128xf32> -> vector<24x128xf32>
    %c120 = arith.constant 120 : index
    %c0_47 = arith.constant 0 : index
    %94 = vector.load %arg7[%c120, %c0_47] : memref<432x128xf32, #tpu.memory_space<vmem>>, vector<20x128xf32>
    %cst_48 = arith.constant dense<0.000000e+00> : vector<24x128xf32>
    %95 = tpu.matmul %91, %94, %cst_48 {dimension_numbers = #tpu.dot_dimension_numbers<[1], [0], [0], [1], [0, 0, 1, 1], [], []>} : vector<24x20xf32>, vector<20x128xf32>, vector<24x128xf32> -> vector<24x128xf32>
    %96 = arith.addf %93, %95 : vector<24x128xf32>
    %c144 = arith.constant 144 : index
    %c0_49 = arith.constant 0 : index
    %97 = vector.load %arg7[%c144, %c0_49] : memref<432x128xf32, #tpu.memory_space<vmem>>, vector<6x128xf32>
    %cst_50 = arith.constant dense<0.000000e+00> : vector<24x128xf32>
    %98 = tpu.matmul %1, %97, %cst_50 {dimension_numbers = #tpu.dot_dimension_numbers<[1], [0], [0], [1], [0, 0, 1, 1], [], []>} : vector<24x6xf32>, vector<6x128xf32>, vector<24x128xf32> -> vector<24x128xf32>
    %99 = arith.addf %96, %98 : vector<24x128xf32>
    %c152 = arith.constant 152 : index
    %c0_51 = arith.constant 0 : index
    %100 = vector.load %arg7[%c152, %c0_51] : memref<432x128xf32, #tpu.memory_space<vmem>>, vector<1x128xf32>
    %101 = vector.broadcast %100 : vector<1x128xf32> to vector<24x128xf32>
    %102 = arith.addf %99, %101 : vector<24x128xf32>
    %cst_52 = arith.constant dense<0.000000e+00> : vector<12x128xf32>
    %103 = tpu.matmul %5, %102, %cst_52 {dimension_numbers = #tpu.dot_dimension_numbers<[1], [0], [0], [1], [0, 0, 1, 1], [], []>} : vector<12x24xf32>, vector<24x128xf32>, vector<12x128xf32> -> vector<12x128xf32>
    %104 = arith.mulf %102, %102 : vector<24x128xf32>
    %cst_53 = arith.constant dense<0.000000e+00> : vector<12x128xf32>
    %105 = tpu.matmul %5, %104, %cst_53 {dimension_numbers = #tpu.dot_dimension_numbers<[1], [0], [0], [1], [0, 0, 1, 1], [], []>} : vector<12x24xf32>, vector<24x128xf32>, vector<12x128xf32> -> vector<12x128xf32>
    %106 = vector.broadcast %16 : vector<12x1xf32> to vector<12x128xf32>
    %107 = arith.mulf %103, %106 : vector<12x128xf32>
    %108 = vector.broadcast %16 : vector<12x1xf32> to vector<12x128xf32>
    %109 = arith.mulf %105, %108 : vector<12x128xf32>
    %110 = arith.mulf %107, %107 : vector<12x128xf32>
    %111 = arith.subf %109, %110 : vector<12x128xf32>
    %cst_54 = arith.constant 0.000000e+00 : f32
    %112 = vector.broadcast %cst_54 : f32 to vector<12x128xf32>
    %113 = arith.maximumf %111, %112 : vector<12x128xf32>
    %cst_55 = arith.constant 9.99999974E-6 : f32
    %114 = vector.broadcast %cst_55 : f32 to vector<12x128xf32>
    %115 = arith.addf %113, %114 : vector<12x128xf32>
    %116 = math.sqrt %115 : vector<12x128xf32>
    %117 = vector.shape_cast %102 : vector<24x128xf32> to vector<1x24x128xf32>
    %118 = vector.broadcast %117 : vector<1x24x128xf32> to vector<12x24x128xf32>
    %119 = vector.broadcast %28 : vector<12x24x1xf32> to vector<12x24x128xf32>
    %120 = arith.addf %118, %119 : vector<12x24x128xf32>
    %cst_56 = arith.constant dense<0x7F800000> : vector<12x128xf32>
    %121 = vector.multi_reduction <minimumf>, %120, %cst_56 [1] : vector<12x24x128xf32> to vector<12x128xf32>
    %cst_57 = arith.constant 0.000000e+00 : f32
    %122 = vector.shape_cast %12 : vector<12x1xi1> to vector<12x1xi1>
    %123 = vector.broadcast %122 : vector<12x1xi1> to vector<12x128xi1>
    %124 = vector.broadcast %cst_57 : f32 to vector<12x128xf32>
    %125 = arith.select %123, %121, %124 : vector<12x128xi1>, vector<12x128xf32>
    %126 = vector.broadcast %117 : vector<1x24x128xf32> to vector<12x24x128xf32>
    %127 = vector.broadcast %28 : vector<12x24x1xf32> to vector<12x24x128xf32>
    %128 = arith.subf %126, %127 : vector<12x24x128xf32>
    %cst_58 = arith.constant dense<0xFF800000> : vector<12x128xf32>
    %129 = vector.multi_reduction <maximumf>, %128, %cst_58 [1] : vector<12x24x128xf32> to vector<12x128xf32>
    %cst_59 = arith.constant 0.000000e+00 : f32
    %130 = vector.shape_cast %12 : vector<12x1xi1> to vector<12x1xi1>
    %131 = vector.broadcast %130 : vector<12x1xi1> to vector<12x128xi1>
    %132 = vector.broadcast %cst_59 : f32 to vector<12x128xf32>
    %133 = arith.select %131, %129, %132 : vector<12x128xi1>, vector<12x128xf32>
    %134 = tpu.concatenate %107, %125, %133, %116 in 1 : vector<12x128xf32>, vector<12x128xf32>, vector<12x128xf32>, vector<12x128xf32> -> vector<12x512xf32>
    %135 = vector.broadcast %21 : vector<12x1xf32> to vector<12x512xf32>
    %136 = arith.mulf %134, %135 : vector<12x512xf32>
    %137 = vector.broadcast %23 : vector<12x1xf32> to vector<12x512xf32>
    %138 = arith.mulf %134, %137 : vector<12x512xf32>
    %139 = tpu.concatenate %134, %136, %138 in 1 : vector<12x512xf32>, vector<12x512xf32>, vector<12x512xf32> -> vector<12x1536xf32>
    %c160 = arith.constant 160 : index
    %c0_60 = arith.constant 0 : index
    %140 = vector.load %arg7[%c160, %c0_60] : memref<432x128xf32, #tpu.memory_space<vmem>>, vector<20x20xf32>
    %cst_61 = arith.constant dense<0.000000e+00> : vector<12x20xf32>
    %141 = tpu.matmul %89, %140, %cst_61 {dimension_numbers = #tpu.dot_dimension_numbers<[1], [0], [0], [1], [0, 0, 1, 1], [], []>} : vector<12x20xf32>, vector<20x20xf32>, vector<12x20xf32> -> vector<12x20xf32>
    %c1 = arith.constant 1 : index
    %c0_62 = arith.constant 0 : index
    %c0_63 = arith.constant 0 : index
    %142 = vector.load %arg8[%c1, %c0_62, %c0_63] : memref<2x1536x20xf32, #tpu.memory_space<vmem>>, vector<1x1536x20xf32>
    %143 = vector.shape_cast %142 : vector<1x1536x20xf32> to vector<1536x20xf32>
    %cst_64 = arith.constant dense<0.000000e+00> : vector<12x20xf32>
    %144 = tpu.matmul %139, %143, %cst_64 {dimension_numbers = #tpu.dot_dimension_numbers<[1], [0], [0], [1], [0, 0, 1, 1], [], []>} : vector<12x1536xf32>, vector<1536x20xf32>, vector<12x20xf32> -> vector<12x20xf32>
    %145 = arith.addf %141, %144 : vector<12x20xf32>
    %c184 = arith.constant 184 : index
    %c0_65 = arith.constant 0 : index
    %146 = vector.load %arg7[%c184, %c0_65] : memref<432x128xf32, #tpu.memory_space<vmem>>, vector<1x20xf32>
    %147 = vector.broadcast %146 : vector<1x20xf32> to vector<12x20xf32>
    %148 = arith.addf %145, %147 : vector<12x20xf32>
    %cst_66 = arith.constant 0.000000e+00 : f32
    %149 = vector.broadcast %cst_66 : f32 to vector<12x20xf32>
    %150 = arith.maximumf %148, %149 : vector<12x20xf32>
    %cst_67 = arith.constant dense<0.000000e+00> : vector<2x20xf32>
    %151 = tpu.matmul %7, %150, %cst_67 {dimension_numbers = #tpu.dot_dimension_numbers<[1], [0], [0], [1], [0, 0, 1, 1], [], []>} : vector<2x12xf32>, vector<12x20xf32>, vector<2x20xf32> -> vector<2x20xf32>
    %c192 = arith.constant 192 : index
    %c0_68 = arith.constant 0 : index
    %152 = vector.load %arg7[%c192, %c0_68] : memref<432x128xf32, #tpu.memory_space<vmem>>, vector<20x32xf32>
    %cst_69 = arith.constant dense<0.000000e+00> : vector<2x32xf32>
    %153 = tpu.matmul %151, %152, %cst_69 {dimension_numbers = #tpu.dot_dimension_numbers<[1], [0], [0], [1], [0, 0, 1, 1], [], []>} : vector<2x20xf32>, vector<20x32xf32>, vector<2x32xf32> -> vector<2x32xf32>
    %c216 = arith.constant 216 : index
    %c0_70 = arith.constant 0 : index
    %154 = vector.load %arg7[%c216, %c0_70] : memref<432x128xf32, #tpu.memory_space<vmem>>, vector<1x32xf32>
    %155 = vector.broadcast %154 : vector<1x32xf32> to vector<2x32xf32>
    %156 = arith.addf %153, %155 : vector<2x32xf32>
    %cst_71 = arith.constant 0.000000e+00 : f32
    %157 = vector.broadcast %cst_71 : f32 to vector<2x32xf32>
    %158 = arith.maximumf %156, %157 : vector<2x32xf32>
    %c224 = arith.constant 224 : index
    %c0_72 = arith.constant 0 : index
    %159 = vector.load %arg7[%c224, %c0_72] : memref<432x128xf32, #tpu.memory_space<vmem>>, vector<32x32xf32>
    %cst_73 = arith.constant dense<0.000000e+00> : vector<2x32xf32>
    %160 = tpu.matmul %158, %159, %cst_73 {dimension_numbers = #tpu.dot_dimension_numbers<[1], [0], [0], [1], [0, 0, 1, 1], [], []>} : vector<2x32xf32>, vector<32x32xf32>, vector<2x32xf32> -> vector<2x32xf32>
    %c256 = arith.constant 256 : index
    %c0_74 = arith.constant 0 : index
    %161 = vector.load %arg7[%c256, %c0_74] : memref<432x128xf32, #tpu.memory_space<vmem>>, vector<1x32xf32>
    %162 = vector.broadcast %161 : vector<1x32xf32> to vector<2x32xf32>
    %163 = arith.addf %160, %162 : vector<2x32xf32>
    %cst_75 = arith.constant 0.000000e+00 : f32
    %164 = vector.broadcast %cst_75 : f32 to vector<2x32xf32>
    %165 = arith.maximumf %163, %164 : vector<2x32xf32>
    %c0_76 = arith.constant 0 : index
    %c0_77 = arith.constant 0 : index
    %166 = vector.load %arg5[%c0_76, %c0_77] : memref<2x24xf32, #tpu.memory_space<vmem>>, vector<2x24xf32>
    %c296 = arith.constant 296 : index
    %c0_78 = arith.constant 0 : index
    %167 = vector.load %arg7[%c296, %c0_78] : memref<432x128xf32, #tpu.memory_space<vmem>>, vector<24x32xf32>
    %cst_79 = arith.constant dense<0.000000e+00> : vector<2x32xf32>
    %168 = tpu.matmul %166, %167, %cst_79 {dimension_numbers = #tpu.dot_dimension_numbers<[1], [0], [0], [1], [0, 0, 1, 1], [], []>} : vector<2x24xf32>, vector<24x32xf32>, vector<2x32xf32> -> vector<2x32xf32>
    %c320 = arith.constant 320 : index
    %c0_80 = arith.constant 0 : index
    %169 = vector.load %arg7[%c320, %c0_80] : memref<432x128xf32, #tpu.memory_space<vmem>>, vector<1x32xf32>
    %170 = vector.broadcast %169 : vector<1x32xf32> to vector<2x32xf32>
    %171 = arith.addf %168, %170 : vector<2x32xf32>
    %cst_81 = arith.constant 0.000000e+00 : f32
    %172 = vector.broadcast %cst_81 : f32 to vector<2x32xf32>
    %173 = arith.maximumf %171, %172 : vector<2x32xf32>
    %c328 = arith.constant 328 : index
    %c0_82 = arith.constant 0 : index
    %174 = vector.load %arg7[%c328, %c0_82] : memref<432x128xf32, #tpu.memory_space<vmem>>, vector<32x32xf32>
    %cst_83 = arith.constant dense<0.000000e+00> : vector<2x32xf32>
    %175 = tpu.matmul %173, %174, %cst_83 {dimension_numbers = #tpu.dot_dimension_numbers<[1], [0], [0], [1], [0, 0, 1, 1], [], []>} : vector<2x32xf32>, vector<32x32xf32>, vector<2x32xf32> -> vector<2x32xf32>
    %c360 = arith.constant 360 : index
    %c0_84 = arith.constant 0 : index
    %176 = vector.load %arg7[%c360, %c0_84] : memref<432x128xf32, #tpu.memory_space<vmem>>, vector<1x32xf32>
    %177 = vector.broadcast %176 : vector<1x32xf32> to vector<2x32xf32>
    %178 = arith.addf %175, %177 : vector<2x32xf32>
    %cst_85 = arith.constant 0.000000e+00 : f32
    %179 = vector.broadcast %cst_85 : f32 to vector<2x32xf32>
    %180 = arith.maximumf %178, %179 : vector<2x32xf32>
    %c264 = arith.constant 264 : index
    %c0_86 = arith.constant 0 : index
    %181 = vector.load %arg7[%c264, %c0_86] : memref<432x128xf32, #tpu.memory_space<vmem>>, vector<32x16xf32>
    %cst_87 = arith.constant dense<0.000000e+00> : vector<2x16xf32>
    %182 = tpu.matmul %165, %181, %cst_87 {dimension_numbers = #tpu.dot_dimension_numbers<[1], [0], [0], [1], [0, 0, 1, 1], [], []>} : vector<2x32xf32>, vector<32x16xf32>, vector<2x16xf32> -> vector<2x16xf32>
    %c368 = arith.constant 368 : index
    %c0_88 = arith.constant 0 : index
    %183 = vector.load %arg7[%c368, %c0_88] : memref<432x128xf32, #tpu.memory_space<vmem>>, vector<32x16xf32>
    %cst_89 = arith.constant dense<0.000000e+00> : vector<2x16xf32>
    %184 = tpu.matmul %180, %183, %cst_89 {dimension_numbers = #tpu.dot_dimension_numbers<[1], [0], [0], [1], [0, 0, 1, 1], [], []>} : vector<2x32xf32>, vector<32x16xf32>, vector<2x16xf32> -> vector<2x16xf32>
    %185 = arith.addf %182, %184 : vector<2x16xf32>
    %c400 = arith.constant 400 : index
    %c0_90 = arith.constant 0 : index
    %186 = vector.load %arg7[%c400, %c0_90] : memref<432x128xf32, #tpu.memory_space<vmem>>, vector<1x16xf32>
    %187 = vector.broadcast %186 : vector<1x16xf32> to vector<2x16xf32>
    %188 = arith.addf %185, %187 : vector<2x16xf32>
    %cst_91 = arith.constant 0.000000e+00 : f32
    %189 = vector.broadcast %cst_91 : f32 to vector<2x16xf32>
    %190 = arith.maximumf %188, %189 : vector<2x16xf32>
    %c408 = arith.constant 408 : index
    %c0_92 = arith.constant 0 : index
    %191 = vector.load %arg7[%c408, %c0_92] : memref<432x128xf32, #tpu.memory_space<vmem>>, vector<16x7xf32>
    %cst_93 = arith.constant dense<0.000000e+00> : vector<2x7xf32>
    %192 = tpu.matmul %190, %191, %cst_93 {dimension_numbers = #tpu.dot_dimension_numbers<[1], [0], [0], [1], [0, 0, 1, 1], [], []>} : vector<2x16xf32>, vector<16x7xf32>, vector<2x7xf32> -> vector<2x7xf32>
    %c424 = arith.constant 424 : index
    %c0_94 = arith.constant 0 : index
    %193 = vector.load %arg7[%c424, %c0_94] : memref<432x128xf32, #tpu.memory_space<vmem>>, vector<1x7xf32>
    %194 = vector.broadcast %193 : vector<1x7xf32> to vector<2x7xf32>
    %195 = arith.addf %192, %194 : vector<2x7xf32>
    %c0_95 = arith.constant 0 : index
    %c0_96 = arith.constant 0 : index
    %196 = vector.load %arg9[%c0_95, %c0_96] : memref<2x7xf32, #tpu.memory_space<vmem>>, vector<2x7xf32>
    tpu.vector_store %arg9[%c0_95, %c0_96], %195 {strides = array<i32>} : memref<2x7xf32, #tpu.memory_space<vmem>>, vector<2x7xf32>,
    return
  }
}

</mosaic_0001>

<bundles_post_ra>
// kernel: net_forward.1
= control target key start
LH: loop header
LB: loop body
LE: loop exit
PB: predicated region body
PF: predicated region fallthrough
CT: control target
= control target key end

     0   :  { %v8605_v4 = vmov 0.0|0.0   ;;  %vm342_vm0 = vcmask 1043456   ;;  %vm6087_vm1 = vmmov 1   ;;  %v8704_v8 = vmov 0  ;;  %s8590_s0 = inlined_call_operand.vmem [shape: f32[12,20], index: 0, kind: input, shape index: {}]   ;;  %s8591_s1 = inlined_call_operand.vmem [shape: f32[24,6], index: 1, kind: input, shape index: {}]   ;;  %s8592_s2 = inlined_call_operand.vmem [shape: bf16[24,12], index: 2, kind: input, shape index: {}]   ;;  %s8593_s3 = inlined_call_operand.vmem [shape: bf16[12,24], index: 3, kind: input, shape index: {}]   ;;  %s8594_s4 = inlined_call_operand.vmem [shape: bf16[2,12], index: 4, kind: input, shape index: {}]   ;;  %s8595_s5 = inlined_call_operand.vmem [shape: f32[2,24], index: 5, kind: input, shape index: {}]   ;;  %s8596_s6 = inlined_call_operand.<no memory space> [shape: f32[1,1], index: 6, kind: input, shape index: {}]   ;;  %s8597_s7 = inlined_call_operand.vmem [shape: f32[432,128], index: 7, kind: input, shape index: {}]   ;;  %s8598_s8 = inlined_call_operand.vmem [shape: f32[2,1536,20], index: 8, kind: input, shape index: {}]   ;;  %s8599_s9 = inlined_call_operand.hbm [shape: f32[2,7], index: 9, kind: output, shape index: {}]  }
   0x1   :  { %v45_v0 = vld [vmem:[%s8593_s3] sm:$0xf]  ;;  %v46_v1 = vld [vmem:[%s8593_s3 + $0x4] sm:$0x3]  ;;  %5561 = vmatprep.subr.bf16.mxu1 %v8605_v4  ;;  %v35_v5 = vld [vmem:[%s8590_s0 + $0x8] sm:$0xf]  ;;  %5557 = vmatprep.subr.bf16.mxu0 %v8605_v4 }
   0x2   :  { %v34_v2 = vld [vmem:[%s8590_s0] sm:$0xff]  ;;  %v6150_v3 = vunpack.c.l.bf16 %v45_v0  ;;  %vm6163_vm2 = vmpackc.low %vm342_vm0, %vm6087_vm1  ;;  %v6168_v9 = vunpack.c.l.bf16 %v46_v1  ;;  %vm6088_vm3 = vmmov 0   ;;  %v8603_v10 = vmov 0.0  }
   0x3   :  { %v6159_v6 = vld [vmem:[%s8592_s2] sm:$0xff]   ;;  %v5558_v7 = vpack.c.bf16 %v35_v5, %v34_v2  ;;  %v8705_v8 = vsel %vm6163_vm2, 4294967295, %v8704_v8  ;;  %5310 = vmatprep.mubr.msk.f32.mxu1 %vm6088_vm3, %v8603_v10 }
   0x4   :  { %8702 = vst [vmem:[#allocation6_spill] sm:$0xff] %v6150_v3  ;;  %8703 = vst [vmem:[#allocation7_spill] sm:$0xff] %v6159_v6  ;;  %300 = vxpose.xlu0.b32.start [1/2] (short) (narrow) %v6150_v3, 24  ;;  %v8602_v11 = vunpack.c.l.bf16 %v6159_v6 }
   0x5   :  { %8706 = vst [vmem:[#allocation8_spill] sm:$0xff] %v8705_v8  ;;  %8707 = vst [vmem:[#allocation9_spill] sm:$0xff] %v6168_v9 }
   0x6   :  { %15 = vsyncpa [#allocation4], 0  ;;  %5564 = vmatpush3.bf16.msk.msra.mxu1 %vm6163_vm2, %v5558_v7  ;;  %vm332_vm4 = vcmask 97280   ;;  %5560 = vmatpush3.bf16.msk.msra.mxu0 %vm6163_vm2, %v5558_v7  ;;  %v8601_v12 = vunpack.c.h.bf16 %v6159_v6  ;;  %v6191_v13 = vld [vmem:[%s8592_s2 + $0x8] sm:$0xf]  ;;  %vm52_vm5 = vcmask 195584   ;;  %v84_v19 = vlaneseq }
   0x7   :  { %5297 = vmatprep.mubr.msk.f32.mxu0 %vm6088_vm3, %v8603_v10  ;;  %5565 = vmatprep.subr.bf16.mxu0 %v8605_v4  ;;  %8708 = vst [vmem:[#allocation10_spill] sm:$0xff] %v6191_v13  ;;  %v8600_v14 = vunpack.c.l.bf16 %v6191_v13  ;;  %v53_v15 = vsel %vm52_vm5, %v6150_v3, 0.0  ;;  %v515_v16 = vld [vmem:[%s8597_s7] sm:$0xff]  ;;  %v516_v17 = vld [vmem:[%s8597_s7 + $0x8] sm:$0xff]  ;;  %v6214_v20 = vsub.f32 1.0, %v6150_v3  ;;  %v518_v24 = vld [vmem:[%s8597_s7 + $0x18] sm:$0xff] }
   0x8   :  { %5568 = vmatprep.subr.bf16.mxu1 %v8605_v4  ;;  %301 = vxpose.xlu0.b32.end [2/2] (short) (narrow) %v6168_v9, 24  ;;  %v5569_v18 = vpack.c.bf16 %v516_v17, %v515_v16  ;;  %v6216_v21 = vshrl.u32 %v84_v19, 7  ;;  %v519_v25 = vld [vmem:[%s8597_s7 + $0x20] sm:$0xff]  ;;  %v520_v28 = vld [vmem:[%s8597_s7 + $0x28] sm:$0xf]  ;;  %vm521_vm6 = vcmask 162816  }
   0x9   :  { %5311 = vmatmul.mubr.msk.f32.vlgmr.msra.gmra.mrb[0].mxu1 %vm332_vm4, %v8602_v11  ;;  %54 = vadd.xlane.f32.xlu1 %v53_v15  ;;  %v5566_v26 = vpack.c.bf16 %v519_v25, %v518_v24  ;;  %v517_v32 = vld [vmem:[%s8597_s7 + $0x10] sm:$0xf]  ;;  %vm717_vm7 = vcmask 1045504   ;;  %v36_v46 = vld [vmem:[%s8591_s1] sm:$0xff]  ;;  %vm707_vm8 = vcmask 48128   ;;  %v37_v48 = vld [vmem:[%s8591_s1 + $0x8] sm:$0xff] }
   0xa   :  { %5313 = vmatprep.mubr.msk.f32.mxu1 %vm6088_vm3, %v8603_v10  ;;  %5570 = vmatpush3.bf16.msra.mxu1 %v5569_v18  ;;  %v86_v22 = vsub.s32 0, %v6216_v21  ;;  %v101_v31 = vsub.s32 1, %v6216_v21  ;;  %v706_v34 = vld [vmem:[%s8597_s7 + $0x30] sm:$0x3f]  ;;  %v116_v37 = vsub.s32 2, %v6216_v21  ;;  %v146_v41 = vsub.s32 4, %v6216_v21 }
   0xb   :  { %5338 = vmatprep.subr.mxu1 %v8603_v10  ;;  %v161_v42 = vsub.s32 5, %v6216_v21  ;;  %v131_v49 = vsub.s32 3, %v6216_v21  ;;  %v38_v50 = vld [vmem:[%s8591_s1 + $0x10] sm:$0xff]  ;;  %v176_v52 = vsub.s32 6, %v6216_v21  ;;  %vm56_vm9 = vcmask 191488   ;;  %s6090_s18 = smov [#allocation3]  }
   0xc   :  { %v87_v23 = vrot.slane %v6214_v20, %v86_v22  ;;  %v102_v33 = vrot.slane %v6214_v20, %v101_v31  ;;  %v117_v40 = vrot.slane %v6214_v20, %v116_v37  ;;  %v147_v44 = vrot.slane %v6214_v20, %v146_v41  ;;  %s4435_s3 = sshll.u32 %s6090_s18, 4  ;;  %s4436_s3 = int_to_ptr.vmem [resolvable:$true] %s4435_s3 }
   0xd   :  { %5314 = vmatmul.mubr.msk.f32.gmra.mrb[2].mxu1 %vm332_vm4, %v8601_v12  ;;  %v162_v47 = vrot.slane %v6214_v20, %v161_v42  ;;  %v132_v51 = vrot.slane %v6214_v20, %v131_v49  ;;  %v177_v53 = vrot.slane %v6214_v20, %v176_v52  ;;  %v57_v54 = vsel %vm56_vm9, %v6168_v9, 0.0  ;;  %v1345_v52 = vld [vmem:[%s8598_s8 + $0x10] sm:$0xff]  ;;  %p6067_p1 = scmp.lt.s32.totalorder %s4436_s3, %s4436_s3 }
   0xe   :  { %5316 = vmatprep.mubr.msk.f32.mxu1 %vm6088_vm3, %v8603_v10  ;;  %5339 = vmatpush3.msk.msra.mxu1 %vm342_vm0, %v517_v32  ;;  %v191_v55 = vsub.s32 7, %v6216_v21  ;;  %v83_v57 = vsub.f32 1.0, %v6168_v9  ;;  %vm1145_vm10 = vcmask 1041409   ;;  %vm1147_vm11 = vcmask 1042434  }
   0xf   :  { %vm1149_vm12 = vcmask 1043459   ;;  %vm8679_vm13 = vcmask 1044484   ;;  %vm8678_vm14 = vcmask 1045509   ;;  %vm8677_vm15 = vcmask 1046534  }
  0x10   :  { %v192_v56 = vrot.slane %v6214_v20, %v191_v55  ;;  %v207_v58 = vrot.slane %v83_v57, %v86_v22  ;;  %v222_v59 = vrot.slane %v83_v57, %v101_v31  ;;  %v252_v60 = vrot.slane %v83_v57, %v131_v49  ;;  %v1362_v49 = vld [vmem:[%s8598_s8 + $0x98] sm:$0xff]  ;;  %v1364_v55 = vld [vmem:[%s8598_s8 + $0xa8] sm:$0xff] }
  0x11   :  { %5317 = vmatmul.mubr.msk.f32.gmra.mrb[4].mxu1 %vm332_vm4, %v8600_v14  ;;  %v237_v61 = vrot.slane %v83_v57, %v116_v37  ;;  %vm8676_vm1 = vcmask 1047559  }
  0x12   :  { %5340 = vmatprep.mubr.msk.f32.mxu1 %vm6088_vm3, %v8603_v10 }
  0x1a   :  { %89 = vbcast.lane.b32.xlu1 %v87_v23, 256 }
  0x1e   :  { %104 = vbcast.lane.b32.xlu1 %v102_v33, 256 }
  0x22   :  { %108 = vbcast.lane.b32.xlu1 %v102_v33, 264 }
  0x26   :  { %119 = vbcast.lane.b32.xlu1 %v117_v40, 256 }
  0x2a   :  { %123 = vbcast.lane.b32.xlu1 %v117_v40, 264 }
  0x2e   :  { %97 = vbcast.lane.b32.xlu1 %v87_v23, 272 }
  0x32   :  { %112 = vbcast.lane.b32.xlu1 %v102_v33, 272 }
  0x35   :  { %93 = vbcast.lane.b32.xlu0 %v87_v23, 264 }
  0x36   :  { %134 = vbcast.lane.b32.xlu1 %v132_v51, 256 }
  0x39   :  { %127 = vbcast.lane.b32.xlu0 %v117_v40, 272 }
  0x3a   :  { %138 = vbcast.lane.b32.xlu1 %v132_v51, 264 }
  0x3d   :  { %153 = vbcast.lane.b32.xlu0 %v147_v44, 264 }
  0x3e   :  { %149 = vbcast.lane.b32.xlu1 %v147_v44, 256 }
  0x41   :  { %164 = vbcast.lane.b32.xlu0 %v162_v47, 256 }
  0x42   :  { %142 = vbcast.lane.b32.xlu1 %v132_v51, 272 }
  0x46   :  { %168 = vbcast.lane.b32.xlu1 %v162_v47, 264 }
  0x4a   :  { %157 = vbcast.lane.b32.xlu1 %v147_v44, 272  ;;  %v1360_v44 = vld [vmem:[%s8598_s8 + $0x88] sm:$0xff] }
  0x4e   :  { %179 = vbcast.lane.b32.xlu1 %v177_v53, 256 }
  0x52   :  { %183 = vbcast.lane.b32.xlu1 %v177_v53, 264 }
  0x56   :  { %172 = vbcast.lane.b32.xlu1 %v162_v47, 272  ;;  %v1344_v47 = vld [vmem:[%s8598_s8 + $0x8] sm:$0xff] }
  0x5a   :  { %194 = vbcast.lane.b32.xlu1 %v192_v56, 256 }
  0x5e   :  { %198 = vbcast.lane.b32.xlu1 %v192_v56, 264 }
  0x60   :  { %58 = vadd.xlane.f32.xlu0 %v57_v54  ;;  %v1363_v54 = vld [vmem:[%s8598_s8 + $0xa0] sm:$0xff] }
  0x62   :  { %187 = vbcast.lane.b32.xlu1 %v177_v53, 272  ;;  %v1346_v53 = vld [vmem:[%s8598_s8 + $0x18] sm:$0xff] }
  0x66   :  { %202 = vbcast.lane.b32.xlu1 %v192_v56, 272  ;;  %v5585_v56 = vpack.c.bf16 %v1346_v53, %v1345_v52 }
  0x6a   :  { %213 = vbcast.lane.b32.xlu1 %v207_v58, 264 }
  0x6e   :  { %224 = vbcast.lane.b32.xlu1 %v222_v59, 256 }
  0x72   :  { %228 = vbcast.lane.b32.xlu1 %v222_v59, 264 }
  0x76   :  { %209 = vbcast.lane.b32.xlu0 %v207_v58, 256  ;;  %239 = vbcast.lane.b32.xlu1 %v237_v61, 256 }
  0x7a   :  { %232 = vbcast.lane.b32.xlu0 %v222_v59, 272  ;;  %243 = vbcast.lane.b32.xlu1 %v237_v61, 264  ;;  %v1347_v59 = vld [vmem:[%s8598_s8 + $0x20] sm:$0xff] }
  0x7e   :  { %258 = vbcast.lane.b32.xlu0 %v252_v60, 264  ;;  %217 = vbcast.lane.b32.xlu1 %v207_v58, 272  ;;  %v5587_v58 = vpack.c.bf16 %v1364_v55, %v1363_v54  ;;  %v1355_v54 = vld [vmem:[%s8598_s8 + $0x60] sm:$0xff]  ;;  %v1356_v55 = vld [vmem:[%s8598_s8 + $0x68] sm:$0xff] }
  0x82   :  { %262 = vbcast.lane.b32.xlu0 %v252_v60, 272  ;;  %254 = vbcast.lane.b32.xlu1 %v252_v60, 256  ;;  %v1348_v60 = vld [vmem:[%s8598_s8 + $0x28] sm:$0xff] }
  0x84   :  { %v6228_v27 = vpop.trf.xlu0 }
  0x85   :  { %8709 = vst [vmem:[#allocation11_spill] sm:$0xff] %v6228_v27  ;;  %5298 = vmatmul.mubr.msk.f32.vlgmr.msra.gmra.mrb[0].mxu0 %vm332_vm4, %v6228_v27 }
  0x86   :  { %5300 = vmatprep.mubr.msk.f32.mxu0 %vm6088_vm3, %v8603_v10  ;;  %5567 = vmatpush3.bf16.msra.mxu0 %v5566_v26 }
  0x87   :  { %5323 = vmatprep.subr.mxu0 %v8603_v10  ;;  %247 = vbcast.lane.b32.xlu1 %v237_v61, 272  ;;  %v1365_v61 = vld [vmem:[%s8598_s8 + $0xb0] sm:$0xff] }
  0x88   :  { %v6238_v29 = vpop.trf.xlu0 }
  0x89   :  { %8710 = vst [vmem:[#allocation12_spill] sm:$0xff] %v6238_v29  ;;  %5301 = vmatmul.mubr.msk.f32.gmra.mrb[2].mxu0 %vm332_vm4, %v6238_v29 }
  0x8a   :  { %5303 = vmatprep.mubr.msk.f32.mxu0 %vm6088_vm3, %v8603_v10  ;;  %5324 = vmatpush3.msk.msra.mxu0 %vm342_vm0, %v520_v28 }
  0x8b   :  { %5349 = vmatprep.subr.mxu0 %v8603_v10 }
  0x8c   :  { %v6246_v30 = vpop.trf.xlu0 }
  0x8d   :  { %8711 = vst [vmem:[#allocation13_spill] sm:$0xff] %v6246_v30  ;;  %5304 = vmatmul.mubr.msk.f32.gmra.mrb[4].mxu0 %vm332_vm4, %v6246_v30 }
  0x8e   :  { %5325 = vmatprep.mubr.msk.f32.mxu0 %vm6088_vm3, %v8603_v10 }
  0x96   :  { %v6320_v7 = vpop.xlane.xlu1 %54 }
  0x97   :  { %vm60_vm9 = vcmp.gt.f32.partialorder %v6320_v7, 0.0 }
  0x9a   :  { %v6322_v15 = vpop.permute.xlu1 %89 }
  0x9e   :  { %v6324_v16 = vpop.permute.xlu1 %104 }
  0xa2   :  { %v6326_v17 = vpop.permute.xlu1 %108 }
  0xa6   :  { %v6328_v18 = vpop.permute.xlu1 %119 }
  0xaa   :  { %v6330_v19 = vpop.permute.xlu1 %123 }
  0xae   :  { %v6332_v20 = vpop.permute.xlu1 %97 }
  0xb2   :  { %v6338_v25 = vpop.permute.xlu1 %112 }
  0xb6   :  { %v6342_v31 = vpop.permute.xlu1 %134 }
  0xdc   :  { %v501_v35 = vpop.f32.mrb[0].mxu1 }
  0xdd   :  { %v5312_v36 = vpop.f32.mrb[1].mxu1  ;;  %5326 = vmatmul.mubr.msk.f32.vlgmr.msra.gmra.mrb[6].mxu0 %vm521_vm6, %v501_v35 }
  0xde   :  { %5328 = vmatprep.mubr.msk.f32.mxu0 %vm6088_vm3, %v8603_v10  ;;  %5350 = vmatpush3.msk.msra.mxu0 %vm717_vm7, %v706_v34  ;;  %v6348_v36 = vpop.permute.xlu1 %138 }
  0xe0   :  { %v506_v38 = vpop.f32.mrb[2].mxu1 }
  0xe1   :  { %v5315_v39 = vpop.f32.mrb[3].mxu1  ;;  %5329 = vmatmul.mubr.msk.f32.gmra.mrb[8].mxu0 %vm521_vm6, %v506_v38 }
  0xe2   :  { %5331 = vmatprep.mubr.msk.f32.mxu0 %vm6088_vm3, %v8603_v10  ;;  %v6352_v39 = vpop.permute.xlu1 %149 }
  0xe4   :  { %v511_v43 = vpop.f32.mrb[4].mxu1 }
  0xe5   :  { %v5318_v45 = vpop.f32.mrb[5].mxu1  ;;  %5332 = vmatmul.mubr.msk.f32.gmra.mrb[10].mxu0 %vm521_vm6, %v511_v43  ;;  %v1359_v43 = vld [vmem:[%s8598_s8 + $0x80] sm:$0xff] }
  0xe6   :  { %5351 = vmatprep.mubr.msk.f32.mxu0 %vm6088_vm3, %v8603_v10  ;;  %v6354_v40 = vpop.permute.xlu1 %142  ;;  %v1343_v45 = vld [vmem:[%s8598_s8] sm:$0xff] }
  0xe9   :  { %5352 = vmatmul.mubr.msk.f32.vlgmr.msra.gmra.mrb[12].mxu0 %vm707_vm8, %v36_v46  ;;  %v5579_v46 = vpack.c.bf16 %v1360_v44, %v1359_v43  ;;  %v1369_v43 = vld [vmem:[%s8598_s8 + $0xd0] sm:$0xff]  ;;  %v1370_v44 = vld [vmem:[%s8598_s8 + $0xd8] sm:$0xff] }
  0xea   :  { %5354 = vmatprep.mubr.msk.f32.mxu0 %vm6088_vm3, %v8603_v10  ;;  %v6356_v41 = vpop.permute.xlu1 %168 }
  0xeb   :  { %5580 = vmatprep.subr.bf16.mxu0 %v5579_v46 }
  0xed   :  { %5355 = vmatmul.mubr.msk.f32.gmra.mrb[14].mxu0 %vm707_vm8, %v37_v48  ;;  %v1361_v48 = vld [vmem:[%s8598_s8 + $0x90] sm:$0xff] }
  0xee   :  { %5357 = vmatprep.mubr.msk.f32.mxu0 %vm6088_vm3, %v8603_v10  ;;  %v6358_v42 = vpop.permute.xlu1 %157  ;;  %v5583_v51 = vpack.c.bf16 %v1362_v49, %v1361_v48  ;;  %v1353_v48 = vld [vmem:[%s8598_s8 + $0x50] sm:$0xff]  ;;  %v1354_v49 = vld [vmem:[%s8598_s8 + $0x58] sm:$0xff] }
  0xef   :  { %v5601_v52 = vpack.c.bf16 %v1354_v49, %v1353_v48  ;;  %v6459_v48 = vmul.f32 1e+30, %v6322_v15  ;;  %v6462_v49 = vmul.f32 1e+30, %v6324_v16  ;;  %v6478_v15 = vmul.f32 1e+30, %v6332_v20 }
  0xf0   :  { %v6483_v16 = vmul.f32 1e+30, %v6338_v25  ;;  %v6497_v20 = vmul.f32 1e+30, %v6354_v40  ;;  %v6503_v25 = vmul.f32 1e+30, %v6358_v42 }
  0xf1   :  { %5358 = vmatmul.mubr.msk.f32.gmra.mrb[16].mxu0 %vm707_vm8, %v38_v50  ;;  %v5581_v50 = vpack.c.bf16 %v1344_v47, %v1343_v45  ;;  %v5599_v47 = vpack.c.bf16 %v1370_v44, %v1369_v43  ;;  %8718 = vst [vmem:[#allocation20_spill] sm:$0xff] %v6478_v15 }
  0xf2   :  { %v6390_v57 = vpop.permute.xlu1 %179  ;;  %8720 = vst [vmem:[#allocation22_spill] sm:$0xff] %v6483_v16  ;;  %8724 = vst [vmem:[#allocation26_spill] sm:$0xff] %v6497_v20 }
  0xf3   :  { %5582 = vmatpush3.bf16.msra.mxu0 %v5581_v50  ;;  %v1371_v50 = vld [vmem:[%s8598_s8 + $0xe0] sm:$0xff]  ;;  %8726 = vst [vmem:[#allocation28_spill] sm:$0xff] %v6503_v25 }
  0xf4   :  { %5584 = vmatprep.subr.bf16.mxu0 %v5583_v51  ;;  %v1372_v51 = vld [vmem:[%s8598_s8 + $0xe8] sm:$0xff] }
  0xf5   :  { %v5603_v53 = vpack.c.bf16 %v1372_v51, %v1371_v50 }
  0xf7   :  { %5586 = vmatpush3.bf16.msra.mxu0 %v5585_v56  ;;  %v1373_v56 = vld [vmem:[%s8598_s8 + $0xf0] sm:$0xff] }
  0xf8   :  { %5588 = vmatprep.subr.bf16.mxu0 %v5587_v58  ;;  %v1374_v58 = vld [vmem:[%s8598_s8 + $0xf8] sm:$0xff] }
 0x158   :  { %v412_v62 = vpop.f32.mrb[0].mxu0 }
 0x159   :  { %v5299_v63 = vpop.f32.mrb[1].mxu0  ;;  %5341 = vmatmul.mubr.msk.f32.vlgmr.msra.gmra.mrb[6].mxu1 %vm521_vm6, %v412_v62  ;;  %v1366_v62 = vld [vmem:[%s8598_s8 + $0xb8] sm:$0xff] }
 0x15a   :  { %5343 = vmatprep.mubr.msk.f32.mxu1 %vm6088_vm3, %v8603_v10  ;;  %v5589_v63 = vpack.c.bf16 %v1348_v60, %v1347_v59  ;;  %v5605_v60 = vpack.c.bf16 %v1356_v55, %v1355_v54  ;;  %v6475_v55 = vmul.f32 1e+30, %v6330_v19  ;;  %v6494_v19 = vmul.f32 1e+30, %v6352_v39 }
 0x15c   :  { %v417_v0 = vpop.f32.mrb[2].mxu0  ;;  %5590 = vmatpush3.bf16.msra.mxu0 %v5589_v63  ;;  %8717 = vst [vmem:[#allocation19_spill] sm:$0xff] %v6475_v55  ;;  %8723 = vst [vmem:[#allocation25_spill] sm:$0xff] %v6494_v19 }
 0x15d   :  { %v5302_v1 = vpop.f32.mrb[3].mxu0  ;;  %5344 = vmatmul.mubr.msk.f32.gmra.mrb[8].mxu1 %vm521_vm6, %v417_v0  ;;  %v5591_v0 = vpack.c.bf16 %v1366_v62, %v1365_v61  ;;  %v5607_v61 = vpack.c.bf16 %v1374_v58, %v1373_v56  ;;  %v6486_v58 = vmul.f32 1e+30, %v6342_v31 }
 0x15e   :  { %5346 = vmatprep.mubr.msk.f32.mxu1 %vm6088_vm3, %v8603_v10  ;;  %v1349_v1 = vld [vmem:[%s8598_s8 + $0x30] sm:$0xff] }
 0x15f   :  { %5592 = vmatprep.subr.bf16.mxu0 %v5591_v0  ;;  %v94_v0 = vpop.permute.xlu0 %93 }
 0x160   :  { %v422_v2 = vpop.f32.mrb[4].mxu0  ;;  %v6464_v50 = vmul.f32 1e+30, %v94_v0  ;;  %v6506_v0 = vmul.f32 1e+30, %v6390_v57 }
 0x161   :  { %5347 = vmatmul.mubr.msk.f32.gmra.mrb[10].mxu1 %vm521_vm6, %v422_v2  ;;  %v5305_v5 = vpop.f32.mrb[5].mxu0  ;;  %v1350_v2 = vld [vmem:[%s8598_s8 + $0x38] sm:$0xff] }
 0x162   :  { %5366 = vmatprep.mubr.msk.f32.mxu1 %vm52_vm5, %v6150_v3  ;;  %v1367_v5 = vld [vmem:[%s8598_s8 + $0xc0] sm:$0xff]  ;;  %8713 = vst [vmem:[#allocation15_spill] sm:$0xff] %v6464_v50  ;;  %8727 = vst [vmem:[#allocation29_spill] sm:$0xff] %v6506_v0 }
 0x1b0   :  { %v6334_v21 = vpop.f32.mrb[6].mxu0 }
 0x1b1   :  { %v5327_v22 = vpop.f32.mrb[7].mxu0 }
 0x1b2   :  { %v1368_v22 = vld [vmem:[%s8598_s8 + $0xc8] sm:$0xff] }
 0x1b4   :  { %v6336_v23 = vpop.f32.mrb[8].mxu0 }
 0x1b5   :  { %v5330_v24 = vpop.f32.mrb[9].mxu0 }
 0x1b6   :  { %v6416_v24 = vpop.permute.xlu1 %183 }
 0x1b8   :  { %v6340_v26 = vpop.f32.mrb[10].mxu0 }
 0x1b9   :  { %v5333_v28 = vpop.f32.mrb[11].mxu0 }
 0x1ba   :  { %v5593_v28 = vpack.c.bf16 %v1350_v2, %v1349_v1  ;;  %v173_v46 = vpop.permute.xlu1 %172  ;;  %v128_v2 = vpop.permute.xlu0 %127 }
 0x1bb   :  { %v6472_v54 = vmul.f32 1e+30, %v128_v2  ;;  %v6509_v2 = vmul.f32 1e+30, %v6416_v24 }
 0x1bc   :  { %v6344_v32 = vpop.f32.mrb[12].mxu0  ;;  %5594 = vmatpush3.bf16.msra.mxu0 %v5593_v28 }
 0x1bd   :  { %v5353_v33 = vpop.f32.mrb[13].mxu0  ;;  %8716 = vst [vmem:[#allocation18_spill] sm:$0xff] %v6472_v54  ;;  %8728 = vst [vmem:[#allocation30_spill] sm:$0xff] %v6509_v2 }
 0x1be   :  { %v5595_v33 = vpack.c.bf16 %v1368_v22, %v1367_v5  ;;  %v195_v59 = vpop.permute.xlu1 %194  ;;  %v154_v22 = vpop.permute.xlu0 %153 }
 0x1bf   :  { %v6480_v56 = vmul.f32 1e+30, %v154_v22  ;;  %v6514_v40 = vmul.f32 1e+30, %v195_v59 }
 0x1c0   :  { %v6346_v34 = vpop.f32.mrb[14].mxu0  ;;  %5596 = vmatprep.subr.bf16.mxu0 %v5595_v33 }
 0x1c1   :  { %v5356_v35 = vpop.f32.mrb[15].mxu0  ;;  %8719 = vst [vmem:[#allocation21_spill] sm:$0xff] %v6480_v56  ;;  %8730 = vst [vmem:[#allocation32_spill] sm:$0xff] %v6514_v40 }
 0x1c2   :  { %v1351_v35 = vld [vmem:[%s8598_s8 + $0x40] sm:$0xff]  ;;  %v199_v62 = vpop.permute.xlu1 %198  ;;  %v165_v33 = vpop.permute.xlu0 %164 }
 0x1c3   :  { %v6519_v42 = vmul.f32 1e+30, %v199_v62 }
 0x1c4   :  { %v6350_v37 = vpop.f32.mrb[16].mxu0 }
 0x1c5   :  { %v5359_v38 = vpop.f32.mrb[17].mxu0  ;;  %8731 = vst [vmem:[#allocation33_spill] sm:$0xff] %v6519_v42 }
 0x1c6   :  { %v1352_v38 = vld [vmem:[%s8598_s8 + $0x48] sm:$0xff]  ;;  %v188_v63 = vpop.permute.xlu1 %187 }
 0x1c7   :  { %v5597_v45 = vpack.c.bf16 %v1352_v38, %v1351_v35  ;;  %v6454_v38 = vpop.xlane.xlu0 %58  ;;  %v6521_v14 = vmul.f32 1e+30, %v188_v63  ;;  %v6538_v63 = vld [vmem:[%s8598_s8 + $0x180] sm:$0xff] }
 0x1c8   :  { %8712 = vst [vmem:[#allocation14_spill] sm:$0xff] %v6454_v38 }
 0x1c9   :  { %5598 = vmatpush3.bf16.msra.mxu0 %v5597_v45  ;;  %8732 = vst [vmem:[#allocation34_spill] sm:$0xff] %v6521_v14 }
 0x1ca   :  { %5600 = vmatprep.subr.bf16.mxu0 %v5599_v47  ;;  %v203_v1 = vpop.permute.xlu1 %202 }
 0x1cb   :  { %v210_v44 = vpop.permute.xlu0 %209  ;;  %v6523_v57 = vmul.f32 1e+30, %v203_v1 }
 0x1cd   :  { %5602 = vmatpush3.bf16.msra.mxu0 %v5601_v52  ;;  %v6467_v52 = vmul.f32 1e+30, %v6326_v17  ;;  %v6488_v17 = vmul.f32 1e+30, %v165_v33  ;;  %v6512_v33 = vmul.f32 1e+30, %v173_v46 }
 0x1ce   :  { %5604 = vmatprep.subr.bf16.mxu0 %v5603_v53  ;;  %v214_v5 = vpop.permute.xlu1 %213  ;;  %v6470_v53 = vmul.f32 1e+30, %v6328_v18  ;;  %8733 = vst [vmem:[#allocation35_spill] sm:$0xff] %v6523_v57 }
 0x1cf   :  { %v6456_v47 = vpop.permute.xlu0 %232  ;;  %8714 = vst [vmem:[#allocation16_spill] sm:$0xff] %v6467_v52  ;;  %8721 = vst [vmem:[#allocation23_spill] sm:$0xff] %v6488_v17  ;;  %v6526_v12 = vmul.f32 1e+30, %v214_v5 }
 0x1d0   :  { %8715 = vst [vmem:[#allocation17_spill] sm:$0xff] %v6470_v53  ;;  %8729 = vst [vmem:[#allocation31_spill] sm:$0xff] %v6512_v33 }
 0x1d1   :  { %5606 = vmatpush3.bf16.msra.mxu0 %v5605_v60  ;;  %v6491_v60 = vmul.f32 1e+30, %v6348_v36 }
 0x1d2   :  { %5608 = vmatprep.subr.bf16.mxu0 %v5607_v61  ;;  %v225_v28 = vpop.permute.xlu1 %224  ;;  %v6500_v61 = vmul.f32 1e+30, %v6356_v41  ;;  %v4463_v41 = vld [vmem:[%s8597_s7 + $0x38] ss:$0 sm:$0xff] }
 0x1d3   :  { %v259_v18 = vpop.permute.xlu0 %258  ;;  %8722 = vst [vmem:[#allocation24_spill] sm:$0xff] %v6491_v60  ;;  %v6545_v1 = vmul.f32 1e+30, %v225_v28 }
 0x1d4   :  { %8725 = vst [vmem:[#allocation27_spill] sm:$0xff] %v6500_v61 }
 0x1d5   :  { %8736 = vst [vmem:[#allocation38_spill] sm:$0xff] %v6545_v1 }
 0x1d6   :  { %v229_v35 = vpop.permute.xlu1 %228 }
 0x1d7   :  { %v6547_v5 = vmul.f32 1e+30, %v229_v35 }
 0x1da   :  { %v240_v43 = vpop.permute.xlu1 %239 }
 0x1db   :  { %v6530_v59 = vmul.f32 1e+30, %v240_v43  ;;  %v6549_v43 = vmul.f32 1e+30, %v210_v44 }
 0x1dd   :  { %8735 = vst [vmem:[#allocation37_spill] sm:$0xff] %v6530_v59  ;;  %8737 = vst [vmem:[#allocation39_spill] sm:$0xff] %v6549_v43 }
 0x1de   :  { %v244_v45 = vpop.permute.xlu1 %243 }
 0x1e2   :  { %v218_v51 = vpop.permute.xlu1 %217 }
 0x1e6   :  { %v255_v22 = vpop.permute.xlu1 %254 }
 0x1ea   :  { %v248_v10 = vpop.permute.xlu1 %247 }
 0x1eb   :  { %v6562_v28 = vmul.f32 1e+30, %v248_v10 }
 0x1ed   :  { %8741 = vst [vmem:[#allocation43_spill] sm:$0xff] %v6562_v28 }
 0x22c   :  { %v692_v31 = vpop.f32.mrb[6].mxu1 }
 0x22d   :  { %v693_v36 = vadd.f32 %v692_v31, %v6334_v21  ;;  %v5342_v39 = vpop.f32.mrb[7].mxu1  ;;  %v6528_v21 = vmul.f32 1e+30, %v255_v22  ;;  %v263_v31 = vpop.permute.xlu0 %262 }
 0x22e   :  { %v6560_v4 = vmul.f32 1e+30, %v263_v31 }
 0x22f   :  { %v801_v24 = vadd.f32 %v6344_v32, %v693_v36  ;;  %8734 = vst [vmem:[#allocation36_spill] sm:$0xff] %v6528_v21  ;;  %v6543_v32 = vld [vmem:[%s8598_s8 + $0x188] sm:$0xff]  ;;  %v6551_v36 = vmul.f32 1e+30, %v244_v45 }
 0x230   :  { %v697_v46 = vpop.f32.mrb[8].mxu1  ;;  %8740 = vst [vmem:[#allocation42_spill] sm:$0xff] %v6560_v4 }
 0x231   :  { %v6532_v39 = vadd.f32 %v4463_v41, %v801_v24  ;;  %v698_v11 = vadd.f32 %v697_v46, %v6336_v23  ;;  %v5345_v62 = vpop.f32.mrb[9].mxu1  ;;  %8738 = vst [vmem:[#allocation40_spill] sm:$0xff] %v6551_v36  ;;  %v6553_v23 = vmul.f32 1e+30, %v218_v51  ;;  %v6556_v24 = vmul.f32 1e+30, %v259_v18 }
 0x233   :  { %v802_v22 = vadd.f32 %v6346_v34, %v698_v11  ;;  %8739 = vst [vmem:[#allocation41_spill] sm:$0xff] %v6556_v24  ;;  %v1030_v46 = vadd.f32 %v6532_v39, %v6528_v21  ;;  %v1199_v44 = vsub.f32 %v6532_v39, %v6528_v21  ;;  %v1027_v51 = vadd.f32 %v6532_v39, %v6530_v59 }
 0x234   :  { %v702_v62 = vpop.f32.mrb[10].mxu1  ;;  %v1196_v18 = vsub.f32 %v6532_v39, %v6530_v59  ;;  %v893_v10 = vmul.f32 %v6532_v39, %v6532_v39  ;;  %v6579_v31 = vadd.f32 %v6532_v39, %v6459_v48  ;;  %v6600_v30 = vadd.f32 %v6532_v39, %v6470_v53 }
 0x235   :  { %v6568_v45 = vadd.f32 %v4463_v41, %v802_v22  ;;  %v703_v11 = vadd.f32 %v702_v62, %v6340_v26  ;;  %v5348_v34 = vpop.f32.mrb[11].mxu1  ;;  %v6583_v22 = vadd.f32 %v6532_v39, %v6462_v49  ;;  %v1009_v8 = vadd.f32 %v6532_v39, %v6494_v19 }
 0x237   :  { %v1031_v26 = vadd.f32 %v6568_v45, %v6556_v24  ;;  %v1200_v62 = vsub.f32 %v6568_v45, %v6556_v24  ;;  %v803_v34 = vadd.f32 %v6350_v37, %v703_v11  ;;  %v1028_v35 = vadd.f32 %v6568_v45, %v6551_v36 }
 0x238   :  { %v1197_v21 = vsub.f32 %v6568_v45, %v6551_v36  ;;  %v5571_v59 = vpack.c.bf16 %v6568_v45, %v6532_v39  ;;  %v894_v13 = vmul.f32 %v6568_v45, %v6568_v45  ;;  %v1006_v36 = vadd.f32 %v6532_v39, %v6486_v58 }
 0x239   :  { %v1121_v29 = vmin.f32 %v1030_v46, %v1031_v26  ;;  %v1290_v24 = vmax.f32 %v1199_v44, %v1200_v62  ;;  %v6602_v6 = vadd.f32 %v4463_v41, %v803_v34  ;;  %v1113_v37 = vmin.f32 %v1027_v51, %v1028_v35 }
 0x23a   :  { %v1282_v11 = vmax.f32 %v1196_v18, %v1197_v21  ;;  %5572 = vmatprep.subr.bf16.mxu1 %v5571_v59  ;;  %v5575_v27 = vpack.c.bf16 %v894_v13, %v893_v10  ;;  %v998_v13 = vadd.f32 %v6568_v45, %v6464_v50  ;;  %v1012_v46 = vadd.f32 %v6532_v39, %v6488_v17 }
 0x23b   :  { %v1032_v38 = vadd.f32 %v6602_v6, %v6560_v4  ;;  %v1201_v53 = vsub.f32 %v6602_v6, %v6560_v4  ;;  %v1029_v41 = vadd.f32 %v6602_v6, %v6562_v28  ;;  %v1198_v21 = vsub.f32 %v6602_v6, %v6562_v28  ;;  %5574 = vmatpush3.bf16.msra.mxu1 %v5571_v59 }
 0x23c   :  { %5364 = vmatprep.subr.mxu1 %v6602_v6  ;;  %v1015_v35 = vadd.f32 %v6532_v39, %v6506_v0  ;;  %v1018_v44 = vadd.f32 %v6532_v39, %v6514_v40  ;;  %v895_v26 = vmul.f32 %v6602_v6, %v6602_v6  ;;  %v999_v62 = vadd.f32 %v6602_v6, %v6478_v15 }
 0x23d   :  { %v6625_v51 = vmin.f32 %v1121_v29, %v1032_v38  ;;  %v6627_v18 = vmax.f32 %v1290_v24, %v1201_v53  ;;  %v1114_v10 = vmin.f32 %v1113_v37, %v1029_v41  ;;  %v6629_v59 = vmax.f32 %v1282_v11, %v1198_v21 }
 0x23e   :  { %v1001_v34 = vadd.f32 %v6568_v45, %v6467_v52  ;;  %v1004_v4 = vadd.f32 %v6568_v45, %v6475_v55  ;;  %v1002_v29 = vadd.f32 %v6602_v6, %v6483_v16  ;;  %v1005_v38 = vadd.f32 %v6602_v6, %v6472_v54 }
 0x23f   :  { %8742 = vst [vmem:[#allocation44_spill] sm:$0xff] %v6627_v18  ;;  %v1115_v28 = vrot.slane %v1114_v10, 4  ;;  %5365 = vmatpush3.msra.mxu1 %v6602_v6  ;;  %v1007_v53 = vadd.f32 %v6568_v45, %v6491_v60  ;;  %v6647_v24 = vmul.f32 1e+30, %v6456_v47  ;;  %v1008_v37 = vadd.f32 %v6602_v6, %v6497_v20 }
 0x240   :  { %5367 = vmatmul.mubr.msk.f32.vlgmr.msra.gmra.mrb[12].mxu1 %vm52_vm5, %v6168_v9  ;;  %5576 = vmatprep.subr.bf16.mxu1 %v5575_v27  ;;  %v1010_v11 = vadd.f32 %v6568_v45, %v6480_v56  ;;  %v1013_v41 = vadd.f32 %v6568_v45, %v6500_v61  ;;  %v1011_v47 = vadd.f32 %v6602_v6, %v6503_v25 }
 0x241   :  { %5578 = vmatpush3.bf16.msra.mxu1 %v5575_v27  ;;  %v1016_v0 = vadd.f32 %v6568_v45, %v6509_v2  ;;  %v6663_v17 = vmin.f32 %v1114_v10, %v1115_v28  ;;  %5375 = vmatprep.mubr.msk.f32.mxu1 %vm52_vm5, %v6150_v3  ;;  %v1014_v21 = vadd.f32 %v6602_v6, %v6512_v33 }
 0x242   :  { %5373 = vmatprep.subr.mxu1 %v895_v26  ;;  %v1019_v27 = vadd.f32 %v6568_v45, %v6519_v42  ;;  %v1017_v40 = vadd.f32 %v6602_v6, %v6521_v14  ;;  %v1020_v18 = vadd.f32 %v6602_v6, %v6523_v57  ;;  %v1033_v28 = vmin.f32 %v6579_v31, %v998_v13 }
 0x243   :  { %v1041_v10 = vmin.f32 %v6583_v22, %v1001_v34  ;;  %v1049_v19 = vmin.f32 %v6600_v30, %v1004_v4  ;;  %v1057_v2 = vmin.f32 %v1006_v36, %v1007_v53  ;;  %v1065_v3 = vmin.f32 %v1009_v8, %v1010_v11 }
 0x244   :  { %v1073_v61 = vmin.f32 %v1012_v46, %v1013_v41  ;;  %v1034_v33 = vmin.f32 %v1033_v28, %v999_v62  ;;  %v1081_v56 = vmin.f32 %v1015_v35, %v1016_v0  ;;  %v1089_v42 = vmin.f32 %v1018_v44, %v1019_v27 }
 0x245   :  { %5374 = vmatpush3.msra.mxu1 %v895_v26  ;;  %v1042_v25 = vmin.f32 %v1041_v10, %v1002_v29  ;;  %v1050_v14 = vmin.f32 %v1049_v19, %v1005_v38  ;;  %v1058_v20 = vmin.f32 %v1057_v2, %v1008_v37  ;;  %v1066_v57 = vmin.f32 %v1065_v3, %v1011_v47 }
 0x246   :  { %5376 = vmatmul.mubr.msk.f32.vlgmr.msra.gmra.mrb[14].mxu1 %vm52_vm5, %v6168_v9  ;;  %v1074_v60 = vmin.f32 %v1073_v61, %v1014_v21  ;;  %v1035_v31 = vrot.slane %v1034_v33, 4  ;;  %v1082_v22 = vmin.f32 %v1081_v56, %v1017_v40  ;;  %v1090_v34 = vmin.f32 %v1089_v42, %v1020_v18 }
 0x247   :  { %v1043_v13 = vrot.slane %v1042_v25, 4  ;;  %v8743_v4 = vpack.c.bf16 %v6543_v32, %v6538_v63  ;;  %v1051_v8 = vrot.slane %v1050_v14, 4  ;;  %v1059_v30 = vrot.slane %v1058_v20, 4 }
 0x248   :  { %v1067_v36 = vrot.slane %v1066_v57, 4  ;;  %v1075_v0 = vrot.slane %v1074_v60, 4  ;;  %v1036_v46 = vmin.f32 %v1034_v33, %v1035_v31  ;;  %v1083_v44 = vrot.slane %v1082_v22, 4 }
 0x249   :  { %5612 = vmatprep.subr.bf16.mxu1 %v8743_v4  ;;  %v1044_v35 = vmin.f32 %v1042_v25, %v1043_v13  ;;  %v1091_v19 = vrot.slane %v1090_v34, 4  ;;  %v1052_v3 = vmin.f32 %v1050_v14, %v1051_v8  ;;  %v1060_v61 = vmin.f32 %v1058_v20, %v1059_v30 }
 0x24a   :  { %v1068_v2 = vmin.f32 %v1066_v57, %v1067_v36  ;;  %v1076_v26 = vmin.f32 %v1074_v60, %v1075_v0  ;;  %v1037_v56 = vrot.slane %v1036_v46, 2  ;;  %v1084_v42 = vmin.f32 %v1082_v22, %v1083_v44 }
 0x24b   :  { %v1045_v40 = vrot.slane %v1044_v35, 2  ;;  %v1092_v63 = vmin.f32 %v1090_v34, %v1091_v19  ;;  %v1053_v32 = vrot.slane %v1052_v3, 2  ;;  %v1061_v18 = vrot.slane %v1060_v61, 2 }
 0x24c   :  { %v1069_v62 = vrot.slane %v1068_v2, 2  ;;  %v1077_v29 = vrot.slane %v1076_v26, 2  ;;  %v1038_v33 = vmin.f32 %v1036_v46, %v1037_v56  ;;  %v1085_v38 = vrot.slane %v1084_v42, 2 }
 0x24d   :  { %v1046_v25 = vmin.f32 %v1044_v35, %v1045_v40  ;;  %v1093_v53 = vrot.slane %v1092_v63, 2  ;;  %v1054_v14 = vmin.f32 %v1052_v3, %v1053_v32  ;;  %v1062_v20 = vmin.f32 %v1060_v61, %v1061_v18 }
 0x24e   :  { %v1070_v57 = vmin.f32 %v1068_v2, %v1069_v62  ;;  %v1078_v60 = vmin.f32 %v1076_v26, %v1077_v29  ;;  %v1039_v37 = vrot.slane %v1038_v33, 1  ;;  %v1086_v41 = vmin.f32 %v1084_v42, %v1085_v38 }
 0x24f   :  { %v1047_v11 = vrot.slane %v1046_v25, 1  ;;  %v1094_v21 = vmin.f32 %v1092_v63, %v1093_v53  ;;  %v1055_v47 = vrot.slane %v1054_v14, 1  ;;  %v1063_v27 = vrot.slane %v1062_v20, 1 }
 0x250   :  { %v1071_v28 = vrot.slane %v1070_v57, 1  ;;  %v1079_v10 = vrot.slane %v1078_v60, 1  ;;  %v8744_v31 = vrot.slane %v6625_v51, 4  ;;  %v1117_v22 = vrot.slane %v6663_v17, 2 }
 0x251   :  { %v1040_v34 = vmin.f32 %v1038_v33, %v1039_v37  ;;  %v1048_v4 = vmin.f32 %v1046_v25, %v1047_v11  ;;  %v1056_v8 = vmin.f32 %v1054_v14, %v1055_v47  ;;  %v1064_v30 = vmin.f32 %v1062_v20, %v1063_v27 }
 0x252   :  { %v1124_v13 = vmin.f32 %v6625_v51, %v8744_v31  ;;  %v1087_v36 = vrot.slane %v1086_v41, 1  ;;  %v1095_v0 = vrot.slane %v1094_v21, 1  ;;  %v1072_v46 = vmin.f32 %v1070_v57, %v1071_v28 }
 0x253   :  { %v1080_v35 = vmin.f32 %v1078_v60, %v1079_v10  ;;  %v1146_v44 = vsel %vm1145_vm10, %v1048_v4, %v1040_v34  ;;  %v1021_v19 = vadd.f32 %v6532_v39, %v6549_v43  ;;  %v1022_v51 = vadd.f32 %v6568_v45, %v6526_v12  ;;  %v8746_v4 = vld [vmem:[#allocation17_spill] sm:$0xff] }
 0x254   :  { %v1148_v3 = vsel %vm1147_vm11, %v1056_v8, %v1146_v44  ;;  %v1023_v61 = vadd.f32 %v6602_v6, %v6553_v23  ;;  %v1024_v2 = vadd.f32 %v6532_v39, %v6545_v1  ;;  %v1025_v56 = vadd.f32 %v6568_v45, %v6547_v5 }
 0x255   :  { %v1150_v26 = vsel %vm1149_vm12, %v1064_v30, %v1148_v3  ;;  %v1026_v40 = vadd.f32 %v6602_v6, %v6647_v24  ;;  %v1118_v42 = vmin.f32 %v6663_v17, %v1117_v22  ;;  %v1088_v63 = vmin.f32 %v1086_v41, %v1087_v36  ;;  %v8748_v3 = vld [vmem:[#allocation26_spill] sm:$0xff] }
 0x256   :  { %v1152_v32 = vsel %vm8679_vm13, %v1072_v46, %v1150_v26  ;;  %v1097_v18 = vmin.f32 %v1021_v19, %v1022_v51  ;;  %v1125_v62 = vrot.slane %v1124_v13, 2  ;;  %v1096_v29 = vmin.f32 %v1094_v21, %v1095_v0  ;;  %v8750_v26 = vld [vmem:[#allocation21_spill] sm:$0xff] }
 0x257   :  { %v1154_v33 = vsel %vm8678_vm14, %v1080_v35, %v1152_v32  ;;  %v1105_v25 = vmin.f32 %v1024_v2, %v1025_v56  ;;  %v1119_v38 = vrot.slane %v1118_v42, 1  ;;  %v8745_v53 = vrot.slane %v6629_v59, 4  ;;  %v8747_v35 = vld [vmem:[#allocation24_spill] sm:$0xff]  ;;  %v8752_v32 = vld [vmem:[#allocation23_spill] sm:$0xff] }
 0x258   :  { %v1156_v20 = vsel %vm8677_vm15, %v1088_v63, %v1154_v33  ;;  %v1098_v57 = vmin.f32 %v1097_v18, %v1023_v61  ;;  %v1126_v60 = vmin.f32 %v1124_v13, %v1125_v62  ;;  %v1166_v11 = vsub.f32 %v6532_v39, %v6459_v48  ;;  %v8749_v61 = vld [vmem:[#allocation25_spill] sm:$0xff]  ;;  %v8753_v62 = vld [vmem:[#allocation27_spill] sm:$0xff] }
 0x259   :  { %v6710_v14 = vmax.f32 %v6629_v59, %v8745_v53  ;;  %v6714_v17 = vsel %vm8676_vm1, %v1096_v29, %v1156_v20  ;;  %v1106_v37 = vmin.f32 %v1105_v25, %v1026_v40  ;;  %v1167_v41 = vsub.f32 %v6568_v45, %v6464_v50  ;;  %v8754_v25 = vld [vmem:[#allocation31_spill] sm:$0xff]  ;;  %v8755_v53 = vld [vmem:[#allocation29_spill] sm:$0xff] }
 0x25a   :  { %4468 = vmatprep.mubr.msk.f32.mxu0 %vm60_vm9, %v6714_v17  ;;  %v1099_v59 = vrot.slane %v1098_v57, 4  ;;  %v1120_v21 = vmin.f32 %v1118_v42, %v1119_v38  ;;  %v1127_v47 = vrot.slane %v1126_v60, 1  ;;  %v1168_v27 = vsub.f32 %v6602_v6, %v6478_v15  ;;  %v8751_v42 = vld [vmem:[#allocation28_spill] sm:$0xff] }
 0x25b   :  { %v1107_v28 = vrot.slane %v1106_v37, 4  ;;  %v1169_v10 = vsub.f32 %v6532_v39, %v6462_v49  ;;  %v1170_v31 = vsub.f32 %v6568_v45, %v6467_v52  ;;  %v1171_v13 = vsub.f32 %v6602_v6, %v6483_v16 }
 0x25c   :  { %v1100_v22 = vmin.f32 %v1098_v57, %v1099_v59  ;;  %v1128_v34 = vmin.f32 %v1126_v60, %v1127_v47  ;;  %v1172_v8 = vsub.f32 %v6532_v39, %v8746_v4  ;;  %v1173_v30 = vsub.f32 %v6568_v45, %v6475_v55  ;;  %v8756_v57 = vld [vmem:[#allocation30_spill] sm:$0xff] }
 0x25d   :  { %v1108_v36 = vmin.f32 %v1106_v37, %v1107_v28  ;;  %v1174_v0 = vsub.f32 %v6602_v6, %v6472_v54  ;;  %v1175_v46 = vsub.f32 %v6532_v39, %v6486_v58  ;;  %v1176_v44 = vsub.f32 %v6568_v45, %v8747_v35  ;;  %v8757_v59 = vld [vmem:[#allocation34_spill] sm:$0xff]  ;;  %v8758_v28 = vld [vmem:[#allocation32_spill] sm:$0xff] }
 0x25e   :  { %v1101_v19 = vrot.slane %v1100_v22, 2  ;;  %v1177_v51 = vsub.f32 %v6602_v6, %v8748_v3  ;;  %v1178_v2 = vsub.f32 %v6532_v39, %v8749_v61  ;;  %v1179_v56 = vsub.f32 %v6568_v45, %v8750_v26 }
 0x25f   :  { %v1109_v40 = vrot.slane %v1108_v36, 2  ;;  %v1180_v63 = vsub.f32 %v6602_v6, %v8751_v42  ;;  %v1181_v18 = vsub.f32 %v6532_v39, %v8752_v32  ;;  %v1182_v29 = vsub.f32 %v6568_v45, %v8753_v62  ;;  %v8759_v42 = vld [vmem:[#allocation33_spill] sm:$0xff] }
 0x260   :  { %v1102_v33 = vmin.f32 %v1100_v22, %v1101_v19  ;;  %v1183_v38 = vsub.f32 %v6602_v6, %v8754_v25  ;;  %v1184_v20 = vsub.f32 %v6532_v39, %v8755_v53  ;;  %v1185_v60 = vsub.f32 %v6568_v45, %v8756_v57 }
 0x261   :  { %v1110_v37 = vmin.f32 %v1108_v36, %v1109_v40  ;;  %v1186_v47 = vsub.f32 %v6602_v6, %v8757_v59  ;;  %v1187_v9 = vsub.f32 %v6532_v39, %v8758_v28  ;;  %v1188_v3 = vsub.f32 %v6568_v45, %v8759_v42 }
 0x262   :  { %v1103_v22 = vrot.slane %v1102_v33, 1  ;;  %v1202_v19 = vmax.f32 %v1166_v11, %v1167_v41  ;;  %v1210_v54 = vmax.f32 %v1169_v10, %v1170_v31  ;;  %v1218_v25 = vmax.f32 %v1172_v8, %v1173_v30 }
 0x263   :  { %v1111_v16 = vrot.slane %v1110_v37, 1  ;;  %v1226_v15 = vmax.f32 %v1175_v46, %v1176_v44  ;;  %v1234_v62 = vmax.f32 %v1178_v2, %v1179_v56  ;;  %v1242_v26 = vmax.f32 %v1181_v18, %v1182_v29 }
 0x264   :  { %v1104_v35 = vmin.f32 %v1102_v33, %v1103_v22  ;;  %v1203_v57 = vmax.f32 %v1202_v19, %v1168_v27  ;;  %v1211_v36 = vmax.f32 %v1210_v54, %v1171_v13  ;;  %v1219_v40 = vmax.f32 %v1218_v25, %v1174_v0  ;;  %v8760_v0 = vld [vmem:[#allocation35_spill] sm:$0xff] }
 0x265   :  { %v1112_v55 = vmin.f32 %v1110_v37, %v1111_v16  ;;  %v1227_v59 = vmax.f32 %v1226_v15, %v1177_v51  ;;  %v1235_v52 = vmax.f32 %v1234_v62, %v1180_v63  ;;  %v1243_v50 = vmax.f32 %v1242_v26, %v1183_v38 }
 0x266   :  { %v1204_v28 = vrot.slane %v1203_v57, 4  ;;  %v1212_v53 = vrot.slane %v1211_v36, 4  ;;  %v1220_v32 = vrot.slane %v1219_v40, 4  ;;  %v1250_v42 = vmax.f32 %v1184_v20, %v1185_v60 }
 0x267   :  { %v1159_v11 = vsel %vm1145_vm10, %v1112_v55, %v1104_v35  ;;  %v1228_v41 = vrot.slane %v1227_v59, 4  ;;  %v1236_v10 = vrot.slane %v1235_v52, 4  ;;  %v1244_v31 = vrot.slane %v1243_v50, 4 }
 0x268   :  { %v1160_v8 = vsel %vm1147_vm11, %v1120_v21, %v1159_v11  ;;  %v1205_v30 = vmax.f32 %v1203_v57, %v1204_v28  ;;  %v1213_v46 = vmax.f32 %v1211_v36, %v1212_v53  ;;  %v1221_v27 = vmax.f32 %v1219_v40, %v1220_v32 }
 0x269   :  { %v6768_v54 = vsel %vm1149_vm12, %v1128_v34, %v1160_v8  ;;  %v1229_v15 = vmax.f32 %v1227_v59, %v1228_v41  ;;  %v1237_v16 = vmax.f32 %v1235_v52, %v1236_v10  ;;  %v1245_v13 = vmax.f32 %v1243_v50, %v1244_v31 }
 0x26a   :  { %v1189_v44 = vsub.f32 %v6602_v6, %v8760_v0  ;;  %v1206_v51 = vrot.slane %v1205_v30, 2  ;;  %v1214_v2 = vrot.slane %v1213_v46, 2  ;;  %v1222_v55 = vrot.slane %v1221_v27, 2 }
 0x26b   :  { %v1230_v35 = vrot.slane %v1229_v15, 2  ;;  %v1238_v26 = vrot.slane %v1237_v16, 2  ;;  %v1246_v56 = vrot.slane %v1245_v13, 2  ;;  %v1251_v63 = vmax.f32 %v1250_v42, %v1186_v47 }
 0x26c   :  { %v1207_v21 = vmax.f32 %v1205_v30, %v1206_v51  ;;  %v1215_v18 = vmax.f32 %v1213_v46, %v1214_v2  ;;  %v1223_v62 = vmax.f32 %v1221_v27, %v1222_v55  ;;  %v1258_v32 = vmax.f32 %v1187_v9, %v1188_v3  ;;  %v8761_v2 = vld [vmem:[#allocation44_spill] sm:$0xff] }
 0x26d   :  { %v1231_v29 = vmax.f32 %v1229_v15, %v1230_v35  ;;  %v1239_v34 = vmax.f32 %v1237_v16, %v1238_v26  ;;  %v1247_v33 = vmax.f32 %v1245_v13, %v1246_v56  ;;  %v1252_v25 = vrot.slane %v1251_v63, 4 }
 0x26e   :  { %v1208_v52 = vrot.slane %v1207_v21, 1  ;;  %v1216_v50 = vrot.slane %v1215_v18, 1  ;;  %v1224_v38 = vrot.slane %v1223_v62, 1  ;;  %v1259_v53 = vmax.f32 %v1258_v32, %v1189_v44 }
 0x26f   :  { %v1232_v20 = vrot.slane %v1231_v29, 1  ;;  %v1240_v57 = vrot.slane %v1239_v34, 1  ;;  %v1248_v60 = vrot.slane %v1247_v33, 1  ;;  %v1253_v37 = vmax.f32 %v1251_v63, %v1252_v25 }
 0x270   :  { %v1209_v59 = vmax.f32 %v1207_v21, %v1208_v52  ;;  %v1217_v28 = vmax.f32 %v1215_v18, %v1216_v50  ;;  %v1225_v22 = vmax.f32 %v1223_v62, %v1224_v38  ;;  %v1260_v42 = vrot.slane %v1259_v53, 4 }
 0x271   :  { %v1233_v47 = vmax.f32 %v1231_v29, %v1232_v20  ;;  %v1241_v19 = vmax.f32 %v1239_v34, %v1240_v57  ;;  %v1249_v36 = vmax.f32 %v1247_v33, %v1248_v60  ;;  %v1254_v9 = vrot.slane %v1253_v37, 2 }
 0x272   :  { %v1261_v3 = vmax.f32 %v1259_v53, %v1260_v42  ;;  %v1310_v40 = vsel %vm1145_vm10, %v1217_v28, %v1209_v59  ;;  %v1190_v11 = vsub.f32 %v6532_v39, %v6549_v43  ;;  %v1191_v41 = vsub.f32 %v6568_v45, %v6526_v12 }
 0x273   :  { %v1255_v10 = vmax.f32 %v1253_v37, %v1254_v9  ;;  %v1311_v31 = vsel %vm1147_vm11, %v1225_v22, %v1310_v40  ;;  %v1192_v8 = vsub.f32 %v6602_v6, %v6553_v23  ;;  %v1193_v30 = vsub.f32 %v6532_v39, %v6545_v1 }
 0x274   :  { %v1262_v46 = vrot.slane %v1261_v3, 2  ;;  %v1312_v27 = vsel %vm1149_vm12, %v1233_v47, %v1311_v31  ;;  %v1194_v15 = vsub.f32 %v6568_v45, %v6547_v5  ;;  %v1195_v16 = vsub.f32 %v6602_v6, %v6647_v24 }
 0x275   :  { %v1256_v13 = vrot.slane %v1255_v10, 1  ;;  %v1313_v44 = vsel %vm8679_vm13, %v1241_v19, %v1312_v27  ;;  %v1266_v51 = vmax.f32 %v1190_v11, %v1191_v41  ;;  %v8762_v55 = vrot.slane %v8761_v2, 4  ;;  %v1357_v11 = vld [vmem:[%s8598_s8 + $0x70] sm:$0xff]  ;;  %v1358_v41 = vld [vmem:[%s8598_s8 + $0x78] sm:$0xff] }
 0x276   :  { %v1263_v26 = vmax.f32 %v1261_v3, %v1262_v46  ;;  %v1314_v39 = vsel %vm8678_vm14, %v1249_v36, %v1313_v44  ;;  %v1274_v56 = vmax.f32 %v1193_v30, %v1194_v15  ;;  %v1286_v63 = vrot.slane %v6710_v14, 2  ;;  %v1393_v46 = vld [vmem:[%s8598_s8 + $0x190] sm:$0xff]  ;;  %v1394_v27 = vld [vmem:[%s8598_s8 + $0x198] sm:$0xff]  ;;  %v1423_v15 = vld [vmem:[%s8598_s8 + $0x280] sm:$0xff] }
 0x277   :  { %v1293_v35 = vmax.f32 %v8761_v2, %v8762_v55  ;;  %v1257_v21 = vmax.f32 %v1255_v10, %v1256_v13  ;;  %v1267_v18 = vmax.f32 %v1266_v51, %v1192_v8  ;;  %v1375_v10 = vld [vmem:[%s8598_s8 + $0x100] sm:$0xff]  ;;  %v5609_v31 = vpack.c.bf16 %v1358_v41, %v1357_v11  ;;  %v1376_v8 = vld [vmem:[%s8598_s8 + $0x108] sm:$0xff]  ;;  %v1377_v44 = vld [vmem:[%s8598_s8 + $0x110] sm:$0xff] }
 0x278   :  { %v1264_v45 = vrot.slane %v1263_v26, 1  ;;  %v1275_v62 = vmax.f32 %v1274_v56, %v1195_v16  ;;  %v1287_v52 = vmax.f32 %v6710_v14, %v1286_v63  ;;  %v5613_v30 = vpack.c.bf16 %v1376_v8, %v1375_v10  ;;  %v1424_v13 = vld [vmem:[%s8598_s8 + $0x288] sm:$0xff]  ;;  %v1378_v51 = vld [vmem:[%s8598_s8 + $0x118] sm:$0xff]  ;;  %v1379_v56 = vld [vmem:[%s8598_s8 + $0x120] sm:$0xff] }
 0x279   :  { %v1315_v6 = vsel %vm8677_vm15, %v1257_v21, %v1314_v39  ;;  %v1268_v32 = vrot.slane %v1267_v18, 4  ;;  %v1294_v33 = vrot.slane %v1293_v35, 2  ;;  %5610 = vmatpush3.bf16.msra.mxu0 %v5609_v31  ;;  %v5615_v16 = vpack.c.bf16 %v1394_v27, %v1393_v46  ;;  %v1380_v63 = vld [vmem:[%s8598_s8 + $0x128] sm:$0xff]  ;;  %v1389_v41 = vld [vmem:[%s8598_s8 + $0x170] sm:$0xff]  ;;  %v1390_v10 = vld [vmem:[%s8598_s8 + $0x178] sm:$0xff] }
 0x27a   :  { %v1265_v29 = vmax.f32 %v1263_v26, %v1264_v45  ;;  %v1276_v34 = vrot.slane %v1275_v62, 4  ;;  %v1288_v37 = vrot.slane %v1287_v52, 1  ;;  %5614 = vmatpush3.bf16.msra.mxu1 %v5613_v30  ;;  %v5643_v2 = vpack.c.bf16 %v1424_v13, %v1423_v15  ;;  %v1396_v26 = vld [vmem:[%s8598_s8 + $0x1a8] sm:$0xff]  ;;  %v1398_v45 = vld [vmem:[%s8598_s8 + $0x1b8] sm:$0xff]  ;;  %v1455_v31 = vld [vmem:[%s8598_s8 + $0x380] sm:$0xff] }
 0x27b   :  { %v1269_v25 = vmax.f32 %v1267_v18, %v1268_v32  ;;  %v1295_v57 = vmax.f32 %v1293_v35, %v1294_v33  ;;  %v5617_v55 = vpack.c.bf16 %v1378_v51, %v1377_v44  ;;  %5616 = vmatprep.subr.bf16.mxu1 %v5615_v16  ;;  %v1395_v35 = vld [vmem:[%s8598_s8 + $0x1a0] sm:$0xff]  ;;  %v5621_v21 = vpack.c.bf16 %v1380_v63, %v1379_v56  ;;  %v1397_v18 = vld [vmem:[%s8598_s8 + $0x1b0] sm:$0xff]  ;;  %v1382_v32 = vld [vmem:[%s8598_s8 + $0x138] sm:$0xff] }
 0x27c   :  { %v6796_v50 = vsel %vm8676_vm1, %v1265_v29, %v1315_v6  ;;  %v1277_v38 = vmax.f32 %v1275_v62, %v1276_v34  ;;  %v1289_v19 = vmax.f32 %v1287_v52, %v1288_v37  ;;  %5644 = vmatprep.subr.bf16.mxu0 %v5643_v2  ;;  %v5619_v39 = vpack.c.bf16 %v1396_v26, %v1395_v35  ;;  %v1381_v6 = vld [vmem:[%s8598_s8 + $0x130] sm:$0xff]  ;;  %v1399_v34 = vld [vmem:[%s8598_s8 + $0x1c0] sm:$0xff]  ;;  %v1400_v33 = vld [vmem:[%s8598_s8 + $0x1c8] sm:$0xff] }
 0x27d   :  { %v1270_v53 = vrot.slane %v1269_v25, 2  ;;  %v1296_v42 = vrot.slane %v1295_v57, 1  ;;  %v5623_v62 = vpack.c.bf16 %v1398_v45, %v1397_v18  ;;  %v5625_v29 = vpack.c.bf16 %v1382_v32, %v1381_v6  ;;  %v1383_v52 = vld [vmem:[%s8598_s8 + $0x140] sm:$0xff]  ;;  %v1385_v37 = vld [vmem:[%s8598_s8 + $0x150] sm:$0xff]  ;;  %v1456_v8 = vld [vmem:[%s8598_s8 + $0x388] sm:$0xff] }
 0x27e   :  { %v1278_v20 = vrot.slane %v1277_v38, 2  ;;  %5618 = vmatpush3.bf16.msra.mxu1 %v5617_v55  ;;  %v5641_v30 = vpack.c.bf16 %v1390_v10, %v1389_v41  ;;  %v5675_v46 = vpack.c.bf16 %v1456_v8, %v1455_v31  ;;  %v62_v27 = vmax.f32 %v6320_v7, 1.0  ;;  %v8763_v16 = vld [vmem:[#allocation14_spill] sm:$0xff]  ;;  %v1425_v35 = vld [vmem:[%s8598_s8 + $0x290] sm:$0xff]  ;;  %v1426_v26 = vld [vmem:[%s8598_s8 + $0x298] sm:$0xff] }
 0x27f   :  { %v1271_v60 = vmax.f32 %v1269_v25, %v1270_v53  ;;  %v1297_v9 = vmax.f32 %v1295_v57, %v1296_v42  ;;  %5620 = vmatprep.subr.bf16.mxu1 %v5619_v39  ;;  %v5627_v25 = vpack.c.bf16 %v1400_v33, %v1399_v34  ;;  %v1402_v57 = vld [vmem:[%s8598_s8 + $0x1d8] sm:$0xff]  ;;  %v63_v13 = vmax.f32 %v8763_v16, 1.0  ;;  %v1407_v2 = vld [vmem:[%s8598_s8 + $0x200] sm:$0xff]  ;;  %v1408_v55 = vld [vmem:[%s8598_s8 + $0x208] sm:$0xff] }
 0x280   :  { %v1279_v59 = vmax.f32 %v1277_v38, %v1278_v20  ;;  %v1384_v38 = vld [vmem:[%s8598_s8 + $0x148] sm:$0xff]  ;;  %v1401_v20 = vld [vmem:[%s8598_s8 + $0x1d0] sm:$0xff]  ;;  %v68_v15 = vadd.f32 1.0, %v62_v27  ;;  %v6916_v44 = vstv %s8596_s6  ;;  %v5645_v45 = vpack.c.bf16 %v1408_v55, %v1407_v2  ;;  %v1410_v34 = vld [vmem:[%s8598_s8 + $0x218] sm:$0xff] }
 0x281   :  { %v1272_v28 = vrot.slane %v1271_v60, 1  ;;  %v5629_v53 = vpack.c.bf16 %v1384_v38, %v1383_v52  ;;  %v5647_v32 = vpack.c.bf16 %v1426_v26, %v1425_v35  ;;  %v1427_v52 = vld [vmem:[%s8598_s8 + $0x2a0] sm:$0xff]  ;;  %v1428_v38 = vld [vmem:[%s8598_s8 + $0x2a8] sm:$0xff]  ;;  %vm61_vm1 = vcmp.gt.f32.partialorder %v8763_v16, 0.0  ;;  %v1413_v31 = vld [vmem:[%s8598_s8 + $0x230] sm:$0xff] }
 0x282   :  { %v1280_v22 = vrot.slane %v1279_v59, 1  ;;  %5622 = vmatpush3.bf16.msra.mxu1 %v5621_v21  ;;  %6035 = vlog2.f32 %v68_v15  ;;  %v1414_v8 = vld [vmem:[%s8598_s8 + $0x238] sm:$0xff]  ;;  %v1415_v35 = vld [vmem:[%s8598_s8 + $0x240] sm:$0xff]  ;;  %v1416_v26 = vld [vmem:[%s8598_s8 + $0x248] sm:$0xff] }
 0x283   :  { %v1273_v47 = vmax.f32 %v1271_v60, %v1272_v28  ;;  %5624 = vmatprep.subr.bf16.mxu1 %v5623_v62  ;;  %v5631_v60 = vpack.c.bf16 %v1402_v57, %v1401_v20  ;;  %v1403_v28 = vld [vmem:[%s8598_s8 + $0x1e0] sm:$0xff]  ;;  %6037 = vrcp.f32 %v63_v13 }
 0x284   :  { %v1281_v36 = vmax.f32 %v1279_v59, %v1280_v22  ;;  %v1386_v59 = vld [vmem:[%s8598_s8 + $0x158] sm:$0xff]  ;;  %v1404_v22 = vld [vmem:[%s8598_s8 + $0x1e8] sm:$0xff]  ;;  %6039 = vrcp.f32 %v62_v27  ;;  %v3036_v7 = vld [vmem:[%s8597_s7 + $0xa0] sm:$0xff] }
 0x285   :  { %v5633_v42 = vpack.c.bf16 %v1386_v59, %v1385_v37  ;;  %6041 = vrcp.f32 %v6916_v44  ;;  %v1411_v37 = vld [vmem:[%s8598_s8 + $0x220] sm:$0xff]  ;;  %v1432_v27 = vld [vmem:[%s8598_s8 + $0x2c8] sm:$0xff] }
 0x286   :  { %v1317_v3 = vsel %vm1145_vm10, %v1281_v36, %v1273_v47  ;;  %5626 = vmatpush3.bf16.msra.mxu1 %v5625_v29  ;;  %v5635_v47 = vpack.c.bf16 %v1404_v22, %v1403_v28  ;;  %v1388_v36 = vld [vmem:[%s8598_s8 + $0x168] sm:$0xff]  ;;  %v1409_v29 = vld [vmem:[%s8598_s8 + $0x210] sm:$0xff] }
 0x287   :  { %v1318_v14 = vsel %vm1147_vm11, %v1289_v19, %v1317_v3  ;;  %5628 = vmatprep.subr.bf16.mxu1 %v5627_v25  ;;  %v1387_v19 = vld [vmem:[%s8598_s8 + $0x160] sm:$0xff]  ;;  %v1406_v3 = vld [vmem:[%s8598_s8 + $0x1f8] sm:$0xff]  ;;  %v5649_v20 = vpack.c.bf16 %v1410_v34, %v1409_v29  ;;  %v1417_v29 = vld [vmem:[%s8598_s8 + $0x250] sm:$0xff] }
 0x288   :  { %v6801_v40 = vsel %vm1149_vm12, %v1297_v9, %v1318_v14  ;;  %v1405_v9 = vld [vmem:[%s8598_s8 + $0x1f0] sm:$0xff]  ;;  %v5637_v14 = vpack.c.bf16 %v1388_v36, %v1387_v19  ;;  %v1430_v19 = vld [vmem:[%s8598_s8 + $0x2b8] sm:$0xff]  ;;  %v8799_v16 = vld [vmem:[#allocation26_spill] sm:$0xff] }
 0x289   :  { %v5639_v11 = vpack.c.bf16 %v1406_v3, %v1405_v9  ;;  %v1418_v34 = vld [vmem:[%s8598_s8 + $0x258] sm:$0xff] }
 0x28a   :  { %5630 = vmatpush3.bf16.msra.mxu1 %v5629_v53  ;;  %v6965_v53 = vsel %vm60_vm9, %v6714_v17, 0.0  ;;  %v1412_v17 = vld [vmem:[%s8598_s8 + $0x228] sm:$0xff] }
 0x28b   :  { %5632 = vmatprep.subr.bf16.mxu1 %v5631_v60  ;;  %v5651_v60 = vpack.c.bf16 %v1428_v38, %v1427_v52  ;;  %v1435_v52 = vld [vmem:[%s8598_s8 + $0x2e0] sm:$0xff]  ;;  %v1436_v38 = vld [vmem:[%s8598_s8 + $0x2e8] sm:$0xff] }
 0x28c   :  { %v6036_v51 = vpop.eup %6035 }
 0x28d   :  { %v6931_v39 = vpop.eup %6037  ;;  %v6935_v21 = vmul.f32 0.6931472, %v6036_v51  ;;  %v5657_v51 = vpack.c.bf16 %v1414_v8, %v1413_v31 }
 0x28e   :  { %5634 = vmatpush3.bf16.msra.mxu1 %v5633_v42  ;;  %8764 = vst [vmem:[#allocation17_spill] sm:$0xff] %v6931_v39  ;;  %v6933_v63 = vpop.eup %6039 }
 0x28f   :  { %5636 = vmatprep.subr.bf16.mxu1 %v5635_v47  ;;  %8765 = vst [vmem:[#allocation25_spill] sm:$0xff] %v6933_v63  ;;  %v6937_v62 = vpop.eup %6041  ;;  %v1429_v47 = vld [vmem:[%s8598_s8 + $0x2b0] sm:$0xff] }
 0x290   :  { %v6950_v33 = vmul.f32 %v6937_v62, %v6935_v21  ;;  %v5655_v10 = vpack.c.bf16 %v1430_v19, %v1429_v47  ;;  %v1422_v47 = vld [vmem:[%s8598_s8 + $0x278] sm:$0xff] }
 0x292   :  { %5638 = vmatpush3.bf16.msra.mxu1 %v5637_v14  ;;  %8766 = vst [vmem:[#allocation35_spill] sm:$0xff] %v6950_v33  ;;  %v1325_v42 = vmul.f32 %v6965_v53, %v6950_v33  ;;  %v5653_v14 = vpack.c.bf16 %v1412_v17, %v1411_v37  ;;  %v1420_v37 = vld [vmem:[%s8598_s8 + $0x268] sm:$0xff]  ;;  %v1437_v17 = vld [vmem:[%s8598_s8 + $0x2f0] sm:$0xff] }
 0x293   :  { %5640 = vmatprep.subr.bf16.mxu1 %v5639_v11  ;;  %v69_v11 = vadd.f32 1.0, %v63_v13 }
 0x295   :  { %6043 = vlog2.f32 %v69_v11 }
 0x296   :  { %5642 = vmatpush3.bf16.msra.mxu1 %v5641_v30 }
 0x297   :  { %5676 = vmatprep.subr.bf16.mxu1 %v5675_v46  ;;  %v1431_v46 = vld [vmem:[%s8598_s8 + $0x2c0] sm:$0xff] }
 0x298   :  { %v5659_v55 = vpack.c.bf16 %v1432_v27, %v1431_v46  ;;  %v1487_v46 = vld [vmem:[%s8598_s8 + $0x480] sm:$0xff]  ;;  %v1488_v27 = vld [vmem:[%s8598_s8 + $0x488] sm:$0xff] }
 0x313   :  { %v5368_v56 = vpop.f32.mrb[12].mxu1 }
 0x314   :  { %v884_v18 = vpop.f32.mrb[13].mxu1  ;;  %v6953_v25 = vmul.f32 %v6931_v39, %v5368_v56  ;;  %v1433_v56 = vld [vmem:[%s8598_s8 + $0x2d0] sm:$0xff] }
 0x315   :  { %v6940_v6 = vmul.f32 %v6933_v63, %v884_v18  ;;  %v1434_v18 = vld [vmem:[%s8598_s8 + $0x2d8] sm:$0xff] }
 0x316   :  { %v976_v28 = vmul.f32 %v6953_v25, %v6953_v25 }
 0x317   :  { %1600 = vmatmul.mubr.f32.vlgmr.msra.gmra.mrb[18].mxu0 %v6940_v6  ;;  %v975_v9 = vmul.f32 %v6940_v6, %v6940_v6 }
 0x318   :  { %5646 = vmatpush3.bf16.msra.mxu0 %v5645_v45  ;;  %4469 = vmatprep.mubr.msk.f32.mxu0 %vm61_vm1, %v6768_v54  ;;  %v5661_v45 = vpack.c.bf16 %v1416_v26, %v1415_v35 }
 0x319   :  { %v5377_v57 = vpop.f32.mrb[14].mxu1  ;;  %5648 = vmatprep.subr.bf16.mxu0 %v5647_v32  ;;  %v5663_v32 = vpack.c.bf16 %v1434_v18, %v1433_v56  ;;  %v1441_v56 = vld [vmem:[%s8598_s8 + $0x310] sm:$0xff]  ;;  %v1442_v18 = vld [vmem:[%s8598_s8 + $0x318] sm:$0xff] }
 0x31a   :  { %v974_v59 = vmul.f32 %v6931_v39, %v5377_v57  ;;  %v962_v22 = vpop.f32.mrb[15].mxu1  ;;  %v5667_v57 = vpack.c.bf16 %v1436_v38, %v1435_v52  ;;  %v1459_v52 = vld [vmem:[%s8598_s8 + $0x3a0] sm:$0xff] }
 0x31b   :  { %v973_v36 = vmul.f32 %v6933_v63, %v962_v22  ;;  %1605 = vmatmul.mubr.f32.gmra.mrb[20].mxu0 %v6953_v25 }
 0x31c   :  { %v978_v3 = vsub.f32 %v974_v59, %v976_v28  ;;  %5650 = vmatpush3.bf16.msra.mxu0 %v5649_v20  ;;  %1749 = vmatprep.mubr.f32.mxu0 %v1325_v42  ;;  %v5665_v20 = vpack.c.bf16 %v1418_v34, %v1417_v29  ;;  %v1438_v59 = vld [vmem:[%s8598_s8 + $0x2f8] sm:$0xff]  ;;  %v6044_v28 = vpop.eup %6043  ;;  %v1421_v42 = vld [vmem:[%s8598_s8 + $0x270] sm:$0xff]  ;;  %v1471_v29 = vld [vmem:[%s8598_s8 + $0x400] sm:$0xff] }
 0x31d   :  { %v977_v41 = vsub.f32 %v973_v36, %v975_v9  ;;  %5652 = vmatprep.subr.bf16.mxu0 %v5651_v60  ;;  %v1419_v60 = vld [vmem:[%s8598_s8 + $0x260] sm:$0xff]  ;;  %v5671_v36 = vpack.c.bf16 %v1438_v59, %v1437_v17  ;;  %v7063_v31 = vmul.f32 0.6931472, %v6044_v28  ;;  %v1472_v34 = vld [vmem:[%s8598_s8 + $0x408] sm:$0xff] }
 0x31e   :  { %v980_v30 = vmax.f32 %v978_v3, 0.0  ;;  %v5669_v22 = vpack.c.bf16 %v1420_v37, %v1419_v60  ;;  %v1439_v9 = vld [vmem:[%s8598_s8 + $0x300] sm:$0xff]  ;;  %v1440_v3 = vld [vmem:[%s8598_s8 + $0x308] sm:$0xff]  ;;  %v1490_v60 = vld [vmem:[%s8598_s8 + $0x498] sm:$0xff]  ;;  %v5681_v37 = vpack.c.bf16 %v1442_v18, %v1441_v56  ;;  %v5709_v17 = vpack.c.bf16 %v1472_v34, %v1471_v29 }
 0x31f   :  { %v979_v15 = vmax.f32 %v977_v41, 0.0  ;;  %v1457_v41 = vld [vmem:[%s8598_s8 + $0x390] sm:$0xff]  ;;  %v1443_v59 = vld [vmem:[%s8598_s8 + $0x320] sm:$0xff]  ;;  %v1444_v28 = vld [vmem:[%s8598_s8 + $0x328] sm:$0xff] }
 0x320   :  { %v7004_v13 = vadd.f32 1e-05, %v980_v30  ;;  %5654 = vmatpush3.bf16.msra.mxu0 %v5653_v14  ;;  %v5673_v30 = vpack.c.bf16 %v1422_v47, %v1421_v42  ;;  %v1476_v56 = vld [vmem:[%s8598_s8 + $0x428] sm:$0xff]  ;;  %v1463_v18 = vld [vmem:[%s8598_s8 + $0x3c0] sm:$0xff] }
 0x321   :  { %v981_v2 = vadd.f32 1e-05, %v979_v15  ;;  %5656 = vmatprep.subr.bf16.mxu0 %v5655_v10  ;;  %v1458_v10 = vld [vmem:[%s8598_s8 + $0x398] sm:$0xff] }
 0x322   :  { %6045 = vrsqrt.f32 %v7004_v13  ;;  %vm992_vm13 = vcmp.eq.f32.partialorder %v7004_v13, inf  ;;  %v5679_v26 = vpack.c.bf16 %v1458_v10, %v1457_v41  ;;  %v1492_v41 = vld [vmem:[%s8598_s8 + $0x4a8] sm:$0xff]  ;;  %v5685_v10 = vpack.c.bf16 %v1444_v28, %v1443_v59  ;;  %v1495_v59 = vld [vmem:[%s8598_s8 + $0x4c0] sm:$0xff] }
 0x323   :  { %6047 = vrsqrt.f32 %v981_v2  ;;  %vm985_vm15 = vcmp.eq.f32.partialorder %v981_v2, inf  ;;  %v988_v8 = vand.u32 2147483648, %v981_v2  ;;  %vm987_vm14 = vcmp.eq.f32.partialorder %v981_v2, 0.0  ;;  %v1496_v28 = vld [vmem:[%s8598_s8 + $0x4c8] sm:$0xff] }
 0x324   :  { %5658 = vmatpush3.bf16.msra.mxu0 %v5657_v51  ;;  %6049 = vrcp.f32 %v6935_v21  ;;  %v5677_v51 = vpack.c.bf16 %v1440_v3, %v1439_v9  ;;  %v1461_v9 = vld [vmem:[%s8598_s8 + $0x3b0] sm:$0xff]  ;;  %v1462_v3 = vld [vmem:[%s8598_s8 + $0x3b8] sm:$0xff] }
 0x325   :  { %5660 = vmatprep.subr.bf16.mxu0 %v5659_v55  ;;  %6051 = vrcp.f32 %v7063_v31 }
 0x328   :  { %5662 = vmatpush3.bf16.msra.mxu0 %v5661_v45  ;;  %v995_v45 = vand.u32 2147483648, %v7004_v13 }
 0x329   :  { %5664 = vmatprep.subr.bf16.mxu0 %v5663_v32  ;;  %v5707_v32 = vpack.c.bf16 %v1488_v27, %v1487_v46  ;;  %v5687_v46 = vpack.c.bf16 %v1462_v3, %v1461_v9  ;;  %v1445_v27 = vld [vmem:[%s8598_s8 + $0x330] sm:$0xff]  ;;  %v1479_v9 = vld [vmem:[%s8598_s8 + $0x440] sm:$0xff]  ;;  %v5723_v3 = vpack.c.bf16 %v1496_v28, %v1495_v59  ;;  %v1502_v59 = vld [vmem:[%s8598_s8 + $0x4f8] sm:$0xff] }
 0x32c   :  { %v6046_v21 = vpop.eup %6045  ;;  %5666 = vmatpush3.bf16.msra.mxu0 %v5665_v20  ;;  %v1460_v20 = vld [vmem:[%s8598_s8 + $0x3a8] sm:$0xff] }
 0x32d   :  { %v6048_v19 = vpop.eup %6047  ;;  %5668 = vmatprep.subr.bf16.mxu0 %v5667_v57  ;;  %v991_v14 = vmul.f32 %v6046_v21, %v7004_v13  ;;  %v1489_v57 = vld [vmem:[%s8598_s8 + $0x490] sm:$0xff]  ;;  %v5683_v47 = vpack.c.bf16 %v1460_v20, %v1459_v52  ;;  %v1448_v20 = vld [vmem:[%s8598_s8 + $0x348] sm:$0xff] }
 0x32e   :  { %v984_v11 = vmul.f32 %v6048_v19, %v981_v2  ;;  %v6050_v38 = vpop.eup %6049  ;;  %v1473_v21 = vld [vmem:[%s8598_s8 + $0x410] sm:$0xff]  ;;  %v5711_v19 = vpack.c.bf16 %v1490_v60, %v1489_v57 }
 0x32f   :  { %v993_v35 = vsel %vm992_vm13, %v7004_v13, %v991_v14  ;;  %vm994_vm13 = vcmp.eq.f32.partialorder %v7004_v13, 0.0  ;;  %v1324_v13 = vmul.f32 %v6940_v6, %v6950_v33  ;;  %v1477_v57 = vld [vmem:[%s8598_s8 + $0x430] sm:$0xff] }
 0x330   :  { %5670 = vmatpush3.bf16.msra.mxu0 %v5669_v22  ;;  %v986_v15 = vsel %vm985_vm15, %v981_v2, %v984_v11  ;;  %v7083_v2 = vmul.f32 %v6937_v62, %v7063_v31  ;;  %v7099_v62 = vsel %vm61_vm1, %v6768_v54, 0.0  ;;  %v7114_v54 = vsel %vm994_vm13, %v995_v45, %v993_v35  ;;  %v1491_v11 = vld [vmem:[%s8598_s8 + $0x4a0] sm:$0xff]  ;;  %v1464_v45 = vld [vmem:[%s8598_s8 + $0x3c8] sm:$0xff] }
 0x331   :  { %v7072_v55 = vsel %vm987_vm14, %v988_v8, %v986_v15  ;;  %5672 = vmatprep.subr.bf16.mxu0 %v5671_v36  ;;  %v7129_v22 = vmul.f32 %v6050_v38, %v6916_v44  ;;  %v1474_v36 = vld [vmem:[%s8598_s8 + $0x418] sm:$0xff]  ;;  %v5691_v52 = vpack.c.bf16 %v1464_v45, %v1463_v18  ;;  %v1447_v38 = vld [vmem:[%s8598_s8 + $0x340] sm:$0xff]  ;;  %v1469_v18 = vld [vmem:[%s8598_s8 + $0x3f0] sm:$0xff]  ;;  %vm8812_vm14 = vcmask 1046534  }
 0x332   :  { %8767 = vst [vmem:[#allocation44_spill] sm:$0xff] %v7083_v2  ;;  %1674 = vmatprep.mubr.f32.mxu1 %v7072_v55  ;;  %v1329_v42 = vmul.f32 %v7099_v62, %v7083_v2  ;;  %v1327_v14 = vmul.f32 %v7072_v55, %v6950_v33  ;;  %v1328_v8 = vmul.f32 %v6953_v25, %v7083_v2  ;;  %v1446_v15 = vld [vmem:[%s8598_s8 + $0x338] sm:$0xff]  ;;  %v1500_v31 = vld [vmem:[%s8598_s8 + $0x4e8] sm:$0xff]  ;;  %vm8813_vm15 = vcmask 1047559  }
 0x333   :  { %4470 = vmatmul.mubr.msk.f32.vlgmr.msra.gmra.mrb[16].mxu1 %vm60_vm9, %v6796_v50  ;;  %8768 = vst [vmem:[#allocation45_spill] sm:$0xff] %v7129_v22  ;;  %v1333_v35 = vmul.f32 %v6965_v53, %v7129_v22  ;;  %v1494_v53 = vld [vmem:[%s8598_s8 + $0x4b8] sm:$0xff]  ;;  %v5689_v29 = vpack.c.bf16 %v1446_v15, %v1445_v27  ;;  %v1451_v15 = vld [vmem:[%s8598_s8 + $0x360] sm:$0xff] }
 0x334   :  { %5674 = vmatpush3.bf16.msra.mxu0 %v5673_v30  ;;  %5678 = vmatpush3.bf16.msra.mxu1 %v5677_v51  ;;  %v5713_v30 = vpack.c.bf16 %v1474_v36, %v1473_v21  ;;  %v1475_v51 = vld [vmem:[%s8598_s8 + $0x420] sm:$0xff]  ;;  %v5693_v21 = vpack.c.bf16 %v1448_v20, %v1447_v38  ;;  %v1450_v36 = vld [vmem:[%s8598_s8 + $0x358] sm:$0xff] }
 0x335   :  { %1679 = vmatprep.mubr.f32.mxu1 %v7114_v54  ;;  %5680 = vmatprep.subr.bf16.mxu1 %v5679_v26  ;;  %v5715_v26 = vpack.c.bf16 %v1492_v41, %v1491_v11  ;;  %v5717_v34 = vpack.c.bf16 %v1476_v56, %v1475_v51  ;;  %v1467_v11 = vld [vmem:[%s8598_s8 + $0x3e0] sm:$0xff]  ;;  %v1468_v41 = vld [vmem:[%s8598_s8 + $0x3e8] sm:$0xff]  ;;  %v1482_v56 = vld [vmem:[%s8598_s8 + $0x458] sm:$0xff] }
 0x336   :  { %5708 = vmatprep.subr.bf16.mxu0 %v5707_v32  ;;  %v1493_v32 = vld [vmem:[%s8598_s8 + $0x4b0] sm:$0xff]  ;;  %v5699_v27 = vpack.c.bf16 %v1468_v41, %v1467_v11  ;;  %v1452_v51 = vld [vmem:[%s8598_s8 + $0x368] sm:$0xff]  ;;  %v1470_v45 = vld [vmem:[%s8598_s8 + $0x3f8] sm:$0xff] }
 0x337   :  { %1750 = vmatmul.mubr.f32.vlgmr.msra.gmra.mrb[22].mxu0 %v1324_v13  ;;  %4471 = vmatmul.mubr.msk.f32.gmra.mrb[18].mxu1 %vm61_vm1, %v6801_v40  ;;  %v5719_v60 = vpack.c.bf16 %v1494_v53, %v1493_v32  ;;  %v1465_v13 = vld [vmem:[%s8598_s8 + $0x3d0] sm:$0xff]  ;;  %v1499_v32 = vld [vmem:[%s8598_s8 + $0x4e0] sm:$0xff]  ;;  %v5701_v53 = vpack.c.bf16 %v1452_v51, %v1451_v15  ;;  %v1454_v38 = vld [vmem:[%s8598_s8 + $0x378] sm:$0xff] }
 0x338   :  { %1754 = vmatprep.mubr.f32.mxu0 %v1329_v42  ;;  %5682 = vmatpush3.bf16.msra.mxu1 %v5681_v37  ;;  %v1478_v37 = vld [vmem:[%s8598_s8 + $0x438] sm:$0xff]  ;;  %v1483_v20 = vld [vmem:[%s8598_s8 + $0x460] sm:$0xff]  ;;  %v1521_v11 = vld [vmem:[%s8598_s8 + $0x590] sm:$0xff] }
 0x339   :  { %5710 = vmatpush3.bf16.msra.mxu0 %v5709_v17  ;;  %1824 = vmatprep.mubr.f32.mxu1 %v1327_v14  ;;  %v1466_v17 = vld [vmem:[%s8598_s8 + $0x3d8] sm:$0xff]  ;;  %v5721_v42 = vpack.c.bf16 %v1478_v37, %v1477_v57  ;;  %v1480_v14 = vld [vmem:[%s8598_s8 + $0x448] sm:$0xff]  ;;  %v5731_v57 = vpack.c.bf16 %v1500_v31, %v1499_v32  ;;  %v1519_v37 = vld [vmem:[%s8598_s8 + $0x580] sm:$0xff] }
 0x33a   :  { %5684 = vmatprep.subr.bf16.mxu1 %v5683_v47  ;;  %5712 = vmatprep.subr.bf16.mxu0 %v5711_v19  ;;  %v5695_v47 = vpack.c.bf16 %v1466_v17, %v1465_v13  ;;  %v1449_v19 = vld [vmem:[%s8598_s8 + $0x350] sm:$0xff]  ;;  %v1520_v13 = vld [vmem:[%s8598_s8 + $0x588] sm:$0xff]  ;;  %v1522_v41 = vld [vmem:[%s8598_s8 + $0x598] sm:$0xff] }
 0x33b   :  { %1755 = vmatmul.mubr.f32.gmra.mrb[24].mxu0 %v1328_v8  ;;  %v1498_v8 = vld [vmem:[%s8598_s8 + $0x4d8] sm:$0xff]  ;;  %v1501_v17 = vld [vmem:[%s8598_s8 + $0x4f0] sm:$0xff]  ;;  %v5743_v15 = vpack.c.bf16 %v1522_v41, %v1521_v11  ;;  %v1523_v32 = vld [vmem:[%s8598_s8 + $0x5a0] sm:$0xff] }
 0x33c   :  { %5686 = vmatpush3.bf16.msra.mxu1 %v5685_v10  ;;  %1899 = vmatprep.mubr.f32.mxu0 %v1333_v35  ;;  %v1497_v10 = vld [vmem:[%s8598_s8 + $0x4d0] sm:$0xff]  ;;  %v1524_v31 = vld [vmem:[%s8598_s8 + $0x5a8] sm:$0xff] }
 0x33d   :  { %5714 = vmatpush3.bf16.msra.mxu0 %v5713_v30  ;;  %5688 = vmatprep.subr.bf16.mxu1 %v5687_v46  ;;  %v5697_v30 = vpack.c.bf16 %v1450_v36, %v1449_v19  ;;  %v5725_v46 = vpack.c.bf16 %v1480_v14, %v1479_v9  ;;  %v1481_v35 = vld [vmem:[%s8598_s8 + $0x450] sm:$0xff]  ;;  %v1503_v19 = vld [vmem:[%s8598_s8 + $0x500] sm:$0xff]  ;;  %v1504_v36 = vld [vmem:[%s8598_s8 + $0x508] sm:$0xff]  ;;  %v7290_v9 = vsel %vm60_vm9, %v6796_v50, 0.0 }
 0x33e   :  { %5716 = vmatprep.subr.bf16.mxu0 %v5715_v26  ;;  %v5727_v26 = vpack.c.bf16 %v1498_v8, %v1497_v10  ;;  %v1486_v14 = vld [vmem:[%s8598_s8 + $0x478] sm:$0xff]  ;;  %v1340_v10 = vld [vmem:[%s8597_s7 + $0x40] sm:$0xff]  ;;  %v1341_v50 = vld [vmem:[%s8597_s7 + $0x48] sm:$0xff]  ;;  %v6052_v8 = vpop.eup %6051 }
 0x33f   :  { %v1505_v51 = vld [vmem:[%s8598_s8 + $0x510] sm:$0xff]  ;;  %v6058_v41 = vld [vmem:[%s8590_s0 + $0x8] sm:$0xf] }
 0x340   :  { %5690 = vmatpush3.bf16.msra.mxu1 %v5689_v29  ;;  %v5729_v29 = vpack.c.bf16 %v1482_v56, %v1481_v35  ;;  %v1506_v35 = vld [vmem:[%s8598_s8 + $0x518] sm:$0xff]  ;;  %v1331_v56 = vmul.f32 %v7114_v54, %v7083_v2 }
 0x341   :  { %5718 = vmatpush3.bf16.msra.mxu0 %v5717_v34  ;;  %5692 = vmatprep.subr.bf16.mxu1 %v5691_v52  ;;  %v5703_v34 = vpack.c.bf16 %v1470_v45, %v1469_v18  ;;  %v1453_v52 = vld [vmem:[%s8598_s8 + $0x370] sm:$0xff]  ;;  %v5771_v18 = vpack.c.bf16 %v1341_v50, %v1340_v10  ;;  %v7323_v45 = vmul.f32 %v6052_v8, %v6916_v44  ;;  %v1507_v44 = vld [vmem:[%s8598_s8 + $0x520] sm:$0xff]  ;;  %v1514_v8 = vld [vmem:[%s8598_s8 + $0x558] sm:$0xff] }
 0x342   :  { %5720 = vmatprep.subr.bf16.mxu0 %v5719_v60  ;;  %v1484_v60 = vld [vmem:[%s8598_s8 + $0x468] sm:$0xff]  ;;  %v5705_v28 = vpack.c.bf16 %v1454_v38, %v1453_v52  ;;  %v5747_v52 = vpack.c.bf16 %v1524_v31, %v1523_v32  ;;  %v1525_v38 = vld [vmem:[%s8598_s8 + $0x5b0] sm:$0xff]  ;;  %v1534_v32 = vld [vmem:[%s8598_s8 + $0x5f8] sm:$0xff] }
 0x343   :  { %8769 = vst [vmem:[#allocation46_spill] sm:$0xff] %v7323_v45  ;;  %v1513_v50 = vld [vmem:[%s8598_s8 + $0x550] sm:$0xff] }
 0x344   :  { %5694 = vmatpush3.bf16.msra.mxu1 %v5693_v21  ;;  %v5733_v21 = vpack.c.bf16 %v1484_v60, %v1483_v20  ;;  %v1526_v20 = vld [vmem:[%s8598_s8 + $0x5b8] sm:$0xff]  ;;  %v1335_v60 = vmul.f32 %v7072_v55, %v7129_v22  ;;  %v1336_v55 = vmul.f32 %v6953_v25, %v7323_v45  ;;  %v1511_v25 = vld [vmem:[%s8598_s8 + $0x540] sm:$0xff] }
 0x345   :  { %5722 = vmatpush3.bf16.msra.mxu0 %v5721_v42  ;;  %5696 = vmatprep.subr.bf16.mxu1 %v5695_v47  ;;  %v5739_v42 = vpack.c.bf16 %v1520_v13, %v1519_v37  ;;  %v1485_v47 = vld [vmem:[%s8598_s8 + $0x470] sm:$0xff]  ;;  %v5751_v13 = vpack.c.bf16 %v1526_v20, %v1525_v38 }
 0x346   :  { %5724 = vmatprep.subr.bf16.mxu0 %v5723_v3  ;;  %v5735_v3 = vpack.c.bf16 %v1502_v59, %v1501_v17  ;;  %v1342_v37 = vld [vmem:[%s8597_s7 + $0x50] sm:$0xf]  ;;  %v1527_v59 = vld [vmem:[%s8598_s8 + $0x5c0] sm:$0xff] }
 0x347   :  { %v1509_v17 = vld [vmem:[%s8598_s8 + $0x530] sm:$0xff] }
 0x348   :  { %5698 = vmatpush3.bf16.msra.mxu1 %v5697_v30  ;;  %v5741_v30 = vpack.c.bf16 %v1504_v36, %v1503_v19  ;;  %v6057_v19 = vld [vmem:[%s8590_s0] sm:$0xff]  ;;  %v1529_v36 = vld [vmem:[%s8598_s8 + $0x5d0] sm:$0xff] }
 0x349   :  { %5726 = vmatpush3.bf16.msra.mxu0 %v5725_v46  ;;  %5700 = vmatprep.subr.bf16.mxu1 %v5699_v27  ;;  %v1326_v46 = vmul.f32 %v7290_v9, %v6950_v33  ;;  %v5737_v27 = vpack.c.bf16 %v1486_v14, %v1485_v47  ;;  %v1512_v47 = vld [vmem:[%s8598_s8 + $0x548] sm:$0xff]  ;;  %v8770_v14 = vmov 0.0|0.0  }
 0x34a   :  { %5728 = vmatprep.subr.bf16.mxu0 %v5727_v26  ;;  %v7318_v26 = vsel %vm61_vm1, %v6801_v40, 0.0  ;;  %v5745_v40 = vpack.c.bf16 %v1506_v35, %v1505_v51  ;;  %v5757_v11 = vpack.c.bf16 %v1512_v47, %v1511_v25  ;;  %v1515_v35 = vld [vmem:[%s8598_s8 + $0x560] sm:$0xff] }
 0x34b   :  { %v1338_v38 = vmul.f32 %v7318_v26, %v7323_v45  ;;  %v8798_v33 = vld [vmem:[#allocation18_spill] sm:$0xff] }
 0x34c   :  { %5702 = vmatpush3.bf16.msra.mxu1 %v5701_v53  ;;  %v1330_v53 = vmul.f32 %v7318_v26, %v7083_v2 }
 0x34d   :  { %5730 = vmatpush3.bf16.msra.mxu0 %v5729_v29  ;;  %5704 = vmatprep.subr.bf16.mxu1 %v5703_v34  ;;  %v1508_v29 = vld [vmem:[%s8598_s8 + $0x528] sm:$0xff]  ;;  %v1332_v34 = vmul.f32 %v6940_v6, %v7129_v22 }
 0x34e   :  { %5732 = vmatprep.subr.bf16.mxu0 %v5731_v57  ;;  %v1337_v57 = vmul.f32 %v7099_v62, %v7323_v45  ;;  %v5749_v6 = vpack.c.bf16 %v1508_v29, %v1507_v44  ;;  %v1510_v62 = vld [vmem:[%s8598_s8 + $0x538] sm:$0xff] }
 0x34f   :  { %v1518_v44 = vld [vmem:[%s8598_s8 + $0x578] sm:$0xff] }
 0x350   :  { %5706 = vmatpush3.bf16.msra.mxu1 %v5705_v28  ;;  %v1528_v28 = vld [vmem:[%s8598_s8 + $0x5c8] sm:$0xff] }
 0x351   :  { %5734 = vmatpush3.bf16.msra.mxu0 %v5733_v21  ;;  %5740 = vmatprep.subr.bf16.mxu1 %v5739_v42  ;;  %v5753_v21 = vpack.c.bf16 %v1510_v62, %v1509_v17  ;;  %v5755_v42 = vpack.c.bf16 %v1528_v28, %v1527_v59 }
 0x352   :  { %5736 = vmatprep.subr.bf16.mxu0 %v5735_v3  ;;  %v1530_v3 = vld [vmem:[%s8598_s8 + $0x5d8] sm:$0xff] }
 0x353   :  { %1825 = vmatmul.mubr.f32.vlgmr.msra.gmra.mrb[20].mxu1 %v1326_v46  ;;  %v5759_v10 = vpack.c.bf16 %v1530_v3, %v1529_v36  ;;  %v1531_v46 = vld [vmem:[%s8598_s8 + $0x5e0] sm:$0xff] }
 0x354   :  { %1829 = vmatprep.mubr.f32.mxu1 %v1331_v56  ;;  %5742 = vmatpush3.bf16.msra.mxu1 %v5741_v30  ;;  %v8771_v30 = vmov 0.0   ;;  %v1516_v56 = vld [vmem:[%s8598_s8 + $0x568] sm:$0xff] }
 0x355   :  { %5738 = vmatpush3.bf16.msra.mxu0 %v5737_v27  ;;  %5744 = vmatprep.subr.bf16.mxu1 %v5743_v15  ;;  %v1532_v27 = vld [vmem:[%s8598_s8 + $0x5e8] sm:$0xff]  ;;  %v5761_v15 = vpack.c.bf16 %v1514_v8, %v1513_v50  ;;  %v5765_v31 = vpack.c.bf16 %v1516_v56, %v1515_v35 }
 0x356   :  { %5772 = vmatprep.subr.bf16.mxu0 %v5771_v18  ;;  %v5763_v51 = vpack.c.bf16 %v1532_v27, %v1531_v46 }
 0x357   :  { %1830 = vmatmul.mubr.f32.gmra.mrb[22].mxu1 %v1330_v53  ;;  %v1517_v53 = vld [vmem:[%s8598_s8 + $0x570] sm:$0xff] }
 0x358   :  { %1900 = vmatmul.mubr.f32.vlgmr.msra.gmra.mrb[26].mxu0 %v1332_v34  ;;  %5746 = vmatpush3.bf16.msra.mxu1 %v5745_v40  ;;  %v5769_v29 = vpack.c.bf16 %v1518_v44, %v1517_v53  ;;  %v1334_v34 = vmul.f32 %v7290_v9, %v7129_v22 }
 0x359   :  { %1904 = vmatprep.mubr.f32.mxu0 %v1337_v57  ;;  %1974 = vmatprep.mubr.f32.mxu1 %v1335_v60 }
 0x35a   :  { %5748 = vmatprep.subr.bf16.mxu1 %v5747_v52  ;;  %5774 = vmatpush3.bf16.msra.mxu0 %v5771_v18  ;;  %v1533_v18 = vld [vmem:[%s8598_s8 + $0x5f0] sm:$0xff]  ;;  %v1339_v52 = vmul.f32 %v7114_v54, %v7323_v45 }
 0x35b   :  { %5382 = vmatprep.subr.msk.mxu0 %vm342_vm0, %v1342_v37  ;;  %v5767_v40 = vpack.c.bf16 %v1534_v32, %v1533_v18 }
 0x35c   :  { %1905 = vmatmul.mubr.f32.gmra.mrb[28].mxu0 %v1336_v55  ;;  %5750 = vmatpush3.bf16.msra.mxu1 %v5749_v6 }
 0x35d   :  { %5752 = vmatprep.subr.bf16.mxu1 %v5751_v13  ;;  %5384 = vmatprep.mubr.msk.f32.mxu0 %vm521_vm6, %v6057_v19 }
 0x35e   :  { %5383 = vmatpush3.msk.msra.mxu0 %vm342_vm0, %v1342_v37 }
 0x35f   :  { %5775 = vmatprep.subr.bf16.mxu0 %v8770_v14 }
 0x360   :  { %5754 = vmatpush3.bf16.msra.mxu1 %v5753_v21  ;;  %5385 = vmatmul.mubr.msk.f32.vlgmr.msra.gmra.mrb[30].mxu0 %vm521_vm6, %v6058_v41 }
 0x361   :  { %5756 = vmatprep.subr.bf16.mxu1 %v5755_v42  ;;  %5391 = vmatprep.mubr.msk.f32.mxu0 %vm6088_vm3, %v8771_v30 }
 0x364   :  { %5758 = vmatpush3.bf16.msra.mxu1 %v5757_v11 }
 0x365   :  { %5760 = vmatprep.subr.bf16.mxu1 %v5759_v10 }
 0x368   :  { %5762 = vmatpush3.bf16.msra.mxu1 %v5761_v15 }
 0x369   :  { %5764 = vmatprep.subr.bf16.mxu1 %v5763_v51 }
 0x36c   :  { %5766 = vmatpush3.bf16.msra.mxu1 %v5765_v31 }
 0x36d   :  { %5768 = vmatprep.subr.bf16.mxu1 %v5767_v40 }
 0x370   :  { %5770 = vmatpush3.bf16.msra.mxu1 %v5769_v29 }
 0x371   :  { %5779 = vmatprep.subr.bf16.mxu1 %v8770_v14 }
 0x373   :  { %1975 = vmatmul.mubr.f32.vlgmr.msra.gmra.mrb[24].mxu1 %v1334_v34 }
 0x374   :  { %1979 = vmatprep.mubr.f32.mxu1 %v1339_v52 }
 0x377   :  { %1980 = vmatmul.mubr.f32.gmra.mrb[26].mxu1 %v1338_v38 }
 0x378   :  { %5404 = vmatprep.mubr.msk.f32.mxu1 %vm6088_vm3, %v8771_v30 }
 0x3ea   :  { %v4789_v20 = vpop.f32.mrb[18].mxu0 }
 0x3eb   :  { %v4790_v57 = vpop.f32.mrb[19].mxu0 }
 0x3ec   :  { %v4791_v60 = vadd.f32 %v4790_v57, %v4789_v20 }
 0x3ee   :  { %v4792_v6 = vpop.f32.mrb[20].mxu0 }
 0x3ef   :  { %v4793_v37 = vpop.f32.mrb[21].mxu0 }
 0x3f0   :  { %v4794_v9 = vadd.f32 %v4793_v37, %v4792_v6 }
 0x406   :  { %v4827_v13 = vpop.f32.mrb[16].mxu1 }
 0x407   :  { %v4828_v17 = vpop.f32.mrb[17].mxu1 }
 0x408   :  { %v4829_v62 = vadd.f32 %v4828_v17, %v4827_v13  ;;  %v4475_v13 = vld [vmem:[%s8597_s7 + $0x58] ss:$0 sm:$0xff] }
 0x40a   :  { %v1677_v55 = vadd.f32 %v4829_v62, %v4791_v60  ;;  %v4865_v54 = vpop.f32.mrb[22].mxu0  ;;  %v4830_v59 = vpop.f32.mrb[18].mxu1 }
 0x40b   :  { %v4866_v28 = vpop.f32.mrb[23].mxu0  ;;  %v4831_v21 = vpop.f32.mrb[19].mxu1 }
 0x40c   :  { %v4867_v42 = vadd.f32 %v4866_v28, %v4865_v54  ;;  %v4832_v26 = vadd.f32 %v4831_v21, %v4830_v59  ;;  %v2243_v21 = vld [vmem:[%s8597_s7 + $0x78] sm:$0xff] }
 0x40e   :  { %v1752_v25 = vadd.f32 %v4867_v42, %v1677_v55  ;;  %v1682_v47 = vadd.f32 %v4832_v26, %v4794_v9  ;;  %v4868_v19 = vpop.f32.mrb[24].mxu0  ;;  %v2244_v26 = vld [vmem:[%s8597_s7 + $0x80] sm:$0xff] }
 0x40f   :  { %v4869_v36 = vpop.f32.mrb[25].mxu0 }
 0x410   :  { %v4870_v3 = vadd.f32 %v4869_v36, %v4868_v19  ;;  %v5784_v36 = vpack.c.bf16 %v2244_v26, %v2243_v21  ;;  %v4519_v26 = vld [vmem:[%s8598_s8 + $0x690] sm:$0xff]  ;;  %v8794_v19 = vld [vmem:[#allocation30_spill] sm:$0xff] }
 0x412   :  { %v1757_v11 = vadd.f32 %v4870_v3, %v1682_v47  ;;  %v2241_v47 = vld [vmem:[%s8597_s7 + $0x68] sm:$0xff] }
 0x426   :  { %v4903_v41 = vpop.f32.mrb[20].mxu1 }
 0x427   :  { %v4904_v10 = vpop.f32.mrb[21].mxu1 }
 0x428   :  { %v4905_v50 = vadd.f32 %v4904_v10, %v4903_v41  ;;  %v8776_v41 = vld [vmem:[#allocation7_spill] sm:$0xff] }
 0x429   :  { %v8777_v10 = vunpack.c.l.bf16 %v8776_v41 }
 0x42a   :  { %v1827_v8 = vadd.f32 %v4905_v50, %v1752_v25  ;;  %v4906_v46 = vpop.f32.mrb[22].mxu1  ;;  %v2240_v25 = vld [vmem:[%s8597_s7 + $0x60] sm:$0xff]  ;;  %v8778_v50 = vld [vmem:[#allocation12_spill] sm:$0xff] }
 0x42b   :  { %v4941_v27 = vpop.f32.mrb[26].mxu0  ;;  %v4907_v15 = vpop.f32.mrb[23].mxu1  ;;  %v5787_v3 = vpack.c.bf16 %v2241_v47, %v2240_v25  ;;  %v4520_v25 = vld [vmem:[%s8598_s8 + $0x698] sm:$0xff] }
 0x42c   :  { %v4908_v51 = vadd.f32 %v4907_v15, %v4906_v46  ;;  %v4942_v35 = vpop.f32.mrb[27].mxu0  ;;  %v8780_v46 = vld [vmem:[#allocation13_spill] sm:$0xff] }
 0x42d   :  { %v4943_v56 = vadd.f32 %v4942_v35, %v4941_v27  ;;  %v8781_v27 = vld [vmem:[#allocation10_spill] sm:$0xff]  ;;  %v2242_v35 = vld [vmem:[%s8597_s7 + $0x70] sm:$0xf] }
 0x42e   :  { %v1832_v18 = vadd.f32 %v4908_v51, %v1757_v11  ;;  %v8775_v11 = vld [vmem:[#allocation11_spill] sm:$0xff]  ;;  %v8782_v15 = vunpack.c.l.bf16 %v8781_v27 }
 0x42f   :  { %v1902_v32 = vadd.f32 %v4943_v56, %v1827_v8  ;;  %v4944_v31 = vpop.f32.mrb[28].mxu0  ;;  %v8779_v8 = vunpack.c.h.bf16 %v8776_v41  ;;  %v2245_v51 = vld [vmem:[%s8597_s7 + $0x88] sm:$0xf]  ;;  %v4521_v41 = vld [vmem:[%s8598_s8 + $0x6a0] sm:$0xff] }
 0x430   :  { %v4945_v40 = vpop.f32.mrb[29].mxu0  ;;  %v4506_v27 = vld [vmem:[%s8598_s8 + $0x628] sm:$0xff] }
 0x431   :  { %v4946_v53 = vadd.f32 %v4945_v40, %v4944_v31 }
 0x433   :  { %v1907_v44 = vadd.f32 %v4946_v53, %v1832_v18  ;;  %v5386_v29 = vpop.f32.mrb[30].mxu0 }
 0x434   :  { %v2059_v34 = vpop.f32.mrb[31].mxu0 }
 0x446   :  { %v4979_v52 = vpop.f32.mrb[24].mxu1 }
 0x447   :  { %v4980_v38 = vpop.f32.mrb[25].mxu1 }
 0x448   :  { %v4981_v20 = vadd.f32 %v4980_v38, %v4979_v52 }
 0x44a   :  { %v4982_v57 = vpop.f32.mrb[26].mxu1  ;;  %v1977_v60 = vadd.f32 %v4981_v20, %v1902_v32  ;;  %v2430_v32 = vld [vmem:[%s8597_s7 + $0x90] sm:$0x3f] }
 0x44b   :  { %v4983_v6 = vpop.f32.mrb[27].mxu1 }
 0x44c   :  { %v4984_v37 = vadd.f32 %v4983_v6, %v4982_v57  ;;  %v2060_v9 = vadd.f32 %v2059_v34, %v1977_v60  ;;  %v8783_v60 = vld [vmem:[#allocation6_spill] sm:$0xff] }
 0x44d   :  { %v6059_v6 = vld [vmem:[%s8591_s1] sm:$0xff] }
 0x44e   :  { %v1982_v17 = vadd.f32 %v4984_v37, %v1907_v44  ;;  %v7435_v55 = vadd.f32 %v4475_v13, %v2060_v9  ;;  %v6060_v37 = vld [vmem:[%s8591_s1 + $0x8] sm:$0xff]  ;;  %v6061_v9 = vld [vmem:[%s8591_s1 + $0x10] sm:$0xff] }
 0x450   :  { %v2065_v62 = vadd.f32 %v5386_v29, %v1982_v17  ;;  %8772 = vst [vmem:[#allocation47_spill] sm:$0xff] %v7435_v55  ;;  %v8681_v59 = vmax.f32 %v7435_v55, 0.0  ;;  %v4518_v17 = vld [vmem:[%s8598_s8 + $0x688] sm:$0xff] }
 0x452   :  { %v7437_v54 = vadd.f32 %v4475_v13, %v2065_v62  ;;  %v4517_v13 = vld [vmem:[%s8598_s8 + $0x680] sm:$0xff] }
 0x453   :  { %v4501_v62 = vld [vmem:[%s8598_s8 + $0x600] sm:$0xff]  ;;  %v5797_v21 = vpack.c.bf16 %v4518_v17, %v4517_v13  ;;  %v4530_v13 = vld [vmem:[%s8598_s8 + $0x6e8] sm:$0xff] }
 0x454   :  { %8773 = vst [vmem:[#allocation48_spill] sm:$0xff] %v7437_v54  ;;  %v8680_v28 = vmax.f32 %v7437_v54, 0.0  ;;  %v8795_v54 = vld [vmem:[#allocation33_spill] sm:$0xff] }
 0x456   :  { %v5776_v42 = vpack.c.bf16 %v8680_v28, %v8681_v59  ;;  %v8793_v59 = vld [vmem:[#allocation27_spill] sm:$0xff] }
 0x458   :  { %5778 = vmatpush3.bf16.msk.msra.mxu0 %vm6163_vm2, %v5776_v42  ;;  %5782 = vmatpush3.bf16.msk.msra.mxu1 %vm6163_vm2, %v5776_v42  ;;  %v4502_v42 = vld [vmem:[%s8598_s8 + $0x608] sm:$0xff] }
 0x459   :  { %5783 = vmatprep.subr.bf16.mxu0 %v8770_v14  ;;  %5786 = vmatprep.subr.bf16.mxu1 %v8770_v14  ;;  %v5799_v47 = vpack.c.bf16 %v4502_v42, %v4501_v62  ;;  %v4514_v42 = vld [vmem:[%s8598_s8 + $0x668] sm:$0xff] }
 0x45b   :  { %5392 = vmatmul.mubr.msk.f32.vlgmr.msra.gmra.mrb[32].mxu0 %vm332_vm4, %v8775_v11  ;;  %5405 = vmatmul.mubr.msk.f32.vlgmr.msra.gmra.mrb[28].mxu1 %vm332_vm4, %v8777_v10  ;;  %v4504_v11 = vld [vmem:[%s8598_s8 + $0x618] sm:$0xff]  ;;  %v4522_v10 = vld [vmem:[%s8598_s8 + $0x6a8] sm:$0xff] }
 0x45c   :  { %5394 = vmatprep.mubr.msk.f32.mxu0 %vm6088_vm3, %v8771_v30  ;;  %5407 = vmatprep.mubr.msk.f32.mxu1 %vm6088_vm3, %v8771_v30 }
 0x45d   :  { %5785 = vmatpush3.bf16.msra.mxu0 %v5784_v36  ;;  %5788 = vmatpush3.bf16.msra.mxu1 %v5787_v3  ;;  %v5801_v36 = vpack.c.bf16 %v4520_v25, %v4519_v26  ;;  %v4503_v3 = vld [vmem:[%s8598_s8 + $0x610] sm:$0xff]  ;;  %v4532_v25 = vld [vmem:[%s8598_s8 + $0x6f8] sm:$0xff] }
 0x45e   :  { %5417 = vmatprep.subr.mxu0 %v8771_v30  ;;  %5432 = vmatprep.subr.mxu1 %v8771_v30  ;;  %v4531_v26 = vld [vmem:[%s8598_s8 + $0x6f0] sm:$0xff] }
 0x45f   :  { %5395 = vmatmul.mubr.msk.f32.gmra.mrb[34].mxu0 %vm332_vm4, %v8778_v50  ;;  %5408 = vmatmul.mubr.msk.f32.gmra.mrb[30].mxu1 %vm332_vm4, %v8779_v8  ;;  %v5803_v50 = vpack.c.bf16 %v4504_v11, %v4503_v3  ;;  %v5805_v8 = vpack.c.bf16 %v4522_v10, %v4521_v41 }
 0x460   :  { %5397 = vmatprep.mubr.msk.f32.mxu0 %vm6088_vm3, %v8771_v30  ;;  %5410 = vmatprep.mubr.msk.f32.mxu1 %vm6088_vm3, %v8771_v30 }
 0x461   :  { %5418 = vmatpush3.msk.msra.mxu0 %vm342_vm0, %v2245_v51  ;;  %5433 = vmatpush3.msk.msra.mxu1 %vm342_vm0, %v2242_v35  ;;  %v4524_v51 = vld [vmem:[%s8598_s8 + $0x6b8] sm:$0xff] }
 0x462   :  { %5443 = vmatprep.subr.mxu0 %v8771_v30 }
 0x463   :  { %5398 = vmatmul.mubr.msk.f32.gmra.mrb[36].mxu0 %vm332_vm4, %v8780_v46  ;;  %5411 = vmatmul.mubr.msk.f32.gmra.mrb[32].mxu1 %vm332_vm4, %v8782_v15  ;;  %v4505_v46 = vld [vmem:[%s8598_s8 + $0x620] sm:$0xff]  ;;  %v4523_v15 = vld [vmem:[%s8598_s8 + $0x6b0] sm:$0xff] }
 0x464   :  { %5419 = vmatprep.mubr.msk.f32.mxu0 %vm6088_vm3, %v8771_v30  ;;  %5434 = vmatprep.mubr.msk.f32.mxu1 %vm6088_vm3, %v8771_v30  ;;  %v5807_v35 = vpack.c.bf16 %v4506_v27, %v4505_v46 }
 0x52e   :  { %v2146_v56 = vpop.f32.mrb[32].mxu0  ;;  %v2226_v18 = vpop.f32.mrb[28].mxu1 }
 0x52f   :  { %v5393_v31 = vpop.f32.mrb[33].mxu0  ;;  %v5406_v40 = vpop.f32.mrb[29].mxu1  ;;  %5420 = vmatmul.mubr.msk.f32.vlgmr.msra.gmra.mrb[38].mxu0 %vm521_vm6, %v2226_v18  ;;  %5435 = vmatmul.mubr.msk.f32.vlgmr.msra.gmra.mrb[34].mxu1 %vm521_vm6, %v2146_v56  ;;  %v5809_v56 = vpack.c.bf16 %v4524_v51, %v4523_v15  ;;  %v4507_v18 = vld [vmem:[%s8598_s8 + $0x630] sm:$0xff] }
 0x530   :  { %5422 = vmatprep.mubr.msk.f32.mxu0 %vm6088_vm3, %v8771_v30  ;;  %5437 = vmatprep.mubr.msk.f32.mxu1 %vm6088_vm3, %v8771_v30  ;;  %v4525_v31 = vld [vmem:[%s8598_s8 + $0x6c0] sm:$0xff]  ;;  %v4526_v40 = vld [vmem:[%s8598_s8 + $0x6c8] sm:$0xff] }
 0x531   :  { %5444 = vmatpush3.msk.msra.mxu0 %vm717_vm7, %v2430_v32  ;;  %v4508_v32 = vld [vmem:[%s8598_s8 + $0x638] sm:$0xff]  ;;  %vm8808_vm7 = vcmask 1044484  }
 0x532   :  { %v2151_v53 = vpop.f32.mrb[34].mxu0  ;;  %v2231_v44 = vpop.f32.mrb[30].mxu1  ;;  %5798 = vmatprep.subr.bf16.mxu0 %v5797_v21  ;;  %v4513_v21 = vld [vmem:[%s8598_s8 + $0x660] sm:$0xff]  ;;  %vm8825_vm13 = vmmov %vm8808_vm7 }
 0x533   :  { %v5396_v29 = vpop.f32.mrb[35].mxu0  ;;  %v5409_v34 = vpop.f32.mrb[31].mxu1  ;;  %5423 = vmatmul.mubr.msk.f32.gmra.mrb[40].mxu0 %vm521_vm6, %v2231_v44  ;;  %5438 = vmatmul.mubr.msk.f32.gmra.mrb[36].mxu1 %vm521_vm6, %v2151_v53  ;;  %v5811_v53 = vpack.c.bf16 %v4508_v32, %v4507_v18  ;;  %v5813_v44 = vpack.c.bf16 %v4526_v40, %v4525_v31 }
 0x534   :  { %5425 = vmatprep.mubr.msk.f32.mxu0 %vm6088_vm3, %v8771_v30  ;;  %5440 = vmatprep.mubr.msk.f32.mxu1 %vm6088_vm3, %v8771_v30  ;;  %v4509_v29 = vld [vmem:[%s8598_s8 + $0x640] sm:$0xff]  ;;  %v4510_v34 = vld [vmem:[%s8598_s8 + $0x648] sm:$0xff] }
 0x536   :  { %v2156_v52 = vpop.f32.mrb[36].mxu0  ;;  %v2236_v38 = vpop.f32.mrb[32].mxu1 }
 0x537   :  { %v5399_v20 = vpop.f32.mrb[37].mxu0  ;;  %v5412_v57 = vpop.f32.mrb[33].mxu1  ;;  %5426 = vmatmul.mubr.msk.f32.gmra.mrb[42].mxu0 %vm521_vm6, %v2236_v38  ;;  %5441 = vmatmul.mubr.msk.f32.gmra.mrb[38].mxu1 %vm521_vm6, %v2156_v52  ;;  %v4527_v52 = vld [vmem:[%s8598_s8 + $0x6d0] sm:$0xff]  ;;  %v4528_v38 = vld [vmem:[%s8598_s8 + $0x6d8] sm:$0xff] }
 0x538   :  { %5445 = vmatprep.mubr.msk.f32.mxu0 %vm6088_vm3, %v8771_v30  ;;  %5460 = vmatprep.mubr.msk.f32.mxu1 %vm52_vm5, %v8783_v60  ;;  %v5815_v20 = vpack.c.bf16 %v4510_v34, %v4509_v29  ;;  %v5817_v57 = vpack.c.bf16 %v4528_v38, %v4527_v52  ;;  %v7635_v34 = vld [vmem:[%s8598_s8 + $0x780] sm:$0xff]  ;;  %v7640_v52 = vld [vmem:[%s8598_s8 + $0x788] sm:$0xff] }
 0x53b   :  { %5446 = vmatmul.mubr.msk.f32.vlgmr.msra.gmra.mrb[44].mxu0 %vm707_vm8, %v6059_v6  ;;  %v4511_v6 = vld [vmem:[%s8598_s8 + $0x650] sm:$0xff] }
 0x53c   :  { %5448 = vmatprep.mubr.msk.f32.mxu0 %vm6088_vm3, %v8771_v30  ;;  %5800 = vmatpush3.bf16.msra.mxu0 %v5799_v47  ;;  %v5823_v47 = vpack.c.bf16 %v4514_v42, %v4513_v21 }
 0x53d   :  { %5802 = vmatprep.subr.bf16.mxu0 %v5801_v36  ;;  %v5825_v36 = vpack.c.bf16 %v4532_v25, %v4531_v26  ;;  %v8784_v25 = vld [vmem:[#allocation23_spill] sm:$0xff] }
 0x53f   :  { %5449 = vmatmul.mubr.msk.f32.gmra.mrb[46].mxu0 %vm707_vm8, %v6060_v37  ;;  %v4512_v37 = vld [vmem:[%s8598_s8 + $0x658] sm:$0xff] }
 0x540   :  { %5451 = vmatprep.mubr.msk.f32.mxu0 %vm6088_vm3, %v8771_v30  ;;  %5804 = vmatpush3.bf16.msra.mxu0 %v5803_v50  ;;  %v5819_v17 = vpack.c.bf16 %v4512_v37, %v4511_v6 }
 0x541   :  { %5806 = vmatprep.subr.bf16.mxu0 %v5805_v8 }
 0x543   :  { %5452 = vmatmul.mubr.msk.f32.gmra.mrb[48].mxu0 %vm707_vm8, %v6061_v9  ;;  %v4529_v9 = vld [vmem:[%s8598_s8 + $0x6e0] sm:$0xff]  ;;  %vm8811_vm8 = vcmask 1045509  }
 0x544   :  { %5808 = vmatpush3.bf16.msra.mxu0 %v5807_v35  ;;  %v5821_v62 = vpack.c.bf16 %v4530_v13, %v4529_v9 }
 0x545   :  { %5810 = vmatprep.subr.bf16.mxu0 %v5809_v56 }
 0x548   :  { %5812 = vmatpush3.bf16.msra.mxu0 %v5811_v53  ;;  %v4496_v53 = vld [vmem:[%s8597_s7 + $0x98] ss:$0 sm:$0xff] }
 0x549   :  { %5814 = vmatprep.subr.bf16.mxu0 %v5813_v44 }
 0x54c   :  { %5816 = vmatpush3.bf16.msra.mxu0 %v5815_v20 }
 0x54d   :  { %5818 = vmatprep.subr.bf16.mxu0 %v5817_v57 }
 0x550   :  { %5820 = vmatpush3.bf16.msra.mxu0 %v5819_v17 }
 0x551   :  { %5822 = vmatprep.subr.bf16.mxu0 %v5821_v62 }
 0x554   :  { %5824 = vmatpush3.bf16.msra.mxu0 %v5823_v47 }
 0x555   :  { %5826 = vmatprep.subr.bf16.mxu0 %v5825_v36  ;;  %v8785_v36 = vld [vmem:[#allocation29_spill] sm:$0xff] }
 0x602   :  { %v2324_v3 = vpop.f32.mrb[38].mxu0  ;;  %v2416_v11 = vpop.f32.mrb[34].mxu1 }
 0x603   :  { %v2417_v41 = vadd.f32 %v2416_v11, %v2324_v3  ;;  %v5421_v10 = vpop.f32.mrb[39].mxu0  ;;  %v5436_v50 = vpop.f32.mrb[35].mxu1 }
 0x606   :  { %v2329_v8 = vpop.f32.mrb[40].mxu0  ;;  %v2421_v46 = vpop.f32.mrb[36].mxu1 }
 0x607   :  { %v2422_v27 = vadd.f32 %v2421_v46, %v2329_v8  ;;  %v5424_v15 = vpop.f32.mrb[41].mxu0  ;;  %v5439_v51 = vpop.f32.mrb[37].mxu1  ;;  %v8787_v46 = vld [vmem:[#allocation37_spill] sm:$0xff] }
 0x60a   :  { %v2334_v35 = vpop.f32.mrb[42].mxu0  ;;  %v2426_v56 = vpop.f32.mrb[38].mxu1 }
 0x60b   :  { %v2427_v18 = vadd.f32 %v2426_v56, %v2334_v35  ;;  %v5427_v32 = vpop.f32.mrb[43].mxu0  ;;  %v5442_v31 = vpop.f32.mrb[39].mxu1 }
 0x60c   :  { %v8788_v32 = vld [vmem:[#allocation15_spill] sm:$0xff] }
 0x60e   :  { %v2500_v40 = vpop.f32.mrb[44].mxu0 }
 0x60f   :  { %v2514_v44 = vadd.f32 %v2500_v40, %v2417_v41  ;;  %v5447_v29 = vpop.f32.mrb[45].mxu0  ;;  %v8786_v41 = vld [vmem:[#allocation32_spill] sm:$0xff] }
 0x610   :  { %v8789_v40 = vld [vmem:[#allocation16_spill] sm:$0xff]  ;;  %v8790_v29 = vld [vmem:[#allocation19_spill] sm:$0xff] }
 0x611   :  { %v7642_v38 = vadd.f32 %v4496_v53, %v2514_v44 }
 0x612   :  { %v2505_v20 = vpop.f32.mrb[46].mxu0 }
 0x613   :  { %v2515_v57 = vadd.f32 %v2505_v20, %v2422_v27  ;;  %v5450_v6 = vpop.f32.mrb[47].mxu0  ;;  %v2600_v37 = vmul.f32 %v7642_v38, %v7642_v38  ;;  %v2704_v13 = vadd.f32 %v7642_v38, %v6459_v48  ;;  %v2707_v17 = vadd.f32 %v7642_v38, %v6462_v49 }
 0x614   :  { %v2710_v62 = vadd.f32 %v7642_v38, %v8746_v4  ;;  %v2713_v21 = vadd.f32 %v7642_v38, %v6486_v58  ;;  %v2716_v26 = vadd.f32 %v7642_v38, %v8749_v61  ;;  %v2719_v47 = vadd.f32 %v7642_v38, %v8784_v25 }
 0x615   :  { %v7656_v42 = vadd.f32 %v4496_v53, %v2515_v57  ;;  %v2722_v3 = vadd.f32 %v7642_v38, %v8785_v36  ;;  %v2725_v10 = vadd.f32 %v7642_v38, %v8786_v41  ;;  %v7668_v50 = vadd.f32 %v7642_v38, %v6549_v43  ;;  %v8791_v57 = vld [vmem:[#allocation24_spill] sm:$0xff] }
 0x616   :  { %v2510_v11 = vpop.f32.mrb[48].mxu0  ;;  %v7672_v8 = vadd.f32 %v7642_v38, %v6545_v1  ;;  %v7676_v27 = vadd.f32 %v7642_v38, %v8787_v46 }
 0x617   :  { %v2516_v15 = vadd.f32 %v2510_v11, %v2427_v18  ;;  %v5789_v51 = vpack.c.bf16 %v7656_v42, %v7642_v38  ;;  %v5453_v35 = vpop.f32.mrb[49].mxu0  ;;  %v2601_v56 = vmul.f32 %v7656_v42, %v7656_v42  ;;  %v2705_v31 = vadd.f32 %v7656_v42, %v8788_v32  ;;  %v8792_v18 = vld [vmem:[#allocation21_spill] sm:$0xff] }
 0x618   :  { %v2708_v44 = vadd.f32 %v7656_v42, %v8789_v40  ;;  %v2711_v20 = vadd.f32 %v7656_v42, %v8790_v29  ;;  %v2714_v6 = vadd.f32 %v7656_v42, %v8791_v57  ;;  %v2717_v11 = vadd.f32 %v7656_v42, %v8792_v18 }
 0x619   :  { %v7692_v28 = vadd.f32 %v4496_v53, %v2516_v15  ;;  %5790 = vmatprep.subr.bf16.mxu1 %v5789_v51  ;;  %v5793_v35 = vpack.c.bf16 %v2601_v56, %v2600_v37  ;;  %v2720_v9 = vadd.f32 %v7656_v42, %v8793_v59  ;;  %v2723_v30 = vadd.f32 %v7656_v42, %v8794_v19  ;;  %v8796_v15 = vld [vmem:[#allocation20_spill] sm:$0xff]  ;;  %v8797_v56 = vld [vmem:[#allocation22_spill] sm:$0xff]  ;;  %v8803_v59 = vld [vmem:[#allocation9_spill] sm:$0xff] }
 0x61a   :  { %5792 = vmatpush3.bf16.msra.mxu1 %v5789_v51  ;;  %v2726_v14 = vadd.f32 %v7656_v42, %v8795_v54  ;;  %v2740_v55 = vmin.f32 %v2704_v13, %v2705_v31  ;;  %v2748_v45 = vmin.f32 %v2707_v17, %v2708_v44  ;;  %v2756_v22 = vmin.f32 %v2710_v62, %v2711_v20  ;;  %v8800_v13 = vld [vmem:[#allocation28_spill] sm:$0xff]  ;;  %v8801_v62 = vld [vmem:[#allocation31_spill] sm:$0xff]  ;;  %v8802_v44 = vld [vmem:[#allocation34_spill] sm:$0xff] }
 0x61b   :  { %5458 = vmatprep.subr.mxu1 %v7692_v28  ;;  %v2602_v53 = vmul.f32 %v7692_v28, %v7692_v28  ;;  %v2706_v37 = vadd.f32 %v7692_v28, %v8796_v15  ;;  %v2709_v2 = vadd.f32 %v7692_v28, %v8797_v56  ;;  %v2712_v51 = vadd.f32 %v7692_v28, %v8798_v33 }
 0x61c   :  { %v2715_v39 = vadd.f32 %v7692_v28, %v8799_v16  ;;  %v2718_v17 = vadd.f32 %v7692_v28, %v8800_v13  ;;  %v2721_v31 = vadd.f32 %v7692_v28, %v8801_v62  ;;  %v2724_v20 = vadd.f32 %v7692_v28, %v8802_v44 }
 0x61d   :  { %v2727_v63 = vadd.f32 %v7692_v28, %v8760_v0  ;;  %v2741_v46 = vmin.f32 %v2740_v55, %v2706_v37  ;;  %v2749_v1 = vmin.f32 %v2748_v45, %v2709_v2  ;;  %v2757_v43 = vmin.f32 %v2756_v22, %v2712_v51 }
 0x61e   :  { %5459 = vmatpush3.msra.mxu1 %v7692_v28  ;;  %v2764_v54 = vmin.f32 %v2713_v21, %v2714_v6  ;;  %v2772_v41 = vmin.f32 %v2716_v26, %v2717_v11  ;;  %v2780_v19 = vmin.f32 %v2719_v47, %v2720_v9  ;;  %v2788_v36 = vmin.f32 %v2722_v3, %v2723_v30 }
 0x61f   :  { %5461 = vmatmul.mubr.msk.f32.vlgmr.msra.gmra.mrb[40].mxu1 %vm52_vm5, %v8803_v59  ;;  %5794 = vmatprep.subr.bf16.mxu1 %v5793_v35  ;;  %v2742_v62 = vrot.slane %v2741_v46, 4  ;;  %v2750_v25 = vrot.slane %v2749_v1, 4  ;;  %v2758_v13 = vrot.slane %v2757_v43, 4  ;;  %v2796_v44 = vmin.f32 %v2725_v10, %v2726_v14 }
 0x620   :  { %5796 = vmatpush3.bf16.msra.mxu1 %v5793_v35  ;;  %5469 = vmatprep.mubr.msk.f32.mxu1 %vm52_vm5, %v8783_v60  ;;  %v2765_v2 = vmin.f32 %v2764_v54, %v2715_v39  ;;  %v2773_v22 = vmin.f32 %v2772_v41, %v2718_v17  ;;  %v2781_v45 = vmin.f32 %v2780_v19, %v2721_v31 }
 0x621   :  { %5467 = vmatprep.subr.mxu1 %v2602_v53  ;;  %v2743_v55 = vmin.f32 %v2741_v46, %v2742_v62  ;;  %v2751_v21 = vmin.f32 %v2749_v1, %v2750_v25  ;;  %v2759_v9 = vmin.f32 %v2757_v43, %v2758_v13  ;;  %v2789_v30 = vmin.f32 %v2788_v36, %v2724_v20 }
 0x622   :  { %v2766_v26 = vrot.slane %v2765_v2, 4  ;;  %v2774_v47 = vrot.slane %v2773_v22, 4  ;;  %v2782_v3 = vrot.slane %v2781_v45, 4  ;;  %v2797_v6 = vmin.f32 %v2796_v44, %v2727_v63 }
 0x623   :  { %v2744_v11 = vrot.slane %v2743_v55, 2  ;;  %v2752_v37 = vrot.slane %v2751_v21, 2  ;;  %v2760_v51 = vrot.slane %v2759_v9, 2  ;;  %v2790_v14 = vrot.slane %v2789_v30, 4 }
 0x624   :  { %5468 = vmatpush3.msra.mxu1 %v2602_v53  ;;  %v2767_v10 = vmin.f32 %v2765_v2, %v2766_v26  ;;  %v2775_v35 = vmin.f32 %v2773_v22, %v2774_v47  ;;  %v2783_v60 = vmin.f32 %v2781_v45, %v2782_v3  ;;  %v2798_v39 = vrot.slane %v2797_v6, 4  ;;  %v8805_v3 = vld [vmem:[#allocation36_spill] sm:$0xff] }
 0x625   :  { %5470 = vmatmul.mubr.msk.f32.vlgmr.msra.gmra.mrb[42].mxu1 %vm52_vm5, %v8803_v59  ;;  %v2745_v54 = vmin.f32 %v2743_v55, %v2744_v11  ;;  %v2753_v1 = vmin.f32 %v2751_v21, %v2752_v37  ;;  %v2761_v43 = vmin.f32 %v2759_v9, %v2760_v51  ;;  %v2791_v19 = vmin.f32 %v2789_v30, %v2790_v14 }
 0x626   :  { %v2768_v25 = vrot.slane %v2767_v10, 2  ;;  %v2776_v36 = vrot.slane %v2775_v35, 2  ;;  %v2784_v41 = vrot.slane %v2783_v60, 2  ;;  %v2799_v63 = vmin.f32 %v2797_v6, %v2798_v39 }
 0x627   :  { %v8804_v46 = vpack.c.bf16 %v7640_v52, %v7635_v34  ;;  %v2746_v53 = vrot.slane %v2745_v54, 1  ;;  %v2754_v13 = vrot.slane %v2753_v1, 1  ;;  %v2762_v17 = vrot.slane %v2761_v43, 1 }
 0x628   :  { %v2792_v62 = vrot.slane %v2791_v19, 2  ;;  %v2769_v31 = vmin.f32 %v2767_v10, %v2768_v25  ;;  %v2777_v44 = vmin.f32 %v2775_v35, %v2776_v36  ;;  %v2785_v20 = vmin.f32 %v2783_v60, %v2784_v41  ;;  %v8807_v25 = vld [vmem:[#allocation43_spill] sm:$0xff] }
 0x629   :  { %5830 = vmatprep.subr.bf16.mxu1 %v8804_v46  ;;  %v2800_v59 = vrot.slane %v2799_v63, 2  ;;  %v2747_v2 = vmin.f32 %v2745_v54, %v2746_v53  ;;  %v2755_v22 = vmin.f32 %v2753_v1, %v2754_v13  ;;  %v2763_v45 = vmin.f32 %v2761_v43, %v2762_v17  ;;  %v8806_v43 = vld [vmem:[#allocation40_spill] sm:$0xff]  ;;  %v8810_v53 = vld [vmem:[#allocation42_spill] sm:$0xff] }
 0x62a   :  { %v2793_v55 = vmin.f32 %v2791_v19, %v2792_v62  ;;  %v2770_v21 = vrot.slane %v2769_v31, 1  ;;  %v2778_v9 = vrot.slane %v2777_v44, 1  ;;  %v2786_v30 = vrot.slane %v2785_v20, 1 }
 0x62b   :  { %v2801_v26 = vmin.f32 %v2799_v63, %v2800_v59  ;;  %v2848_v34 = vsel %vm1145_vm10, %v2755_v22, %v2747_v2  ;;  %v2729_v52 = vadd.f32 %v7656_v42, %v6526_v12  ;;  %v2737_v6 = vadd.f32 %v7642_v38, %v8805_v3  ;;  %v8809_v63 = vld [vmem:[#allocation41_spill] sm:$0xff] }
 0x62c   :  { %v2794_v47 = vrot.slane %v2793_v55, 1  ;;  %v2771_v11 = vmin.f32 %v2769_v31, %v2770_v21  ;;  %v2779_v37 = vmin.f32 %v2777_v44, %v2778_v9  ;;  %v2730_v14 = vadd.f32 %v7692_v28, %v6553_v23 }
 0x62d   :  { %v2802_v51 = vrot.slane %v2801_v26, 1  ;;  %v2787_v10 = vmin.f32 %v2785_v20, %v2786_v30  ;;  %v2849_v60 = vsel %vm1147_vm11, %v2763_v45, %v2848_v34  ;;  %v2732_v39 = vadd.f32 %v7656_v42, %v6547_v5 }
 0x62e   :  { %v2795_v35 = vmin.f32 %v2793_v55, %v2794_v47  ;;  %v2850_v54 = vsel %vm1149_vm12, %v2771_v11, %v2849_v60  ;;  %v2733_v1 = vadd.f32 %v7692_v28, %v6647_v24  ;;  %v2735_v19 = vadd.f32 %v7656_v42, %v8806_v43 }
 0x62f   :  { %v2736_v36 = vadd.f32 %v7692_v28, %v8807_v25  ;;  %v2851_v41 = vsel %vm8808_vm7, %v2779_v37, %v2850_v54  ;;  %v2738_v46 = vadd.f32 %v7656_v42, %v8809_v63  ;;  %v2739_v13 = vadd.f32 %v7692_v28, %v8810_v53  ;;  %vm8827_vm7 = vmmov %vm8811_vm8 }
 0x630   :  { %v2804_v17 = vmin.f32 %v7668_v50, %v2729_v52  ;;  %v2803_v62 = vmin.f32 %v2801_v26, %v2802_v51  ;;  %v2852_v31 = vsel %vm8811_vm8, %v2787_v10, %v2851_v41  ;;  %v2812_v44 = vmin.f32 %v7672_v8, %v2732_v39  ;;  %v8815_v41 = vld [vmem:[#allocation23_spill] sm:$0xff]  ;;  %vm8828_vm8 = vmmov %vm8812_vm14 }
 0x631   :  { %v2820_v20 = vmin.f32 %v7676_v27, %v2735_v19  ;;  %v2853_v59 = vsel %vm8812_vm14, %v2795_v35, %v2852_v31  ;;  %v2828_v22 = vmin.f32 %v2737_v6, %v2738_v46  ;;  %v2862_v9 = vsub.f32 %v7642_v38, %v6459_v48  ;;  %v8816_v46 = vld [vmem:[#allocation27_spill] sm:$0xff]  ;;  %v8818_v31 = vld [vmem:[#allocation29_spill] sm:$0xff]  ;;  %vm8829_vm14 = vmmov %vm8813_vm15 }
 0x632   :  { %v2805_v2 = vmin.f32 %v2804_v17, %v2730_v14  ;;  %v7757_v45 = vsel %vm8813_vm15, %v2803_v62, %v2853_v59  ;;  %v2813_v55 = vmin.f32 %v2812_v44, %v2733_v1  ;;  %v2863_v27 = vsub.f32 %v7656_v42, %v8788_v32  ;;  %v8814_v1 = vld [vmem:[#allocation28_spill] sm:$0xff]  ;;  %v8817_v62 = vld [vmem:[#allocation31_spill] sm:$0xff]  ;;  %v8819_v59 = vld [vmem:[#allocation30_spill] sm:$0xff] }
 0x633   :  { %v2821_v21 = vmin.f32 %v2820_v20, %v2736_v36  ;;  %4693 = vmatprep.mubr.msk.f32.mxu0 %vm60_vm9, %v7757_v45  ;;  %v2829_v8 = vmin.f32 %v2828_v22, %v2739_v13  ;;  %v2864_v30 = vsub.f32 %v7692_v28, %v8796_v15  ;;  %v2865_v34 = vsub.f32 %v7642_v38, %v6462_v49  ;;  %v8820_v22 = vld [vmem:[#allocation34_spill] sm:$0xff] }
 0x634   :  { %v2806_v50 = vrot.slane %v2805_v2, 4  ;;  %v2814_v26 = vrot.slane %v2813_v55, 4  ;;  %v2866_v48 = vsub.f32 %v7656_v42, %v8789_v40  ;;  %v2867_v11 = vsub.f32 %v7692_v28, %v8797_v56 }
 0x635   :  { %v2822_v47 = vrot.slane %v2821_v21, 4  ;;  %v2830_v6 = vrot.slane %v2829_v8, 4  ;;  %v2868_v37 = vsub.f32 %v7642_v38, %v8746_v4  ;;  %v2869_v15 = vsub.f32 %v7656_v42, %v8790_v29 }
 0x636   :  { %v2807_v52 = vmin.f32 %v2805_v2, %v2806_v50  ;;  %v2815_v32 = vmin.f32 %v2813_v55, %v2814_v26  ;;  %v2870_v14 = vsub.f32 %v7692_v28, %v8798_v33  ;;  %v2871_v40 = vsub.f32 %v7642_v38, %v6486_v58 }
 0x637   :  { %v2823_v51 = vmin.f32 %v2821_v21, %v2822_v47  ;;  %v2831_v10 = vmin.f32 %v2829_v8, %v2830_v6  ;;  %v2872_v35 = vsub.f32 %v7656_v42, %v8791_v57  ;;  %v2873_v4 = vsub.f32 %v7692_v28, %v8799_v16  ;;  %v8821_v8 = vld [vmem:[#allocation32_spill] sm:$0xff]  ;;  %v8822_v47 = vld [vmem:[#allocation33_spill] sm:$0xff] }
 0x638   :  { %v2808_v49 = vrot.slane %v2807_v52, 2  ;;  %v2816_v56 = vrot.slane %v2815_v32, 2  ;;  %v2874_v39 = vsub.f32 %v7642_v38, %v8749_v61  ;;  %v2875_v33 = vsub.f32 %v7656_v42, %v8792_v18 }
 0x639   :  { %v2824_v60 = vrot.slane %v2823_v51, 2  ;;  %v2832_v54 = vrot.slane %v2831_v10, 2  ;;  %v2876_v19 = vsub.f32 %v7692_v28, %v8814_v1  ;;  %v2877_v57 = vsub.f32 %v7642_v38, %v8815_v41 }
 0x63a   :  { %v2809_v29 = vmin.f32 %v2807_v52, %v2808_v49  ;;  %v2817_v58 = vmin.f32 %v2815_v32, %v2816_v56  ;;  %v2878_v13 = vsub.f32 %v7656_v42, %v8816_v46  ;;  %v2879_v61 = vsub.f32 %v7692_v28, %v8817_v62 }
 0x63b   :  { %v2825_v36 = vmin.f32 %v2823_v51, %v2824_v60  ;;  %v2833_v17 = vmin.f32 %v2831_v10, %v2832_v54  ;;  %v2880_v44 = vsub.f32 %v7642_v38, %v8818_v31  ;;  %v2881_v2 = vsub.f32 %v7656_v42, %v8819_v59 }
 0x63c   :  { %v2810_v16 = vrot.slane %v2809_v29, 1  ;;  %v2818_v18 = vrot.slane %v2817_v58, 1  ;;  %v2882_v55 = vsub.f32 %v7692_v28, %v8820_v22  ;;  %v2883_v26 = vsub.f32 %v7642_v38, %v8821_v8 }
 0x63d   :  { %v2826_v20 = vrot.slane %v2825_v36, 1  ;;  %v2834_v50 = vrot.slane %v2833_v17, 1  ;;  %v2884_v52 = vsub.f32 %v7656_v42, %v8822_v47  ;;  %v2898_v51 = vmax.f32 %v2862_v9, %v2863_v27 }
 0x63e   :  { %v2811_v21 = vmin.f32 %v2809_v29, %v2810_v16  ;;  %v2819_v6 = vmin.f32 %v2817_v58, %v2818_v18  ;;  %v2906_v49 = vmax.f32 %v2865_v34, %v2866_v48  ;;  %v2914_v56 = vmax.f32 %v2868_v37, %v2869_v15 }
 0x63f   :  { %v2827_v32 = vmin.f32 %v2825_v36, %v2826_v20  ;;  %v2835_v10 = vmin.f32 %v2833_v17, %v2834_v50  ;;  %v2922_v60 = vmax.f32 %v2871_v40, %v2872_v35  ;;  %v2930_v54 = vmax.f32 %v2874_v39, %v2875_v33 }
 0x640   :  { %v2855_v1 = vsel %vm1145_vm10, %v2819_v6, %v2811_v21  ;;  %v2899_v41 = vmax.f32 %v2898_v51, %v2864_v30  ;;  %v2907_v46 = vmax.f32 %v2906_v49, %v2867_v11  ;;  %v2938_v29 = vmax.f32 %v2877_v57, %v2878_v13 }
 0x641   :  { %v2856_v16 = vsel %vm1147_vm11, %v2827_v32, %v2855_v1  ;;  %v2915_v62 = vmax.f32 %v2914_v56, %v2870_v14  ;;  %v2923_v31 = vmax.f32 %v2922_v60, %v2873_v4  ;;  %v2931_v59 = vmax.f32 %v2930_v54, %v2876_v19 }
 0x642   :  { %v7811_v22 = vsel %vm1149_vm12, %v2835_v10, %v2856_v16  ;;  %v2900_v58 = vrot.slane %v2899_v41, 4  ;;  %v2908_v9 = vrot.slane %v2907_v46, 4  ;;  %v2939_v27 = vmax.f32 %v2938_v29, %v2879_v61 }
 0x643   :  { %v2885_v34 = vsub.f32 %v7692_v28, %v8760_v0  ;;  %v2916_v48 = vrot.slane %v2915_v62, 4  ;;  %v2924_v37 = vrot.slane %v2923_v31, 4  ;;  %v2932_v15 = vrot.slane %v2931_v59, 4 }
 0x644   :  { %v2901_v30 = vmax.f32 %v2899_v41, %v2900_v58  ;;  %v2909_v11 = vmax.f32 %v2907_v46, %v2908_v9  ;;  %v2940_v40 = vrot.slane %v2939_v27, 4  ;;  %v2946_v35 = vmax.f32 %v2880_v44, %v2881_v2  ;;  %v8823_v9 = vld [vmem:[#allocation39_spill] sm:$0xff] }
 0x645   :  { %v2917_v39 = vmax.f32 %v2915_v62, %v2916_v48  ;;  %v2925_v14 = vmax.f32 %v2923_v31, %v2924_v37  ;;  %v2933_v4 = vmax.f32 %v2931_v59, %v2932_v15  ;;  %v2954_v33 = vmax.f32 %v2883_v26, %v2884_v52 }
 0x646   :  { %v2902_v19 = vrot.slane %v2901_v30, 2  ;;  %v2910_v36 = vrot.slane %v2909_v11, 2  ;;  %v2941_v57 = vmax.f32 %v2939_v27, %v2940_v40  ;;  %v2947_v13 = vmax.f32 %v2946_v35, %v2882_v55  ;;  %v8824_v40 = vld [vmem:[#allocation38_spill] sm:$0xff] }
 0x647   :  { %v2918_v17 = vrot.slane %v2917_v39, 2  ;;  %v2926_v61 = vrot.slane %v2925_v14, 2  ;;  %v2934_v18 = vrot.slane %v2933_v4, 2  ;;  %v2955_v20 = vmax.f32 %v2954_v33, %v2885_v34 }
 0x648   :  { %v2903_v0 = vmax.f32 %v2901_v30, %v2902_v19  ;;  %v2911_v21 = vmax.f32 %v2909_v11, %v2910_v36  ;;  %v2942_v50 = vrot.slane %v2941_v57, 2  ;;  %v2948_v8 = vrot.slane %v2947_v13, 4  ;;  %v8826_v19 = vld [vmem:[#allocation37_spill] sm:$0xff] }
 0x649   :  { %v2919_v47 = vmax.f32 %v2917_v39, %v2918_v17  ;;  %v2927_v6 = vmax.f32 %v2925_v14, %v2926_v61  ;;  %v2935_v32 = vmax.f32 %v2933_v4, %v2934_v18  ;;  %v2956_v44 = vrot.slane %v2955_v20, 4 }
 0x64a   :  { %v2904_v2 = vrot.slane %v2903_v0, 1  ;;  %v2912_v51 = vrot.slane %v2911_v21, 1  ;;  %v2943_v49 = vmax.f32 %v2941_v57, %v2942_v50  ;;  %v2949_v26 = vmax.f32 %v2947_v13, %v2948_v8 }
 0x64b   :  { %v2920_v52 = vrot.slane %v2919_v47, 1  ;;  %v2928_v10 = vrot.slane %v2927_v6, 1  ;;  %v2936_v56 = vrot.slane %v2935_v32, 1  ;;  %v2957_v55 = vmax.f32 %v2955_v20, %v2956_v44 }
 0x64c   :  { %v2905_v60 = vmax.f32 %v2903_v0, %v2904_v2  ;;  %v2913_v54 = vmax.f32 %v2911_v21, %v2912_v51  ;;  %v2944_v1 = vrot.slane %v2943_v49, 1  ;;  %v2950_v41 = vrot.slane %v2949_v26, 2 }
 0x64d   :  { %v2921_v46 = vmax.f32 %v2919_v47, %v2920_v52  ;;  %v2929_v29 = vmax.f32 %v2927_v6, %v2928_v10  ;;  %v2937_v16 = vmax.f32 %v2935_v32, %v2936_v56  ;;  %v2958_v62 = vrot.slane %v2957_v55, 2 }
 0x64e   :  { %v2945_v31 = vmax.f32 %v2943_v49, %v2944_v1  ;;  %v2951_v59 = vmax.f32 %v2949_v26, %v2950_v41  ;;  %v3006_v58 = vsel %vm1145_vm10, %v2913_v54, %v2905_v60  ;;  %v2886_v27 = vsub.f32 %v7642_v38, %v8823_v9  ;;  %v4515_v9 = vld [vmem:[%s8598_s8 + $0x670] sm:$0xff] }
 0x64f   :  { %v2959_v34 = vmax.f32 %v2957_v55, %v2958_v62  ;;  %v3007_v48 = vsel %vm1147_vm11, %v2921_v46, %v3006_v58  ;;  %v2887_v37 = vsub.f32 %v7656_v42, %v6526_v12  ;;  %v2888_v15 = vsub.f32 %v7692_v28, %v6553_v23 }
 0x650   :  { %v2952_v30 = vrot.slane %v2951_v59, 1  ;;  %v3008_v11 = vsel %vm1149_vm12, %v2929_v29, %v3007_v48  ;;  %v2889_v35 = vsub.f32 %v7642_v38, %v8824_v40  ;;  %v2890_v39 = vsub.f32 %v7656_v42, %v6547_v5  ;;  %v4581_v40 = vld [vmem:[%s8598_s8 + $0x880] sm:$0xff] }
 0x651   :  { %v2960_v14 = vrot.slane %v2959_v34, 1  ;;  %v3009_v4 = vsel %vm8825_vm13, %v2937_v16, %v3008_v11  ;;  %v2891_v33 = vsub.f32 %v7692_v28, %v6647_v24  ;;  %v2892_v12 = vsub.f32 %v7642_v38, %v8826_v19  ;;  %v4552_v11 = vld [vmem:[%s8598_s8 + $0x798] sm:$0xff] }
 0x652   :  { %v2953_v36 = vmax.f32 %v2951_v59, %v2952_v30  ;;  %v3010_v23 = vsel %vm8827_vm7, %v2945_v31, %v3009_v4  ;;  %v2893_v57 = vsub.f32 %v7656_v42, %v8806_v43  ;;  %v2894_v13 = vsub.f32 %v7692_v28, %v8807_v25  ;;  %v4551_v30 = vld [vmem:[%s8598_s8 + $0x790] sm:$0xff]  ;;  %v4536_v4 = vld [vmem:[%s8598_s8 + $0x718] sm:$0xff] }
 0x653   :  { %v2961_v17 = vmax.f32 %v2959_v34, %v2960_v14  ;;  %v2895_v5 = vsub.f32 %v7642_v38, %v8805_v3  ;;  %v2896_v61 = vsub.f32 %v7656_v42, %v8809_v63  ;;  %v2897_v24 = vsub.f32 %v7692_v28, %v8810_v53  ;;  %v4533_v34 = vld [vmem:[%s8598_s8 + $0x700] sm:$0xff]  ;;  %v4535_v14 = vld [vmem:[%s8598_s8 + $0x710] sm:$0xff] }
 0x654   :  { %v3011_v18 = vsel %vm8828_vm8, %v2953_v36, %v3010_v23  ;;  %v2962_v20 = vmax.f32 %v2886_v27, %v2887_v37  ;;  %v2970_v0 = vmax.f32 %v2889_v35, %v2890_v39  ;;  %v2978_v21 = vmax.f32 %v2892_v12, %v2893_v57  ;;  %v4516_v27 = vld [vmem:[%s8598_s8 + $0x678] sm:$0xff]  ;;  %v4534_v37 = vld [vmem:[%s8598_s8 + $0x708] sm:$0xff]  ;;  %v4553_v12 = vld [vmem:[%s8598_s8 + $0x7a0] sm:$0xff] }
 0x655   :  { %v7846_v43 = vsel %vm8829_vm14, %v2961_v17, %v3011_v18  ;;  %v2986_v50 = vmax.f32 %v2895_v5, %v2896_v61  ;;  %v5827_v48 = vpack.c.bf16 %v4516_v27, %v4515_v9  ;;  %v5833_v35 = vpack.c.bf16 %v4552_v11, %v4551_v30  ;;  %v4582_v39 = vld [vmem:[%s8598_s8 + $0x888] sm:$0xff]  ;;  %v4537_v57 = vld [vmem:[%s8598_s8 + $0x720] sm:$0xff]  ;;  %v4555_v5 = vld [vmem:[%s8598_s8 + $0x7b0] sm:$0xff] }
 0x656   :  { %v2963_v25 = vmax.f32 %v2962_v20, %v2888_v15  ;;  %v2971_v8 = vmax.f32 %v2970_v0, %v2891_v33  ;;  %v2979_v47 = vmax.f32 %v2978_v21, %v2894_v13  ;;  %v5831_v15 = vpack.c.bf16 %v4534_v37, %v4533_v34  ;;  %v4554_v36 = vld [vmem:[%s8598_s8 + $0x7a8] sm:$0xff]  ;;  %v4556_v61 = vld [vmem:[%s8598_s8 + $0x7b8] sm:$0xff]  ;;  %v4539_v18 = vld [vmem:[%s8598_s8 + $0x730] sm:$0xff] }
 0x657   :  { %v2987_v6 = vmax.f32 %v2986_v50, %v2897_v24  ;;  %5828 = vmatpush3.bf16.msra.mxu0 %v5827_v48  ;;  %v5861_v33 = vpack.c.bf16 %v4582_v39, %v4581_v40  ;;  %v5835_v19 = vpack.c.bf16 %v4536_v4, %v4535_v14  ;;  %v5837_v23 = vpack.c.bf16 %v4554_v36, %v4553_v12  ;;  %v4538_v13 = vld [vmem:[%s8598_s8 + $0x728] sm:$0xff]  ;;  %v4540_v20 = vld [vmem:[%s8598_s8 + $0x738] sm:$0xff]  ;;  %v4557_v21 = vld [vmem:[%s8598_s8 + $0x7c0] sm:$0xff] }
 0x658   :  { %v2964_v38 = vrot.slane %v2963_v25, 4  ;;  %v2972_v3 = vrot.slane %v2971_v8, 4  ;;  %v2980_v32 = vrot.slane %v2979_v47, 4  ;;  %5832 = vmatpush3.bf16.msra.mxu1 %v5831_v15  ;;  %v5839_v17 = vpack.c.bf16 %v4538_v13, %v4537_v57  ;;  %v4558_v50 = vld [vmem:[%s8598_s8 + $0x7c8] sm:$0xff]  ;;  %v8830_v34 = vld [vmem:[#allocation25_spill] sm:$0xff]  ;;  %v4567_v15 = vld [vmem:[%s8598_s8 + $0x810] sm:$0xff] }
 0x659   :  { %v2988_v42 = vrot.slane %v2987_v6, 4  ;;  %5834 = vmatprep.subr.bf16.mxu1 %v5833_v35  ;;  %5862 = vmatprep.subr.bf16.mxu0 %v5861_v33  ;;  %v5841_v24 = vpack.c.bf16 %v4556_v61, %v4555_v5  ;;  %v5843_v0 = vpack.c.bf16 %v4540_v20, %v4539_v18  ;;  %v4568_v30 = vld [vmem:[%s8598_s8 + $0x818] sm:$0xff]  ;;  %v4585_v35 = vld [vmem:[%s8598_s8 + $0x8a0] sm:$0xff]  ;;  %v4586_v39 = vld [vmem:[%s8598_s8 + $0x8a8] sm:$0xff]  ;;  %v7994_v14 = vsel %vm60_vm9, %v7757_v45, 0.0 }
 0x65a   :  { %v2965_v63 = vmax.f32 %v2963_v25, %v2964_v38  ;;  %v2973_v44 = vmax.f32 %v2971_v8, %v2972_v3  ;;  %v2981_v28 = vmax.f32 %v2979_v47, %v2980_v32  ;;  %v5845_v25 = vpack.c.bf16 %v4558_v50, %v4557_v21  ;;  %v4541_v8 = vld [vmem:[%s8598_s8 + $0x740] sm:$0xff]  ;;  %v4542_v47 = vld [vmem:[%s8598_s8 + $0x748] sm:$0xff]  ;;  %v4559_v38 = vld [vmem:[%s8598_s8 + $0x7d0] sm:$0xff] }
 0x65b   :  { %v2989_v53 = vmax.f32 %v2987_v6, %v2988_v42  ;;  %v5847_v6 = vpack.c.bf16 %v4542_v47, %v4541_v8  ;;  %v4560_v3 = vld [vmem:[%s8598_s8 + $0x7d8] sm:$0xff]  ;;  %v4543_v42 = vld [vmem:[%s8598_s8 + $0x750] sm:$0xff]  ;;  %v5867_v33 = vpack.c.bf16 %v4568_v30, %v4567_v15  ;;  %v5869_v12 = vpack.c.bf16 %v4586_v39, %v4585_v35  ;;  %v4569_v36 = vld [vmem:[%s8598_s8 + $0x820] sm:$0xff] }
 0x65c   :  { %v2966_v2 = vrot.slane %v2965_v63, 2  ;;  %v2974_v51 = vrot.slane %v2973_v44, 2  ;;  %v2982_v49 = vrot.slane %v2981_v28, 2  ;;  %5836 = vmatpush3.bf16.msra.mxu1 %v5835_v19  ;;  %v5849_v32 = vpack.c.bf16 %v4560_v3, %v4559_v38  ;;  %v8831_v11 = vld [vmem:[#allocation17_spill] sm:$0xff]  ;;  %v4570_v45 = vld [vmem:[%s8598_s8 + $0x828] sm:$0xff]  ;;  %v4587_v61 = vld [vmem:[%s8598_s8 + $0x8b0] sm:$0xff] }
 0x65d   :  { %v2990_v26 = vrot.slane %v2989_v53, 2  ;;  %5838 = vmatprep.subr.bf16.mxu1 %v5837_v23  ;;  %v5871_v21 = vpack.c.bf16 %v4570_v45, %v4569_v36  ;;  %v4571_v8 = vld [vmem:[%s8598_s8 + $0x830] sm:$0xff]  ;;  %v4572_v47 = vld [vmem:[%s8598_s8 + $0x838] sm:$0xff]  ;;  %v4589_v38 = vld [vmem:[%s8598_s8 + $0x8c0] sm:$0xff] }
 0x65e   :  { %v2967_v52 = vmax.f32 %v2965_v63, %v2966_v2  ;;  %v2975_v10 = vmax.f32 %v2973_v44, %v2974_v51  ;;  %v2983_v56 = vmax.f32 %v2981_v28, %v2982_v49  ;;  %v4544_v63 = vld [vmem:[%s8598_s8 + $0x758] sm:$0xff]  ;;  %v4561_v44 = vld [vmem:[%s8598_s8 + $0x7e0] sm:$0xff]  ;;  %v4562_v28 = vld [vmem:[%s8598_s8 + $0x7e8] sm:$0xff] }
 0x65f   :  { %v2991_v55 = vmax.f32 %v2989_v53, %v2990_v26  ;;  %v5851_v53 = vpack.c.bf16 %v4544_v63, %v4543_v42  ;;  %v5853_v2 = vpack.c.bf16 %v4562_v28, %v4561_v44  ;;  %v4545_v51 = vld [vmem:[%s8598_s8 + $0x760] sm:$0xff]  ;;  %v4546_v49 = vld [vmem:[%s8598_s8 + $0x768] sm:$0xff]  ;;  %v4563_v26 = vld [vmem:[%s8598_s8 + $0x7f0] sm:$0xff]  ;;  %v5875_v63 = vpack.c.bf16 %v4572_v47, %v4571_v8 }
 0x660   :  { %v2968_v60 = vrot.slane %v2967_v52, 1  ;;  %v2976_v54 = vrot.slane %v2975_v10, 1  ;;  %v2984_v1 = vrot.slane %v2983_v56, 1  ;;  %5840 = vmatpush3.bf16.msra.mxu1 %v5839_v17  ;;  %v8833_v17 = vld [vmem:[#allocation35_spill] sm:$0xff]  ;;  %v4616_v39 = vld [vmem:[%s8598_s8 + $0x998] sm:$0xff]  ;;  %v4665_v4 = vld [vmem:[%s8598_s8 + $0xb20] sm:$0xff] }
 0x661   :  { %v2992_v41 = vrot.slane %v2991_v55, 1  ;;  %5842 = vmatprep.subr.bf16.mxu1 %v5841_v24  ;;  %v3021_v5 = vmul.f32 %v7994_v14, %v8833_v17  ;;  %v4588_v24 = vld [vmem:[%s8598_s8 + $0x8b8] sm:$0xff]  ;;  %v4590_v3 = vld [vmem:[%s8598_s8 + $0x8c8] sm:$0xff]  ;;  %v4615_v35 = vld [vmem:[%s8598_s8 + $0x990] sm:$0xff] }
 0x662   :  { %v2969_v46 = vmax.f32 %v2967_v52, %v2968_v60  ;;  %v2977_v29 = vmax.f32 %v2975_v10, %v2976_v54  ;;  %v2985_v16 = vmax.f32 %v2983_v56, %v2984_v1  ;;  %v4564_v52 = vld [vmem:[%s8598_s8 + $0x7f8] sm:$0xff]  ;;  %v5855_v10 = vpack.c.bf16 %v4546_v49, %v4545_v51  ;;  %v4613_v54 = vld [vmem:[%s8598_s8 + $0x980] sm:$0xff]  ;;  %v4614_v1 = vld [vmem:[%s8598_s8 + $0x988] sm:$0xff] }
 0x663   :  { %v2993_v62 = vmax.f32 %v2991_v55, %v2992_v41  ;;  %v5857_v56 = vpack.c.bf16 %v4564_v52, %v4563_v26  ;;  %v4547_v55 = vld [vmem:[%s8598_s8 + $0x770] sm:$0xff]  ;;  %v4548_v60 = vld [vmem:[%s8598_s8 + $0x778] sm:$0xff]  ;;  %v5877_v28 = vpack.c.bf16 %v4590_v3, %v4589_v38  ;;  %v4598_v15 = vld [vmem:[%s8598_s8 + $0x908] sm:$0xff] }
 0x664   :  { %v3013_v31 = vsel %vm1145_vm10, %v2977_v29, %v2969_v46  ;;  %5844 = vmatpush3.bf16.msra.mxu1 %v5843_v0  ;;  %v5859_v41 = vpack.c.bf16 %v4548_v60, %v4547_v55  ;;  %v5893_v46 = vpack.c.bf16 %v4614_v1, %v4613_v54  ;;  %v4565_v29 = vld [vmem:[%s8598_s8 + $0x800] sm:$0xff]  ;;  %v4591_v51 = vld [vmem:[%s8598_s8 + $0x8d0] sm:$0xff]  ;;  %v4592_v49 = vld [vmem:[%s8598_s8 + $0x8d8] sm:$0xff] }
 0x665   :  { %v3014_v59 = vsel %vm1147_vm11, %v2985_v16, %v3013_v31  ;;  %5846 = vmatprep.subr.bf16.mxu1 %v5845_v25  ;;  %v4566_v16 = vld [vmem:[%s8598_s8 + $0x808] sm:$0xff]  ;;  %v4584_v31 = vld [vmem:[%s8598_s8 + $0x898] sm:$0xff]  ;;  %v5873_v25 = vpack.c.bf16 %v4588_v24, %v4587_v61  ;;  %v5881_v52 = vpack.c.bf16 %v4592_v49, %v4591_v51  ;;  %v4593_v55 = vld [vmem:[%s8598_s8 + $0x8e0] sm:$0xff] }
 0x666   :  { %v7851_v58 = vsel %vm1149_vm12, %v2993_v62, %v3014_v59  ;;  %v4583_v62 = vld [vmem:[%s8598_s8 + $0x890] sm:$0xff]  ;;  %v5863_v27 = vpack.c.bf16 %v4566_v16, %v4565_v29  ;;  %v4594_v60 = vld [vmem:[%s8598_s8 + $0x8e8] sm:$0xff]  ;;  %v4596_v16 = vld [vmem:[%s8598_s8 + $0x8f8] sm:$0xff] }
 0x667   :  { %v5865_v37 = vpack.c.bf16 %v4584_v31, %v4583_v62  ;;  %v5885_v1 = vpack.c.bf16 %v4594_v60, %v4593_v55  ;;  %v4595_v29 = vld [vmem:[%s8598_s8 + $0x8f0] sm:$0xff]  ;;  %v4646_v36 = vld [vmem:[%s8598_s8 + $0xa88] sm:$0xff]  ;;  %v4600_v24 = vld [vmem:[%s8598_s8 + $0x918] sm:$0xff] }
 0x668   :  { %5848 = vmatpush3.bf16.msra.mxu1 %v5847_v6  ;;  %v4599_v61 = vld [vmem:[%s8598_s8 + $0x910] sm:$0xff]  ;;  %v4618_v8 = vld [vmem:[%s8598_s8 + $0x9a8] sm:$0xff]  ;;  %v4632_v49 = vld [vmem:[%s8598_s8 + $0xa18] sm:$0xff] }
 0x669   :  { %5850 = vmatprep.subr.bf16.mxu1 %v5849_v32  ;;  %v4647_v47 = vld [vmem:[%s8598_s8 + $0xa90] sm:$0xff]  ;;  %v5899_v38 = vpack.c.bf16 %v4600_v24, %v4599_v61  ;;  %v4650_v55 = vld [vmem:[%s8598_s8 + $0xaa8] sm:$0xff] }
 0x66c   :  { %5852 = vmatpush3.bf16.msra.mxu1 %v5851_v53  ;;  %v4573_v53 = vld [vmem:[%s8598_s8 + $0x840] sm:$0xff] }
 0x66d   :  { %5854 = vmatprep.subr.bf16.mxu1 %v5853_v2  ;;  %v4574_v2 = vld [vmem:[%s8598_s8 + $0x848] sm:$0xff] }
 0x66e   :  { %v5879_v26 = vpack.c.bf16 %v4574_v2, %v4573_v53 }
 0x670   :  { %5856 = vmatpush3.bf16.msra.mxu1 %v5855_v10  ;;  %v4575_v10 = vld [vmem:[%s8598_s8 + $0x850] sm:$0xff] }
 0x671   :  { %5858 = vmatprep.subr.bf16.mxu1 %v5857_v56  ;;  %v4576_v56 = vld [vmem:[%s8598_s8 + $0x858] sm:$0xff] }
 0x672   :  { %v5883_v54 = vpack.c.bf16 %v4576_v56, %v4575_v10  ;;  %v4649_v56 = vld [vmem:[%s8598_s8 + $0xaa0] sm:$0xff] }
 0x674   :  { %5860 = vmatpush3.bf16.msra.mxu1 %v5859_v41  ;;  %v4577_v41 = vld [vmem:[%s8598_s8 + $0x860] sm:$0xff] }
 0x675   :  { %5894 = vmatprep.subr.bf16.mxu1 %v5893_v46  ;;  %v4578_v46 = vld [vmem:[%s8598_s8 + $0x868] sm:$0xff] }
 0x676   :  { %v5887_v31 = vpack.c.bf16 %v4578_v46, %v4577_v41  ;;  %v4603_v46 = vld [vmem:[%s8598_s8 + $0x930] sm:$0xff] }
 0x6f2   :  { %v5462_v59 = vpop.f32.mrb[40].mxu1 }
 0x6f3   :  { %v2591_v9 = vpop.f32.mrb[41].mxu1  ;;  %v7983_v40 = vmul.f32 %v8831_v11, %v5462_v59  ;;  %v4579_v59 = vld [vmem:[%s8598_s8 + $0x870] sm:$0xff] }
 0x6f4   :  { %v7974_v48 = vmul.f32 %v8830_v34, %v2591_v9  ;;  %v4580_v9 = vld [vmem:[%s8598_s8 + $0x878] sm:$0xff] }
 0x6f5   :  { %v2683_v57 = vmul.f32 %v7983_v40, %v7983_v40 }
 0x6f6   :  { %3297 = vmatmul.mubr.f32.vlgmr.msra.gmra.mrb[50].mxu0 %v7974_v48  ;;  %v2682_v20 = vmul.f32 %v7974_v48, %v7974_v48  ;;  %v3020_v3 = vmul.f32 %v7974_v48, %v8833_v17 }
 0x6f7   :  { %5864 = vmatpush3.bf16.msra.mxu0 %v5863_v27  ;;  %4694 = vmatprep.mubr.msk.f32.mxu0 %vm61_vm1, %v7811_v22 }
 0x6f8   :  { %v5471_v19 = vpop.f32.mrb[42].mxu1  ;;  %5866 = vmatprep.subr.bf16.mxu0 %v5865_v37  ;;  %v4597_v37 = vld [vmem:[%s8598_s8 + $0x900] sm:$0xff] }
 0x6f9   :  { %v2681_v23 = vmul.f32 %v8831_v11, %v5471_v19  ;;  %v2669_v13 = vpop.f32.mrb[43].mxu1  ;;  %v5891_v19 = vpack.c.bf16 %v4580_v9, %v4579_v59  ;;  %v5933_v59 = vpack.c.bf16 %v4650_v55, %v4649_v56  ;;  %v4634_v9 = vld [vmem:[%s8598_s8 + $0xa28] sm:$0xff] }
 0x6fa   :  { %v2680_v18 = vmul.f32 %v8830_v34, %v2669_v13  ;;  %3302 = vmatmul.mubr.f32.gmra.mrb[52].mxu0 %v7983_v40  ;;  %v5889_v34 = vpack.c.bf16 %v4596_v16, %v4595_v29  ;;  %v4604_v29 = vld [vmem:[%s8598_s8 + $0x938] sm:$0xff]  ;;  %v4633_v16 = vld [vmem:[%s8598_s8 + $0xa20] sm:$0xff] }
 0x6fb   :  { %v2685_v0 = vsub.f32 %v2681_v23, %v2683_v57  ;;  %5868 = vmatpush3.bf16.msra.mxu0 %v5867_v33  ;;  %3446 = vmatprep.mubr.f32.mxu0 %v3021_v5  ;;  %v5895_v23 = vpack.c.bf16 %v4598_v15, %v4597_v37  ;;  %v5897_v5 = vpack.c.bf16 %v4616_v39, %v4615_v35  ;;  %v4651_v37 = vld [vmem:[%s8598_s8 + $0xab0] sm:$0xff]  ;;  %v4605_v35 = vld [vmem:[%s8598_s8 + $0x940] sm:$0xff]  ;;  %v4606_v39 = vld [vmem:[%s8598_s8 + $0x948] sm:$0xff] }
 0x6fc   :  { %v2684_v50 = vsub.f32 %v2680_v18, %v2682_v20  ;;  %5870 = vmatprep.subr.bf16.mxu0 %v5869_v12  ;;  %v4645_v12 = vld [vmem:[%s8598_s8 + $0xa80] sm:$0xff]  ;;  %v5907_v15 = vpack.c.bf16 %v4604_v29, %v4603_v46  ;;  %v4642_v29 = vld [vmem:[%s8598_s8 + $0xa68] sm:$0xff] }
 0x6fd   :  { %v2687_v6 = vmax.f32 %v2685_v0, 0.0  ;;  %v5925_v20 = vpack.c.bf16 %v4646_v36, %v4645_v12  ;;  %v4629_v0 = vld [vmem:[%s8598_s8 + $0xa00] sm:$0xff]  ;;  %v4636_v12 = vld [vmem:[%s8598_s8 + $0xa38] sm:$0xff]  ;;  %v4623_v36 = vld [vmem:[%s8598_s8 + $0x9d0] sm:$0xff] }
 0x6fe   :  { %v2686_v32 = vmax.f32 %v2684_v50, 0.0  ;;  %v4617_v50 = vld [vmem:[%s8598_s8 + $0x9a0] sm:$0xff] }
 0x6ff   :  { %v8033_v42 = vadd.f32 1e-05, %v2687_v6  ;;  %5872 = vmatpush3.bf16.msra.mxu0 %v5871_v21  ;;  %v4630_v21 = vld [vmem:[%s8598_s8 + $0xa08] sm:$0xff]  ;;  %v4648_v6 = vld [vmem:[%s8598_s8 + $0xa98] sm:$0xff]  ;;  %v5901_v2 = vpack.c.bf16 %v4618_v8, %v4617_v50  ;;  %v4625_v8 = vld [vmem:[%s8598_s8 + $0x9e0] sm:$0xff] }
 0x700   :  { %v2688_v44 = vadd.f32 1e-05, %v2686_v32  ;;  %5874 = vmatprep.subr.bf16.mxu0 %v5873_v25  ;;  %v8121_v25 = vsel %vm61_vm1, %v7811_v22, 0.0  ;;  %v5927_v32 = vpack.c.bf16 %v4630_v21, %v4629_v0  ;;  %v5929_v51 = vpack.c.bf16 %v4648_v6, %v4647_v47  ;;  %v4637_v0 = vld [vmem:[%s8598_s8 + $0xa40] sm:$0xff]  ;;  %v4638_v50 = vld [vmem:[%s8598_s8 + $0xa48] sm:$0xff]  ;;  %v4655_v6 = vld [vmem:[%s8598_s8 + $0xad0] sm:$0xff] }
 0x701   :  { %6053 = vrsqrt.f32 %v8033_v42  ;;  %vm2699_vm12 = vcmp.eq.f32.partialorder %v8033_v42, inf  ;;  %v2702_v18 = vand.u32 2147483648, %v8033_v42  ;;  %vm2701_vm15 = vcmp.eq.f32.partialorder %v8033_v42, 0.0  ;;  %v4626_v47 = vld [vmem:[%s8598_s8 + $0x9e8] sm:$0xff] }
 0x702   :  { %6055 = vrsqrt.f32 %v2688_v44  ;;  %vm2692_vm10 = vcmp.eq.f32.partialorder %v2688_v44, inf  ;;  %v2695_v33 = vand.u32 2147483648, %v2688_v44  ;;  %vm2694_vm11 = vcmp.eq.f32.partialorder %v2688_v44, 0.0 }
 0x703   :  { %5876 = vmatpush3.bf16.msra.mxu0 %v5875_v63  ;;  %v4602_v63 = vld [vmem:[%s8598_s8 + $0x928] sm:$0xff] }
 0x704   :  { %5878 = vmatprep.subr.bf16.mxu0 %v5877_v28  ;;  %v8834_v28 = vld [vmem:[#allocation44_spill] sm:$0xff] }
 0x705   :  { %v3025_v53 = vmul.f32 %v8121_v25, %v8834_v28 }
 0x707   :  { %5880 = vmatpush3.bf16.msra.mxu0 %v5879_v26  ;;  %v4619_v26 = vld [vmem:[%s8598_s8 + $0x9b0] sm:$0xff] }
 0x708   :  { %5882 = vmatprep.subr.bf16.mxu0 %v5881_v52  ;;  %v4620_v52 = vld [vmem:[%s8598_s8 + $0x9b8] sm:$0xff] }
 0x709   :  { %v5905_v41 = vpack.c.bf16 %v4620_v52, %v4619_v26  ;;  %v4628_v26 = vld [vmem:[%s8598_s8 + $0x9f8] sm:$0xff]  ;;  %v4657_v52 = vld [vmem:[%s8598_s8 + $0xae0] sm:$0xff] }
 0x70b   :  { %v6054_v62 = vpop.eup %6053  ;;  %5884 = vmatpush3.bf16.msra.mxu0 %v5883_v54  ;;  %v3024_v54 = vmul.f32 %v7983_v40, %v8834_v28 }
 0x70c   :  { %v6056_v27 = vpop.eup %6055  ;;  %5886 = vmatprep.subr.bf16.mxu0 %v5885_v1  ;;  %v2698_v30 = vmul.f32 %v6054_v62, %v8033_v42  ;;  %v8835_v62 = vld [vmem:[#allocation45_spill] sm:$0xff] }
 0x70d   :  { %v2691_v11 = vmul.f32 %v6056_v27, %v2688_v44  ;;  %v4621_v27 = vld [vmem:[%s8598_s8 + $0x9c0] sm:$0xff] }
 0x70e   :  { %v2700_v13 = vsel %vm2699_vm12, %v8033_v42, %v2698_v30  ;;  %v4601_v42 = vld [vmem:[%s8598_s8 + $0x920] sm:$0xff]  ;;  %v5935_v30 = vpack.c.bf16 %v4634_v9, %v4633_v16  ;;  %v4660_v9 = vld [vmem:[%s8598_s8 + $0xaf8] sm:$0xff] }
 0x70f   :  { %5888 = vmatpush3.bf16.msra.mxu0 %v5887_v31  ;;  %v2693_v45 = vsel %vm2692_vm10, %v2688_v44, %v2691_v11  ;;  %v8136_v22 = vsel %vm2701_vm15, %v2702_v18, %v2700_v13  ;;  %v4631_v44 = vld [vmem:[%s8598_s8 + $0xa10] sm:$0xff]  ;;  %v5903_v60 = vpack.c.bf16 %v4602_v63, %v4601_v42  ;;  %v3029_v31 = vmul.f32 %v7994_v14, %v8835_v62  ;;  %v4652_v14 = vld [vmem:[%s8598_s8 + $0xab8] sm:$0xff]  ;;  %v4654_v13 = vld [vmem:[%s8598_s8 + $0xac8] sm:$0xff] }
 0x710   :  { %v8098_v57 = vsel %vm2694_vm11, %v2695_v33, %v2693_v45  ;;  %5890 = vmatprep.subr.bf16.mxu0 %v5889_v34  ;;  %v5931_v1 = vpack.c.bf16 %v4632_v49, %v4631_v44  ;;  %v4622_v34 = vld [vmem:[%s8598_s8 + $0x9c8] sm:$0xff]  ;;  %v4635_v33 = vld [vmem:[%s8598_s8 + $0xa30] sm:$0xff]  ;;  %v4624_v45 = vld [vmem:[%s8598_s8 + $0x9d8] sm:$0xff]  ;;  %v5917_v42 = vpack.c.bf16 %v4626_v47, %v4625_v8 }
 0x711   :  { %3371 = vmatprep.mubr.f32.mxu1 %v8098_v57  ;;  %v3023_v10 = vmul.f32 %v8098_v57, %v8833_v17  ;;  %v5909_v11 = vpack.c.bf16 %v4622_v34, %v4621_v27  ;;  %v5939_v61 = vpack.c.bf16 %v4636_v12, %v4635_v33  ;;  %v5913_v24 = vpack.c.bf16 %v4624_v45, %v4623_v36  ;;  %v4607_v18 = vld [vmem:[%s8598_s8 + $0x950] sm:$0xff]  ;;  %v4609_v63 = vld [vmem:[%s8598_s8 + $0x960] sm:$0xff]  ;;  %v4610_v44 = vld [vmem:[%s8598_s8 + $0x968] sm:$0xff] }
 0x712   :  { %4695 = vmatmul.mubr.msk.f32.vlgmr.msra.gmra.mrb[44].mxu1 %vm60_vm9, %v7846_v43  ;;  %v4627_v49 = vld [vmem:[%s8598_s8 + $0x9f0] sm:$0xff]  ;;  %v5919_v56 = vpack.c.bf16 %v4610_v44, %v4609_v63  ;;  %v4677_v16 = vld [vmem:[%s8598_s8 + $0xb80] sm:$0xff] }
 0x713   :  { %5892 = vmatpush3.bf16.msra.mxu0 %v5891_v19  ;;  %5896 = vmatpush3.bf16.msra.mxu1 %v5895_v23  ;;  %v5937_v19 = vpack.c.bf16 %v4652_v14, %v4651_v37  ;;  %v4653_v23 = vld [vmem:[%s8598_s8 + $0xac0] sm:$0xff]  ;;  %v4643_v14 = vld [vmem:[%s8598_s8 + $0xa70] sm:$0xff] }
 0x714   :  { %3376 = vmatprep.mubr.f32.mxu1 %v8136_v22  ;;  %5898 = vmatprep.subr.bf16.mxu1 %v5897_v5  ;;  %v5911_v5 = vpack.c.bf16 %v4606_v39, %v4605_v35  ;;  %v5941_v21 = vpack.c.bf16 %v4654_v13, %v4653_v23  ;;  %v4644_v39 = vld [vmem:[%s8598_s8 + $0xa78] sm:$0xff]  ;;  %v4679_v33 = vld [vmem:[%s8598_s8 + $0xb90] sm:$0xff]  ;;  %v4685_v44 = vld [vmem:[%s8598_s8 + $0xbc0] sm:$0xff] }
 0x715   :  { %5926 = vmatprep.subr.bf16.mxu0 %v5925_v20  ;;  %v4608_v20 = vld [vmem:[%s8598_s8 + $0x958] sm:$0xff]  ;;  %v5955_v45 = vpack.c.bf16 %v4644_v39, %v4643_v14  ;;  %v4663_v13 = vld [vmem:[%s8598_s8 + $0xb10] sm:$0xff] }
 0x716   :  { %3447 = vmatmul.mubr.f32.vlgmr.msra.gmra.mrb[54].mxu0 %v3020_v3  ;;  %4696 = vmatmul.mubr.msk.f32.gmra.mrb[46].mxu1 %vm61_vm1, %v7851_v58  ;;  %v5915_v3 = vpack.c.bf16 %v4608_v20, %v4607_v18  ;;  %v4681_v18 = vld [vmem:[%s8598_s8 + $0xba0] sm:$0xff]  ;;  %v4682_v20 = vld [vmem:[%s8598_s8 + $0xba8] sm:$0xff]  ;;  %v4683_v47 = vld [vmem:[%s8598_s8 + $0xbb0] sm:$0xff] }
 0x717   :  { %3451 = vmatprep.mubr.f32.mxu0 %v3025_v53  ;;  %5900 = vmatpush3.bf16.msra.mxu1 %v5899_v38  ;;  %v4656_v38 = vld [vmem:[%s8598_s8 + $0xad8] sm:$0xff]  ;;  %v4639_v53 = vld [vmem:[%s8598_s8 + $0xa50] sm:$0xff]  ;;  %v5965_v8 = vpack.c.bf16 %v4682_v20, %v4681_v18 }
 0x718   :  { %5928 = vmatpush3.bf16.msra.mxu0 %v5927_v32  ;;  %3521 = vmatprep.mubr.f32.mxu1 %v3023_v10  ;;  %v5943_v32 = vpack.c.bf16 %v4638_v50, %v4637_v0  ;;  %v4658_v10 = vld [vmem:[%s8598_s8 + $0xae8] sm:$0xff]  ;;  %v3028_v50 = vmul.f32 %v7974_v48, %v8835_v62  ;;  %v4667_v63 = vld [vmem:[%s8598_s8 + $0xb30] sm:$0xff] }
 0x719   :  { %5902 = vmatprep.subr.bf16.mxu1 %v5901_v2  ;;  %5930 = vmatprep.subr.bf16.mxu0 %v5929_v51  ;;  %v5945_v2 = vpack.c.bf16 %v4656_v38, %v4655_v6  ;;  %v4640_v51 = vld [vmem:[%s8598_s8 + $0xa58] sm:$0xff]  ;;  %v5949_v46 = vpack.c.bf16 %v4658_v10, %v4657_v52  ;;  %v8836_v6 = vld [vmem:[#allocation46_spill] sm:$0xff]  ;;  %v4687_v10 = vld [vmem:[%s8598_s8 + $0xbd0] sm:$0xff] }
 0x71a   :  { %3452 = vmatmul.mubr.f32.gmra.mrb[56].mxu0 %v3024_v54  ;;  %v5947_v55 = vpack.c.bf16 %v4640_v51, %v4639_v53  ;;  %v4611_v54 = vld [vmem:[%s8598_s8 + $0x970] sm:$0xff]  ;;  %v3033_v38 = vmul.f32 %v8121_v25, %v8836_v6  ;;  %v4668_v25 = vld [vmem:[%s8598_s8 + $0xb38] sm:$0xff]  ;;  %v4686_v53 = vld [vmem:[%s8598_s8 + $0xbc8] sm:$0xff] }
 0x71b   :  { %5904 = vmatpush3.bf16.msra.mxu1 %v5903_v60  ;;  %3596 = vmatprep.mubr.f32.mxu0 %v3029_v31  ;;  %v5921_v60 = vpack.c.bf16 %v4628_v26, %v4627_v49  ;;  %v4678_v31 = vld [vmem:[%s8598_s8 + $0xb88] sm:$0xff]  ;;  %v4669_v26 = vld [vmem:[%s8598_s8 + $0xb40] sm:$0xff]  ;;  %v4691_v14 = vld [vmem:[%s8598_s8 + $0xbf0] sm:$0xff] }
 0x71c   :  { %5932 = vmatpush3.bf16.msra.mxu0 %v5931_v1  ;;  %5906 = vmatprep.subr.bf16.mxu1 %v5905_v41  ;;  %v4612_v1 = vld [vmem:[%s8598_s8 + $0x978] sm:$0xff]  ;;  %v4641_v41 = vld [vmem:[%s8598_s8 + $0xa60] sm:$0xff]  ;;  %v5957_v37 = vpack.c.bf16 %v4678_v31, %v4677_v16  ;;  %v8837_v51 = vld [vmem:[#allocation47_spill] sm:$0xff]  ;;  %v8842_v16 = vmov 0.0  }
 0x71d   :  { %5934 = vmatprep.subr.bf16.mxu0 %v5933_v59  ;;  %v4659_v59 = vld [vmem:[%s8598_s8 + $0xaf0] sm:$0xff]  ;;  %v5923_v27 = vpack.c.bf16 %v4612_v1, %v4611_v54  ;;  %v5951_v34 = vpack.c.bf16 %v4642_v29, %v4641_v41  ;;  %v8838_v49 = vmax.f32 %v8837_v51, 0.0  ;;  %v4670_v52 = vld [vmem:[%s8598_s8 + $0xb48] sm:$0xff]  ;;  %v4672_v29 = vld [vmem:[%s8598_s8 + $0xb58] sm:$0xff] }
 0x71e   :  { %v5953_v35 = vpack.c.bf16 %v4660_v9, %v4659_v59  ;;  %v5975_v1 = vpack.c.bf16 %v4670_v52, %v4669_v26  ;;  %v4689_v31 = vld [vmem:[%s8598_s8 + $0xbe0] sm:$0xff]  ;;  %v4690_v59 = vld [vmem:[%s8598_s8 + $0xbe8] sm:$0xff]  ;;  %v4675_v39 = vld [vmem:[%s8598_s8 + $0xb70] sm:$0xff] }
 0x71f   :  { %5908 = vmatpush3.bf16.msra.mxu1 %v5907_v15  ;;  %v4661_v15 = vld [vmem:[%s8598_s8 + $0xb00] sm:$0xff] }
 0x720   :  { %5936 = vmatpush3.bf16.msra.mxu0 %v5935_v30  ;;  %5910 = vmatprep.subr.bf16.mxu1 %v5909_v11  ;;  %v4662_v30 = vld [vmem:[%s8598_s8 + $0xb08] sm:$0xff]  ;;  %v8308_v11 = vsel %vm60_vm9, %v7846_v43, 0.0 }
 0x721   :  { %5938 = vmatprep.subr.bf16.mxu0 %v5937_v19  ;;  %v4680_v19 = vld [vmem:[%s8598_s8 + $0xb98] sm:$0xff]  ;;  %v3037_v43 = vld [vmem:[%s8597_s7 + $0xa8] sm:$0xff]  ;;  %v5959_v12 = vpack.c.bf16 %v4662_v30, %v4661_v15  ;;  %v3022_v36 = vmul.f32 %v8308_v11, %v8833_v17  ;;  %v3027_v17 = vmul.f32 %v8136_v22, %v8834_v28 }
 0x722   :  { %v5961_v23 = vpack.c.bf16 %v4680_v19, %v4679_v33  ;;  %v4692_v15 = vld [vmem:[%s8598_s8 + $0xbf8] sm:$0xff] }
 0x723   :  { %5912 = vmatpush3.bf16.msra.mxu1 %v5911_v5  ;;  %v4664_v5 = vld [vmem:[%s8598_s8 + $0xb18] sm:$0xff] }
 0x724   :  { %5940 = vmatpush3.bf16.msra.mxu0 %v5939_v61  ;;  %5914 = vmatprep.subr.bf16.mxu1 %v5913_v24  ;;  %v8336_v61 = vsel %vm61_vm1, %v7851_v58, 0.0  ;;  %v5989_v24 = vpack.c.bf16 %v3037_v43, %v3036_v7  ;;  %v5963_v0 = vpack.c.bf16 %v4664_v5, %v4663_v13  ;;  %v4676_v33 = vld [vmem:[%s8598_s8 + $0xb78] sm:$0xff]  ;;  %v3030_v7 = vmul.f32 %v8308_v11, %v8835_v62 }
 0x725   :  { %5942 = vmatprep.subr.bf16.mxu0 %v5941_v21  ;;  %v3026_v58 = vmul.f32 %v8336_v61, %v8834_v28  ;;  %v4666_v21 = vld [vmem:[%s8598_s8 + $0xb28] sm:$0xff]  ;;  %v4684_v28 = vld [vmem:[%s8598_s8 + $0xbb8] sm:$0xff]  ;;  %v5987_v19 = vpack.c.bf16 %v4676_v33, %v4675_v39  ;;  %v3035_v43 = vmul.f32 %v8136_v22, %v8836_v6 }
 0x726   :  { %v5967_v48 = vpack.c.bf16 %v4666_v21, %v4665_v4 }
 0x727   :  { %5916 = vmatpush3.bf16.msra.mxu1 %v5915_v3  ;;  %v3031_v3 = vmul.f32 %v8098_v57, %v8835_v62  ;;  %v3032_v57 = vmul.f32 %v7983_v40, %v8836_v6  ;;  %v5973_v40 = vpack.c.bf16 %v4686_v53, %v4685_v44  ;;  %v3851_v62 = vld [vmem:[%s8597_s7 + $0xc8] sm:$0xff] }
 0x728   :  { %5944 = vmatpush3.bf16.msra.mxu0 %v5943_v32  ;;  %5918 = vmatprep.subr.bf16.mxu1 %v5917_v42  ;;  %v3038_v32 = vld [vmem:[%s8597_s7 + $0xb0] sm:$0xf]  ;;  %v5969_v42 = vpack.c.bf16 %v4684_v28, %v4683_v47 }
 0x729   :  { %5946 = vmatprep.subr.bf16.mxu0 %v5945_v2  ;;  %v5971_v2 = vpack.c.bf16 %v4668_v25, %v4667_v63 }
 0x72b   :  { %5920 = vmatpush3.bf16.msra.mxu1 %v5919_v56  ;;  %v4688_v56 = vld [vmem:[%s8598_s8 + $0xbd8] sm:$0xff] }
 0x72c   :  { %5948 = vmatpush3.bf16.msra.mxu0 %v5947_v55  ;;  %5922 = vmatprep.subr.bf16.mxu1 %v5921_v60  ;;  %v8839_v55 = vmov 0.0|0.0   ;;  %v8840_v60 = vld [vmem:[#allocation48_spill] sm:$0xff]  ;;  %v5977_v41 = vpack.c.bf16 %v4688_v56, %v4687_v10 }
 0x72d   :  { %5950 = vmatprep.subr.bf16.mxu0 %v5949_v46  ;;  %v8841_v54 = vmax.f32 %v8840_v60, 0.0  ;;  %v4671_v46 = vld [vmem:[%s8598_s8 + $0xb50] sm:$0xff] }
 0x72e   :  { %v5979_v9 = vpack.c.bf16 %v4672_v29, %v4671_v46 }
 0x72f   :  { %5924 = vmatpush3.bf16.msra.mxu1 %v5923_v27  ;;  %v5981_v27 = vpack.c.bf16 %v4690_v59, %v4689_v31 }
 0x730   :  { %5952 = vmatpush3.bf16.msra.mxu0 %v5951_v34  ;;  %5958 = vmatprep.subr.bf16.mxu1 %v5957_v37  ;;  %v4673_v34 = vld [vmem:[%s8598_s8 + $0xb60] sm:$0xff]  ;;  %v4674_v37 = vld [vmem:[%s8598_s8 + $0xb68] sm:$0xff] }
 0x731   :  { %5954 = vmatprep.subr.bf16.mxu0 %v5953_v35  ;;  %v5983_v30 = vpack.c.bf16 %v4674_v37, %v4673_v34  ;;  %v5985_v35 = vpack.c.bf16 %v4692_v15, %v4691_v14  ;;  %v4700_v37 = vld [vmem:[%s8597_s7 + $0xb8] ss:$0 sm:$0xff] }
 0x732   :  { %3522 = vmatmul.mubr.f32.vlgmr.msra.gmra.mrb[48].mxu1 %v3022_v36  ;;  %v3850_v36 = vld [vmem:[%s8597_s7 + $0xc0] sm:$0xff] }
 0x733   :  { %3526 = vmatprep.mubr.f32.mxu1 %v3027_v17  ;;  %5960 = vmatpush3.bf16.msra.mxu1 %v5959_v12  ;;  %v3034_v12 = vmul.f32 %v8336_v61, %v8836_v6  ;;  %v5998_v11 = vpack.c.bf16 %v3851_v62, %v3850_v36  ;;  %v3852_v36 = vld [vmem:[%s8597_s7 + $0xd0] sm:$0xf]  ;;  %v3935_v62 = vld [vmem:[%s8597_s7 + $0xe0] sm:$0xff] }
 0x734   :  { %5956 = vmatpush3.bf16.msra.mxu0 %v5955_v45  ;;  %5962 = vmatprep.subr.bf16.mxu1 %v5961_v23 }
 0x735   :  { %5990 = vmatprep.subr.bf16.mxu0 %v5989_v24 }
 0x736   :  { %3527 = vmatmul.mubr.f32.gmra.mrb[50].mxu1 %v3026_v58 }
 0x737   :  { %3597 = vmatmul.mubr.f32.vlgmr.msra.gmra.mrb[58].mxu0 %v3028_v50  ;;  %5964 = vmatpush3.bf16.msra.mxu1 %v5963_v0 }
 0x738   :  { %3601 = vmatprep.mubr.f32.mxu0 %v3033_v38  ;;  %3671 = vmatprep.mubr.f32.mxu1 %v3031_v3 }
 0x739   :  { %5992 = vmatpush3.bf16.msra.mxu0 %v5989_v24  ;;  %5966 = vmatprep.subr.bf16.mxu1 %v5965_v8 }
 0x73a   :  { %5476 = vmatprep.subr.msk.mxu0 %vm342_vm0, %v3038_v32 }
 0x73b   :  { %3602 = vmatmul.mubr.f32.gmra.mrb[60].mxu0 %v3032_v57  ;;  %5968 = vmatpush3.bf16.msra.mxu1 %v5967_v48 }
 0x73c   :  { %5478 = vmatprep.mubr.msk.f32.mxu0 %vm521_vm6, %v8838_v49  ;;  %5970 = vmatprep.subr.bf16.mxu1 %v5969_v42 }
 0x73d   :  { %5477 = vmatpush3.msk.msra.mxu0 %vm342_vm0, %v3038_v32 }
 0x73e   :  { %5993 = vmatprep.subr.bf16.mxu0 %v8839_v55 }
 0x73f   :  { %5479 = vmatmul.mubr.msk.f32.vlgmr.msra.gmra.mrb[62].mxu0 %vm521_vm6, %v8841_v54  ;;  %5972 = vmatpush3.bf16.msra.mxu1 %v5971_v2 }
 0x740   :  { %5974 = vmatprep.subr.bf16.mxu1 %v5973_v40  ;;  %5485 = vmatprep.mubr.msk.f32.mxu0 %vm6088_vm3, %v8842_v16 }
 0x743   :  { %5976 = vmatpush3.bf16.msra.mxu1 %v5975_v1 }
 0x744   :  { %5978 = vmatprep.subr.bf16.mxu1 %v5977_v41 }
 0x747   :  { %5980 = vmatpush3.bf16.msra.mxu1 %v5979_v9 }
 0x748   :  { %5982 = vmatprep.subr.bf16.mxu1 %v5981_v27 }
 0x74b   :  { %5984 = vmatpush3.bf16.msra.mxu1 %v5983_v30 }
 0x74c   :  { %5986 = vmatprep.subr.bf16.mxu1 %v5985_v35 }
 0x74f   :  { %5988 = vmatpush3.bf16.msra.mxu1 %v5987_v19  ;;  %v49_v19 = vld [vmem:[%s8594_s4] sm:$0x1]  ;;  %s6062_s4 = scalar_lea.vmem %s4436_s3, 32 }
 0x750   :  { %5997 = vmatprep.subr.bf16.mxu1 %v8839_v55  ;;  %p6063_p0 = scmp.ne.s32.totalorder %s4436_s3, %s6062_s4  ;;  %p6068_p2 = scmp.lt.s32.totalorder %s6062_s4, %s6062_s4 }
 0x752   :  { %3672 = vmatmul.mubr.f32.vlgmr.msra.gmra.mrb[52].mxu1 %v3030_v7  ;;  %p6069_p3 = por %p6068_p2, %p6067_p1 }
 0x753   :  { %3676 = vmatprep.mubr.f32.mxu1 %v3035_v43  ;;  %5999 = vmatpush3.bf16.msra.mxu1 %v5998_v11  ;;  %v50_v43 = vunpack.c.l.bf16 %v49_v19  ;;  %v3936_v11 = vld [vmem:[%s8597_s7 + $0xe8] sm:$0xff] }
 0x754   :  { %5492 = vmatprep.subr.mxu1 %v8842_v16  ;;  %p6070_p4 = pnand %p6069_p3, %p6063_p0 }
 0x756   :  { %3677 = vmatmul.mubr.f32.gmra.mrb[54].mxu1 %v3034_v12  ;;  %v4715_v12 = vld [vmem:[%s8597_s7 + $0x1a8] ss:$0 sm:$0xff] }
 0x757   :  { %5494 = vmatprep.mubr.msk.f32.mxu1 %vm6088_vm3, %v8842_v16  ;;  %5493 = vmatpush3.msk.msra.mxu1 %vm342_vm0, %v3852_v36  ;;  %vm3944_vm0 = vcmask 261120  }
 0x758   :  { %6006 = vmatprep.subr.bf16.mxu1 %v8839_v55 }
 0x7c9   :  { %v5058_v22 = vpop.f32.mrb[50].mxu0 }
 0x7ca   :  { %v5059_v45 = vpop.f32.mrb[51].mxu0 }
 0x7cb   :  { %v5060_v23 = vadd.f32 %v5059_v45, %v5058_v22  ;;  %v6001_v22 = vpack.c.bf16 %v3936_v11, %v3935_v62  ;;  %v4020_v45 = vld [vmem:[%s8597_s7 + $0x128] sm:$0xff] }
 0x7cd   :  { %v5061_v13 = vpop.f32.mrb[52].mxu0 }
 0x7ce   :  { %v5062_v5 = vpop.f32.mrb[53].mxu0 }
 0x7cf   :  { %v5063_v61 = vadd.f32 %v5062_v5, %v5061_v13 }
 0x7e5   :  { %v5096_v17 = vpop.f32.mrb[44].mxu1 }
 0x7e6   :  { %v5097_v24 = vpop.f32.mrb[45].mxu1 }
 0x7e7   :  { %v5098_v18 = vadd.f32 %v5097_v24, %v5096_v17  ;;  %v4022_v17 = vld [vmem:[%s8597_s7 + $0x138] sm:$0xff]  ;;  %v4019_v24 = vld [vmem:[%s8595_s5] sm:$0x3] }
 0x7e9   :  { %v3374_v20 = vadd.f32 %v5098_v18, %v5060_v23  ;;  %v5134_v0 = vpop.f32.mrb[54].mxu0  ;;  %v5099_v58 = vpop.f32.mrb[46].mxu1  ;;  %v4021_v23 = vld [vmem:[%s8597_s7 + $0x130] sm:$0xff] }
 0x7ea   :  { %v5135_v4 = vpop.f32.mrb[55].mxu0  ;;  %v5100_v21 = vpop.f32.mrb[47].mxu1  ;;  %v6007_v13 = vpack.c.bf16 %v4021_v23, %v4020_v45  ;;  %v3937_v18 = vld [vmem:[%s8597_s7 + $0xf0] sm:$0xff] }
 0x7eb   :  { %v5136_v50 = vadd.f32 %v5135_v4, %v5134_v0  ;;  %v5101_v8 = vadd.f32 %v5100_v21, %v5099_v58  ;;  %v4703_v58 = vld [vmem:[%s8597_s7 + $0xd8] ss:$0 sm:$0xff]  ;;  %v4102_v4 = vld [vmem:[%s8597_s7 + $0x148] sm:$0xff]  ;;  %v4103_v21 = vld [vmem:[%s8597_s7 + $0x150] sm:$0xff] }
 0x7ed   :  { %v3449_v47 = vadd.f32 %v5136_v50, %v3374_v20  ;;  %v3379_v28 = vadd.f32 %v5101_v8, %v5063_v61  ;;  %v5137_v6 = vpop.f32.mrb[56].mxu0  ;;  %v3938_v20 = vld [vmem:[%s8597_s7 + $0xf8] sm:$0xff] }
 0x7ee   :  { %v5138_v38 = vpop.f32.mrb[57].mxu0  ;;  %v6004_v0 = vpack.c.bf16 %v3938_v20, %v3937_v18 }
 0x7ef   :  { %v5139_v3 = vadd.f32 %v5138_v38, %v5137_v6  ;;  %v4104_v38 = vld [vmem:[%s8597_s7 + $0x158] sm:$0xff] }
 0x7f1   :  { %v3454_v48 = vadd.f32 %v5139_v3, %v3379_v28  ;;  %v6010_v28 = vpack.c.bf16 %v4103_v21, %v4102_v4  ;;  %v4105_v3 = vld [vmem:[%s8597_s7 + $0x160] sm:$0xff] }
 0x805   :  { %v5172_v32 = vpop.f32.mrb[48].mxu1 }
 0x806   :  { %v5173_v42 = vpop.f32.mrb[49].mxu1 }
 0x807   :  { %v5174_v63 = vadd.f32 %v5173_v42, %v5172_v32  ;;  %v6013_v42 = vpack.c.bf16 %v4105_v3, %v4104_v38 }
 0x809   :  { %v3524_v25 = vadd.f32 %v5174_v63, %v3449_v47  ;;  %v5175_v57 = vpop.f32.mrb[50].mxu1 }
 0x80a   :  { %v5210_v44 = vpop.f32.mrb[58].mxu0  ;;  %v5176_v53 = vpop.f32.mrb[51].mxu1 }
 0x80b   :  { %v5177_v2 = vadd.f32 %v5176_v53, %v5175_v57  ;;  %v5211_v51 = vpop.f32.mrb[59].mxu0  ;;  %v4185_v57 = vld [vmem:[%s8597_s7 + $0x108] sm:$0xff] }
 0x80c   :  { %v5212_v49 = vadd.f32 %v5211_v51, %v5210_v44  ;;  %v4186_v44 = vld [vmem:[%s8597_s7 + $0x110] sm:$0xff] }
 0x80d   :  { %v3529_v40 = vadd.f32 %v5177_v2, %v3454_v48  ;;  %v4708_v48 = vld [vmem:[%s8597_s7 + $0x140] ss:$0 sm:$0xff]  ;;  %v6022_v2 = vpack.c.bf16 %v4186_v44, %v4185_v57  ;;  %v4189_v51 = vld [vmem:[%s8597_s7 + $0x170] sm:$0xff] }
 0x80e   :  { %v3599_v26 = vadd.f32 %v5212_v49, %v3524_v25  ;;  %v5213_v52 = vpop.f32.mrb[60].mxu0  ;;  %v4190_v49 = vld [vmem:[%s8597_s7 + $0x178] sm:$0xff] }
 0x80f   :  { %v5214_v10 = vpop.f32.mrb[61].mxu0 }
 0x810   :  { %v5215_v56 = vadd.f32 %v5214_v10, %v5213_v52  ;;  %v4188_v52 = vld [vmem:[%s8597_s7 + $0x120] sm:$0xff] }
 0x811   :  { %v4191_v10 = vld [vmem:[%s8597_s7 + $0x180] sm:$0xff] }
 0x812   :  { %v3604_v60 = vadd.f32 %v5215_v56, %v3529_v40  ;;  %v5480_v54 = vpop.f32.mrb[62].mxu0  ;;  %v6016_v40 = vpack.c.bf16 %v4190_v49, %v4189_v51 }
 0x813   :  { %v3756_v1 = vpop.f32.mrb[63].mxu0 }
 0x825   :  { %v5248_v41 = vpop.f32.mrb[52].mxu1 }
 0x826   :  { %v5249_v46 = vpop.f32.mrb[53].mxu1 }
 0x827   :  { %v5250_v29 = vadd.f32 %v5249_v46, %v5248_v41 }
 0x829   :  { %v3674_v31 = vadd.f32 %v5250_v29, %v3599_v26  ;;  %v5251_v59 = vpop.f32.mrb[54].mxu1  ;;  %v4187_v26 = vld [vmem:[%s8597_s7 + $0x118] sm:$0xff] }
 0x82a   :  { %v5252_v9 = vpop.f32.mrb[55].mxu1  ;;  %v6025_v56 = vpack.c.bf16 %v4188_v52, %v4187_v26 }
 0x82b   :  { %v3757_v27 = vadd.f32 %v3756_v1, %v3674_v31  ;;  %v5253_v34 = vadd.f32 %v5252_v9, %v5251_v59  ;;  %v4706_v1 = vld [vmem:[%s8597_s7 + $0x100] ss:$0 sm:$0xff]  ;;  %v4710_v59 = vld [vmem:[%s8597_s7 + $0x168] ss:$0 sm:$0xff] }
 0x82d   :  { %v3679_v14 = vadd.f32 %v5253_v34, %v3604_v60  ;;  %v3770_v15 = vadd.f32 %v4700_v37, %v3757_v27  ;;  %v4192_v60 = vld [vmem:[%s8597_s7 + $0x188] sm:$0xff] }
 0x82f   :  { %v3762_v30 = vadd.f32 %v5480_v54, %v3679_v14  ;;  %v3772_v39 = vmax.f32 %v3770_v15, 0.0  ;;  %v6019_v54 = vpack.c.bf16 %v4192_v60, %v4191_v10  ;;  %v4347_v14 = vld [vmem:[%s8597_s7 + $0x1a0] sm:$0xff] }
 0x831   :  { %v3771_v35 = vadd.f32 %v4700_v37, %v3762_v30 }
 0x833   :  { %v3773_v33 = vmax.f32 %v3771_v35, 0.0 }
 0x835   :  { %v5994_v7 = vpack.c.bf16 %v3773_v33, %v3772_v39  ;;  %v4714_v33 = vld [vmem:[%s8597_s7 + $0x190] ss:$0 sm:$0xff] }
 0x837   :  { %5996 = vmatpush3.bf16.msk.msra.mxu0 %vm6163_vm2, %v5994_v7  ;;  %vm4353_vm2 = vcmask 130048  }
 0x838   :  { %6000 = vmatprep.subr.bf16.mxu0 %v8839_v55 }
 0x83a   :  { %5486 = vmatmul.mubr.msk.f32.vlgmr.msra.gmra.mrb[64].mxu0 %vm332_vm4, %v50_v43 }
 0x83b   :  { %5505 = vmatprep.mubr.msk.f32.mxu0 %vm6088_vm3, %v8842_v16  ;;  %6002 = vmatpush3.bf16.msra.mxu0 %v6001_v22 }
 0x83c   :  { %6003 = vmatprep.subr.bf16.mxu0 %v8839_v55 }
 0x83f   :  { %6005 = vmatpush3.bf16.msra.mxu0 %v6004_v0 }
 0x840   :  { %6009 = vmatprep.subr.bf16.mxu0 %v8839_v55 }
 0x90d   :  { %v3846_v5 = vpop.f32.mrb[64].mxu0 }
 0x90e   :  { %5495 = vmatmul.mubr.msk.f32.vlgmr.msra.gmra.mrb[56].mxu1 %vm521_vm6, %v3846_v5  ;;  %v5487_v61 = vpop.f32.mrb[65].mxu0 }
 0x90f   :  { %6008 = vmatpush3.bf16.msra.mxu1 %v6007_v13  ;;  %5514 = vmatprep.mubr.msk.f32.mxu1 %vm6088_vm3, %v8842_v16 }
 0x910   :  { %5512 = vmatprep.subr.mxu1 %v8842_v16 }
 0x913   :  { %5513 = vmatpush3.msra.mxu1 %v4022_v17 }
 0x914   :  { %5515 = vmatmul.mubr.msk.f32.vlgmr.msra.gmra.mrb[58].mxu1 %vm52_vm5, %v4019_v24  ;;  %6015 = vmatprep.subr.bf16.mxu1 %v8839_v55 }
 0x915   :  { %5536 = vmatprep.mubr.msk.f32.mxu1 %vm6088_vm3, %v8842_v16  ;;  %6017 = vmatpush3.bf16.msra.mxu1 %v6016_v40 }
 0x916   :  { %6018 = vmatprep.subr.bf16.mxu1 %v8839_v55 }
 0x919   :  { %6020 = vmatpush3.bf16.msra.mxu1 %v6019_v54 }
 0x91a   :  { %6027 = vmatprep.subr.bf16.mxu1 %v8839_v55 }
 0x9e1   :  { %v3930_v50 = vpop.f32.mrb[56].mxu1 }
 0x9e2   :  { %v3931_v8 = vadd.f32 %v4703_v58, %v3930_v50  ;;  %v5496_v47 = vpop.f32.mrb[57].mxu1 }
 0x9e4   :  { %v3934_v6 = vmax.f32 %v3931_v8, 0.0 }
 0x9e6   :  { %5506 = vmatmul.mubr.msk.f32.vlgmr.msra.gmra.mrb[66].mxu0 %vm3944_vm0, %v3934_v6 }
 0x9e7   :  { %6011 = vmatpush3.bf16.msra.mxu0 %v6010_v28  ;;  %v4097_v32 = vpop.f32.mrb[58].mxu1  ;;  %5525 = vmatprep.mubr.msk.f32.mxu0 %vm6088_vm3, %v8842_v16 }
 0x9e8   :  { %v4098_v63 = vadd.f32 %v4708_v48, %v4097_v32  ;;  %6012 = vmatprep.subr.bf16.mxu0 %v8839_v55  ;;  %v5516_v25 = vpop.f32.mrb[59].mxu1 }
 0x9ea   :  { %v4101_v53 = vmax.f32 %v4098_v63, 0.0 }
 0x9eb   :  { %6014 = vmatpush3.bf16.msra.mxu0 %v6013_v42 }
 0x9ec   :  { %6021 = vmatprep.subr.bf16.mxu0 %v8839_v55 }
 0x9ee   :  { %5526 = vmatmul.mubr.msk.f32.vlgmr.msra.gmra.mrb[68].mxu0 %vm3944_vm0, %v4101_v53 }
 0x9ef   :  { %6023 = vmatpush3.bf16.msra.mxu0 %v6022_v2  ;;  %5547 = vmatprep.mubr.msk.f32.mxu0 %vm6088_vm3, %v8842_v16 }
 0x9f0   :  { %6024 = vmatprep.subr.bf16.mxu0 %v8839_v55  ;;  %v4346_v55 = vld [vmem:[%s8597_s7 + $0x198] sm:$0xff] }
 0x9f1   :  { %v6028_v15 = vpack.c.bf16 %v4347_v14, %v4346_v55 }
 0x9f3   :  { %6026 = vmatpush3.bf16.msra.mxu0 %v6025_v56 }
 0xab9   :  { %v4014_v41 = vpop.f32.mrb[66].mxu0 }
 0xaba   :  { %v4015_v46 = vadd.f32 %v4706_v1, %v4014_v41  ;;  %v5507_v29 = vpop.f32.mrb[67].mxu0 }
 0xabc   :  { %v4018_v31 = vmax.f32 %v4015_v46, 0.0 }
 0xabe   :  { %5548 = vmatmul.mubr.msk.f32.vlgmr.msra.gmra.mrb[70].mxu0 %vm3944_vm0, %v4018_v31 }
 0xac1   :  { %v4180_v9 = vpop.f32.mrb[68].mxu0 }
 0xac2   :  { %v4181_v27 = vadd.f32 %v4710_v59, %v4180_v9  ;;  %v5527_v34 = vpop.f32.mrb[69].mxu0 }
 0xac4   :  { %v4184_v37 = vmax.f32 %v4181_v27, 0.0 }
 0xac6   :  { %5537 = vmatmul.mubr.msk.f32.vlgmr.msra.gmra.mrb[60].mxu1 %vm3944_vm0, %v4184_v37 }
 0xac7   :  { %5554 = vmatprep.mubr.msk.f32.mxu1 %vm6088_vm3, %v8842_v16  ;;  %6029 = vmatpush3.bf16.msra.mxu1 %v6028_v15  ;;  %vm4427_vm3 = vcmask 50176  }
 0xb91   :  { %v4335_v30 = vpop.f32.mrb[70].mxu0 }
 0xb92   :  { %v5549_v35 = vpop.f32.mrb[71].mxu0 }
 0xb99   :  { %v4262_v39 = vpop.f32.mrb[60].mxu1 }
 0xb9a   :  { %v4336_v19 = vadd.f32 %v4335_v30, %v4262_v39  ;;  %v5538_v7 = vpop.f32.mrb[61].mxu1 }
 0xb9c   :  { %v4344_v16 = vadd.f32 %v4714_v33, %v4336_v19 }
 0xb9e   :  { %v4345_v43 = vmax.f32 %v4344_v16, 0.0 }
 0xba0   :  { %5555 = vmatmul.mubr.msk.f32.vlgmr.msra.gmra.mrb[62].mxu1 %vm4353_vm2, %v4345_v43 }
 0xc73   :  { %v4423_v36 = vpop.f32.mrb[62].mxu1 }
 0xc74   :  { %v4424_v62 = vadd.f32 %v4715_v12, %v4423_v36  ;;  %v5556_v11 = vpop.f32.mrb[63].mxu1 }
 0xc76   :  { %4428 = vst.msk [vmem:[#allocation3] sm:$0x3] %vm4427_vm3, %v4424_v62 }
 0xc77   :  { %6073 = shalt.err (!%p6070_p4)
}
 0xc78   :  { %s6074_s20 = scalar_lea.hbm %s8599_s9, 32 }
 0xc79   :  { %p6075_p5 = scmp.ne.s32.totalorder %s8599_s9, %s6074_s20  ;;  %p6078_p6 = scmp.lt.u32.totalorder %s6074_s20, %s8599_s9 }
 0xc7b   :  { %p6080_p7 = pnand %p6078_p6, %p6075_p5 }
 0xc7d   :  { %6083 = shalt.err (!%p6080_p7)
}
 0xc7e   :  { %4438 = dma.vmem_to_hbm [thread:$0]  %s4436_s3, 32, %s8599_s9, [#allocation4]  }
 0xc7f   :  { %6084 = dma.done.wait [#allocation4], 32  }
 0xc80   :  { %6085 = vsyncadd [#allocation4], 4294967264 }
 0xc81   :  { %4442 = vsyncpa [#allocation4], 1 }

</bundles_post_ra>
